<compile_context>
chip_gen: v5e
topology: v5e:2x2
jax: 0.10.0
libtpu: 0.0.40
codegen_flags: <defaults>
</compile_context>

<pallas_src>
import jax
import jax.numpy as jnp
from jax.experimental import pallas as pl
from jax.experimental.pallas import tpu as pltpu


def _make_rcu_kernel(H, W, C):
    HW = H * W
    P = W + 1  # zero rows prepended/appended to the flattened image

    def conv3x3(y, wk_ref, b_ref, lmask, rmask):
        # y      : (HW, C)  f32 activation (already ReLU'd, so pad zeros are fine)
        # wk_ref : (3, 3C, C) bf16 — for each output row kh, the 3 kw taps
        #          stacked along the contraction axis.
        # b_ref  : (1, C)  f32 bias.
        # lmask  : (HW, 1) f32, zero where col == W-1 (feeds the kw=0 taps).
        # rmask  : (HW, 1) f32, zero where col == 0   (feeds the kw=2 taps).
        yl = y * lmask                                      # hoisted: 1x per conv
        yr = y * rmask                                      # hoisted: 1x per conv
        zpad = jnp.zeros((P, C), jnp.float32)
        ycp = jnp.concatenate([zpad, y, zpad], axis=0)      # (HW + 2P, C)
        ylp = jnp.concatenate([zpad, yl, zpad], axis=0)
        yrp = jnp.concatenate([zpad, yr, zpad], axis=0)

        acc = None
        for kh in range(3):
            base = P + (kh - 1) * W                          # static offsets
            patch = jnp.concatenate(
                [ylp[base - 1:base - 1 + HW, :],             # kw = 0 (left)
                 ycp[base:base + HW, :],                     # kw = 1 (center)
                 yrp[base + 1:base + 1 + HW, :]],            # kw = 2 (right)
                axis=-1).astype(jnp.bfloat16)                # (HW, 3C) bf16
            part = jnp.dot(patch, wk_ref[kh],
                           preferred_element_type=jnp.float32)
            acc = part if acc is None else acc + part
        return acc + b_ref[...]                              # bias added once

    def kernel(x_ref, w1_ref, b1_ref, w2_ref, b2_ref, wm_ref, o_ref):
        x = x_ref[0].astype(jnp.float32)                     # (HW, C)
        lmask = wm_ref[:, 0:1]                               # (HW, 1)
        rmask = wm_ref[:, 1:2]                               # (HW, 1)
        y = jnp.maximum(x, 0.0)
        y = conv3x3(y, w1_ref, b1_ref, lmask, rmask)
        y = jnp.maximum(y, 0.0)
        y = conv3x3(y, w2_ref, b2_ref, lmask, rmask)
        o_ref[0] = (y + x).astype(o_ref.dtype)

    return kernel


def residual_conv_unit(x, w1, b1, w2, b2):
    """ResidualConvUnit.forward.

    x      : [B, C, H, W]   (NCHW, like PyTorch)
    w1, w2 : [C, C, 3, 3]   (PyTorch Conv2d OIHW weight layout)
    b1, b2 : [C]
    returns [B, C, H, W]
    """
    B, C, H, W = x.shape
    HW = H * W

    # TODO(synk): the NCHW<->channels-last transposes below each cost an extra
    # HBM round trip; keep the surrounding DPT block channels-last (or fuse the
    # neighbouring ops into this pallas_call) so they are paid only once.
    x_flat = jnp.transpose(x, (0, 2, 3, 1)).reshape(B, HW, C)

    def pack(w):
        # OIHW -> (kh, kw, Cin, Cout) -> (3, 3*Cin, Cout), bf16 for the MXU.
        return (jnp.transpose(w, (2, 3, 1, 0))
                .reshape(3, 3 * C, C).astype(jnp.bfloat16))

    w1p, w2p = pack(w1), pack(w2)
    b1r = b1.reshape(1, C).astype(jnp.float32)
    b2r = b2.reshape(1, C).astype(jnp.float32)

    # Column masks for the horizontal (W) boundary, packed into one operand.
    col = jnp.arange(HW, dtype=jnp.int32) % W
    wmask = jnp.stack(
        [(col != W - 1).astype(jnp.float32),   # stream feeding the kw=0 taps
         (col != 0).astype(jnp.float32)],      # stream feeding the kw=2 taps
        axis=-1)                               # (HW, 2) f32

    kernel = _make_rcu_kernel(H, W, C)
    itemsize = jnp.dtype(x.dtype).itemsize

    # VMEM budget: double-buffered x/out blocks + packed bf16 weights +
    # mask block + in-kernel temporaries (padded streams, patches, accumulators).
    est = (4 * HW * C * 4            # x/out blocks, double buffered, f32
           + 4 * 9 * C * C * 2       # two packed weights, double buffered, bf16
           + 2 * HW * 128 * 4        # lane-padded mask block, double buffered
           + 12 * HW * C * 4)        # in-kernel temporaries
    vmem_limit = int(min(64 * 2 ** 20, max(32 * 2 ** 20, 2 * est)))

    out_flat = pl.pallas_call(
        kernel,
        out_shape=jax.ShapeDtypeStruct((B, HW, C), x.dtype),
        grid=(B,),
        in_specs=[
            pl.BlockSpec((1, HW, C), lambda b: (b, 0, 0)),
            pl.BlockSpec((3, 3 * C, C), lambda b: (0, 0, 0)),
            pl.BlockSpec((1, C), lambda b: (0, 0)),
            pl.BlockSpec((3, 3 * C, C), lambda b: (0, 0, 0)),
            pl.BlockSpec((1, C), lambda b: (0, 0)),
            pl.BlockSpec((HW, 2), lambda b: (0, 0)),
        ],
        out_specs=pl.BlockSpec((1, HW, C), lambda b: (b, 0, 0)),
        compiler_params=pltpu.CompilerParams(
            dimension_semantics=("parallel",),
            vmem_limit_bytes=vmem_limit,
        ),
        cost_estimate=pl.CostEstimate(
            flops=int(2 * 2 * B * HW * 9 * C * C),
            transcendentals=0,
            bytes_accessed=int(2 * B * HW * C * itemsize   # x in + out
                               + 2 * 9 * C * C * 2         # bf16 weights
                               + 2 * C * 4                 # biases
                               + HW * 2 * 4),               # packed masks
        ),
    )(x_flat, w1p, b1r, w2p, b2r, wmask)

    # Back to NCHW to match the PyTorch module's output layout.
    return jnp.transpose(out_flat.reshape(B, H, W, C), (0, 3, 1, 2))


def _reference_rcu(x, w1, b1, w2, b2):
    """Pure-JAX (XLA, f32) reference of the PyTorch ResidualConvUnit forward."""
    def conv(y, w, b):
        out = jax.lax.conv_general_dilated(
            y, w, window_strides=(1, 1), padding=((1, 1), (1, 1)),
            dimension_numbers=("NCHW", "OIHW", "NCHW"))
        return out + b.reshape(1, -1, 1, 1)

    y = jnp.maximum(x, 0.0)
    y = conv(y, w1, b1)
    y = jnp.maximum(y, 0.0)
    y = conv(y, w2, b2)
    return y + x


if __name__ == "__main__":
    # Small shapes consistent with the module: embed_size=32, 16x16 feature map.
    B, C, H, W = 2, 32, 16, 16

    key = jax.random.PRNGKey(0)
    k1, k2, k3, k4, k5 = jax.random.split(key, 5)
    scale = (C * 9) ** -0.5
    x = jax.random.normal(k1, (B, C, H, W), dtype=jnp.float32)
    w1 = jax.random.normal(k2, (C, C, 3, 3), dtype=jnp.float32) * scale
    b1 = jax.random.normal(k3, (C,), dtype=jnp.float32) * 0.1
    w2 = jax.random.normal(k4, (C, C, 3, 3), dtype=jnp.float32) * scale
    b2 = jax.random.normal(k5, (C,), dtype=jnp.float32) * 0.1

    out = residual_conv_unit(x, w1, b1, w2, b2)
    out = jax.block_until_ready(out)

    ref = _reference_rcu(x, w1, b1, w2, b2)
    assert out.shape == (B, C, H, W), out.shape
    # bf16 matmul operands (f32 accumulation) -> looser tolerance vs f32 ref.
    max_err = float(jnp.max(jnp.abs(out - ref)))
    assert jnp.allclose(out, ref, atol=5e-2, rtol=5e-2), f"max abs err {max_err}"

    print("KERNEL_OK")
</pallas_src>

<mosaic_0001>
module attributes {stable_mosaic.version = 11 : i64} {
  func.func @kernel(%arg0: i32, %arg1: memref<1x256x32xf32, #tpu.memory_space<vmem>>, %arg2: memref<3x96x32xbf16, #tpu.memory_space<vmem>>, %arg3: memref<1x32xf32, #tpu.memory_space<vmem>>, %arg4: memref<3x96x32xbf16, #tpu.memory_space<vmem>>, %arg5: memref<1x32xf32, #tpu.memory_space<vmem>>, %arg6: memref<256x2xf32, #tpu.memory_space<vmem>>, %arg7: memref<1x256x32xf32, #tpu.memory_space<vmem>>) attributes {dimension_semantics = [#tpu.dimension_semantics<parallel>], iteration_bounds = array<i64: 2>, scalar_prefetch = 0 : i64, scratch_operands = 0 : i64, tpu.core_type = #tpu.core_type<tc>, window_params = [{transform_indices = @transform_0, window_bounds = array<i64: 1, 256, 32>}, {pipeline_mode = #tpu.pipeline_mode<synchronous>, transform_indices = @transform_1, window_bounds = array<i64: 3, 96, 32>}, {pipeline_mode = #tpu.pipeline_mode<synchronous>, transform_indices = @transform_2, window_bounds = array<i64: 1, 32>}, {pipeline_mode = #tpu.pipeline_mode<synchronous>, transform_indices = @transform_3, window_bounds = array<i64: 3, 96, 32>}, {pipeline_mode = #tpu.pipeline_mode<synchronous>, transform_indices = @transform_4, window_bounds = array<i64: 1, 32>}, {pipeline_mode = #tpu.pipeline_mode<synchronous>, transform_indices = @transform_5, window_bounds = array<i64: 256, 2>}, {transform_indices = @transform_6, window_bounds = array<i64: 1, 256, 32>}]} {
    %c0 = arith.constant 0 : index
    %c0_0 = arith.constant 0 : index
    %c0_1 = arith.constant 0 : index
    %0 = vector.load %arg1[%c0, %c0_0, %c0_1] : memref<1x256x32xf32, #tpu.memory_space<vmem>>, vector<1x256x32xf32>
    %1 = vector.shape_cast %0 : vector<1x256x32xf32> to vector<256x32xf32>
    %c0_2 = arith.constant 0 : index
    %c0_3 = arith.constant 0 : index
    %2 = vector.load %arg6[%c0_2, %c0_3] : memref<256x2xf32, #tpu.memory_space<vmem>>, vector<256x1xf32>
    %c0_4 = arith.constant 0 : index
    %c1 = arith.constant 1 : index
    %3 = vector.load %arg6[%c0_4, %c1] : memref<256x2xf32, #tpu.memory_space<vmem>>, vector<256x1xf32>
    %cst = arith.constant 0.000000e+00 : f32
    %4 = vector.broadcast %cst : f32 to vector<256x32xf32>
    %5 = arith.maximumf %1, %4 : vector<256x32xf32>
    %6 = vector.broadcast %2 : vector<256x1xf32> to vector<256x32xf32>
    %7 = arith.mulf %5, %6 : vector<256x32xf32>
    %8 = vector.broadcast %3 : vector<256x1xf32> to vector<256x32xf32>
    %9 = arith.mulf %5, %8 : vector<256x32xf32>
    %cst_5 = arith.constant 0.000000e+00 : f32
    %10 = vector.broadcast %cst_5 : f32 to vector<17x32xf32>
    %11 = tpu.concatenate %10, %5, %10 in 0 : vector<17x32xf32>, vector<256x32xf32>, vector<17x32xf32> -> vector<290x32xf32>
    %12 = tpu.concatenate %10, %7, %10 in 0 : vector<17x32xf32>, vector<256x32xf32>, vector<17x32xf32> -> vector<290x32xf32>
    %13 = tpu.concatenate %10, %9, %10 in 0 : vector<17x32xf32>, vector<256x32xf32>, vector<17x32xf32> -> vector<290x32xf32>
    %14 = vector.extract_strided_slice %12 {offsets = [0, 0], sizes = [256, 32], strides = [1, 1]} : vector<290x32xf32> to vector<256x32xf32>
    %15 = vector.extract_strided_slice %11 {offsets = [1, 0], sizes = [256, 32], strides = [1, 1]} : vector<290x32xf32> to vector<256x32xf32>
    %16 = vector.extract_strided_slice %13 {offsets = [2, 0], sizes = [256, 32], strides = [1, 1]} : vector<290x32xf32> to vector<256x32xf32>
    %17 = tpu.concatenate %14, %15, %16 in 1 : vector<256x32xf32>, vector<256x32xf32>, vector<256x32xf32> -> vector<256x96xf32>
    %18 = arith.truncf %17 : vector<256x96xf32> to vector<256x96xbf16>
    %c0_6 = arith.constant 0 : index
    %c0_7 = arith.constant 0 : index
    %c0_8 = arith.constant 0 : index
    %19 = vector.load %arg2[%c0_6, %c0_7, %c0_8] : memref<3x96x32xbf16, #tpu.memory_space<vmem>>, vector<1x96x32xbf16>
    %20 = vector.shape_cast %19 : vector<1x96x32xbf16> to vector<96x32xbf16>
    %cst_9 = arith.constant dense<0.000000e+00> : vector<256x32xf32>
    %21 = tpu.matmul %18, %20, %cst_9 {dimension_numbers = #tpu.dot_dimension_numbers<[1], [0], [0], [1], [0, 0, 1, 1], [], []>} : vector<256x96xbf16>, vector<96x32xbf16>, vector<256x32xf32> -> vector<256x32xf32>
    %22 = vector.extract_strided_slice %12 {offsets = [16, 0], sizes = [256, 32], strides = [1, 1]} : vector<290x32xf32> to vector<256x32xf32>
    %23 = vector.extract_strided_slice %11 {offsets = [17, 0], sizes = [256, 32], strides = [1, 1]} : vector<290x32xf32> to vector<256x32xf32>
    %24 = vector.extract_strided_slice %13 {offsets = [18, 0], sizes = [256, 32], strides = [1, 1]} : vector<290x32xf32> to vector<256x32xf32>
    %25 = tpu.concatenate %22, %23, %24 in 1 : vector<256x32xf32>, vector<256x32xf32>, vector<256x32xf32> -> vector<256x96xf32>
    %26 = arith.truncf %25 : vector<256x96xf32> to vector<256x96xbf16>
    %c1_10 = arith.constant 1 : index
    %c0_11 = arith.constant 0 : index
    %c0_12 = arith.constant 0 : index
    %27 = vector.load %arg2[%c1_10, %c0_11, %c0_12] : memref<3x96x32xbf16, #tpu.memory_space<vmem>>, vector<1x96x32xbf16>
    %28 = vector.shape_cast %27 : vector<1x96x32xbf16> to vector<96x32xbf16>
    %cst_13 = arith.constant dense<0.000000e+00> : vector<256x32xf32>
    %29 = tpu.matmul %26, %28, %cst_13 {dimension_numbers = #tpu.dot_dimension_numbers<[1], [0], [0], [1], [0, 0, 1, 1], [], []>} : vector<256x96xbf16>, vector<96x32xbf16>, vector<256x32xf32> -> vector<256x32xf32>
    %30 = arith.addf %21, %29 : vector<256x32xf32>
    %31 = vector.extract_strided_slice %12 {offsets = [32, 0], sizes = [256, 32], strides = [1, 1]} : vector<290x32xf32> to vector<256x32xf32>
    %32 = vector.extract_strided_slice %11 {offsets = [33, 0], sizes = [256, 32], strides = [1, 1]} : vector<290x32xf32> to vector<256x32xf32>
    %33 = vector.extract_strided_slice %13 {offsets = [34, 0], sizes = [256, 32], strides = [1, 1]} : vector<290x32xf32> to vector<256x32xf32>
    %34 = tpu.concatenate %31, %32, %33 in 1 : vector<256x32xf32>, vector<256x32xf32>, vector<256x32xf32> -> vector<256x96xf32>
    %35 = arith.truncf %34 : vector<256x96xf32> to vector<256x96xbf16>
    %c2 = arith.constant 2 : index
    %c0_14 = arith.constant 0 : index
    %c0_15 = arith.constant 0 : index
    %36 = vector.load %arg2[%c2, %c0_14, %c0_15] : memref<3x96x32xbf16, #tpu.memory_space<vmem>>, vector<1x96x32xbf16>
    %37 = vector.shape_cast %36 : vector<1x96x32xbf16> to vector<96x32xbf16>
    %cst_16 = arith.constant dense<0.000000e+00> : vector<256x32xf32>
    %38 = tpu.matmul %35, %37, %cst_16 {dimension_numbers = #tpu.dot_dimension_numbers<[1], [0], [0], [1], [0, 0, 1, 1], [], []>} : vector<256x96xbf16>, vector<96x32xbf16>, vector<256x32xf32> -> vector<256x32xf32>
    %39 = arith.addf %30, %38 : vector<256x32xf32>
    %c0_17 = arith.constant 0 : index
    %c0_18 = arith.constant 0 : index
    %40 = vector.load %arg3[%c0_17, %c0_18] : memref<1x32xf32, #tpu.memory_space<vmem>>, vector<1x32xf32>
    %41 = vector.broadcast %40 : vector<1x32xf32> to vector<256x32xf32>
    %42 = arith.addf %39, %41 : vector<256x32xf32>
    %cst_19 = arith.constant 0.000000e+00 : f32
    %43 = vector.broadcast %cst_19 : f32 to vector<256x32xf32>
    %44 = arith.maximumf %42, %43 : vector<256x32xf32>
    %45 = vector.broadcast %2 : vector<256x1xf32> to vector<256x32xf32>
    %46 = arith.mulf %44, %45 : vector<256x32xf32>
    %47 = vector.broadcast %3 : vector<256x1xf32> to vector<256x32xf32>
    %48 = arith.mulf %44, %47 : vector<256x32xf32>
    %cst_20 = arith.constant 0.000000e+00 : f32
    %49 = vector.broadcast %cst_20 : f32 to vector<17x32xf32>
    %50 = tpu.concatenate %49, %44, %49 in 0 : vector<17x32xf32>, vector<256x32xf32>, vector<17x32xf32> -> vector<290x32xf32>
    %51 = tpu.concatenate %49, %46, %49 in 0 : vector<17x32xf32>, vector<256x32xf32>, vector<17x32xf32> -> vector<290x32xf32>
    %52 = tpu.concatenate %49, %48, %49 in 0 : vector<17x32xf32>, vector<256x32xf32>, vector<17x32xf32> -> vector<290x32xf32>
    %53 = vector.extract_strided_slice %51 {offsets = [0, 0], sizes = [256, 32], strides = [1, 1]} : vector<290x32xf32> to vector<256x32xf32>
    %54 = vector.extract_strided_slice %50 {offsets = [1, 0], sizes = [256, 32], strides = [1, 1]} : vector<290x32xf32> to vector<256x32xf32>
    %55 = vector.extract_strided_slice %52 {offsets = [2, 0], sizes = [256, 32], strides = [1, 1]} : vector<290x32xf32> to vector<256x32xf32>
    %56 = tpu.concatenate %53, %54, %55 in 1 : vector<256x32xf32>, vector<256x32xf32>, vector<256x32xf32> -> vector<256x96xf32>
    %57 = arith.truncf %56 : vector<256x96xf32> to vector<256x96xbf16>
    %c0_21 = arith.constant 0 : index
    %c0_22 = arith.constant 0 : index
    %c0_23 = arith.constant 0 : index
    %58 = vector.load %arg4[%c0_21, %c0_22, %c0_23] : memref<3x96x32xbf16, #tpu.memory_space<vmem>>, vector<1x96x32xbf16>
    %59 = vector.shape_cast %58 : vector<1x96x32xbf16> to vector<96x32xbf16>
    %cst_24 = arith.constant dense<0.000000e+00> : vector<256x32xf32>
    %60 = tpu.matmul %57, %59, %cst_24 {dimension_numbers = #tpu.dot_dimension_numbers<[1], [0], [0], [1], [0, 0, 1, 1], [], []>} : vector<256x96xbf16>, vector<96x32xbf16>, vector<256x32xf32> -> vector<256x32xf32>
    %61 = vector.extract_strided_slice %51 {offsets = [16, 0], sizes = [256, 32], strides = [1, 1]} : vector<290x32xf32> to vector<256x32xf32>
    %62 = vector.extract_strided_slice %50 {offsets = [17, 0], sizes = [256, 32], strides = [1, 1]} : vector<290x32xf32> to vector<256x32xf32>
    %63 = vector.extract_strided_slice %52 {offsets = [18, 0], sizes = [256, 32], strides = [1, 1]} : vector<290x32xf32> to vector<256x32xf32>
    %64 = tpu.concatenate %61, %62, %63 in 1 : vector<256x32xf32>, vector<256x32xf32>, vector<256x32xf32> -> vector<256x96xf32>
    %65 = arith.truncf %64 : vector<256x96xf32> to vector<256x96xbf16>
    %c1_25 = arith.constant 1 : index
    %c0_26 = arith.constant 0 : index
    %c0_27 = arith.constant 0 : index
    %66 = vector.load %arg4[%c1_25, %c0_26, %c0_27] : memref<3x96x32xbf16, #tpu.memory_space<vmem>>, vector<1x96x32xbf16>
    %67 = vector.shape_cast %66 : vector<1x96x32xbf16> to vector<96x32xbf16>
    %cst_28 = arith.constant dense<0.000000e+00> : vector<256x32xf32>
    %68 = tpu.matmul %65, %67, %cst_28 {dimension_numbers = #tpu.dot_dimension_numbers<[1], [0], [0], [1], [0, 0, 1, 1], [], []>} : vector<256x96xbf16>, vector<96x32xbf16>, vector<256x32xf32> -> vector<256x32xf32>
    %69 = arith.addf %60, %68 : vector<256x32xf32>
    %70 = vector.extract_strided_slice %51 {offsets = [32, 0], sizes = [256, 32], strides = [1, 1]} : vector<290x32xf32> to vector<256x32xf32>
    %71 = vector.extract_strided_slice %50 {offsets = [33, 0], sizes = [256, 32], strides = [1, 1]} : vector<290x32xf32> to vector<256x32xf32>
    %72 = vector.extract_strided_slice %52 {offsets = [34, 0], sizes = [256, 32], strides = [1, 1]} : vector<290x32xf32> to vector<256x32xf32>
    %73 = tpu.concatenate %70, %71, %72 in 1 : vector<256x32xf32>, vector<256x32xf32>, vector<256x32xf32> -> vector<256x96xf32>
    %74 = arith.truncf %73 : vector<256x96xf32> to vector<256x96xbf16>
    %c2_29 = arith.constant 2 : index
    %c0_30 = arith.constant 0 : index
    %c0_31 = arith.constant 0 : index
    %75 = vector.load %arg4[%c2_29, %c0_30, %c0_31] : memref<3x96x32xbf16, #tpu.memory_space<vmem>>, vector<1x96x32xbf16>
    %76 = vector.shape_cast %75 : vector<1x96x32xbf16> to vector<96x32xbf16>
    %cst_32 = arith.constant dense<0.000000e+00> : vector<256x32xf32>
    %77 = tpu.matmul %74, %76, %cst_32 {dimension_numbers = #tpu.dot_dimension_numbers<[1], [0], [0], [1], [0, 0, 1, 1], [], []>} : vector<256x96xbf16>, vector<96x32xbf16>, vector<256x32xf32> -> vector<256x32xf32>
    %78 = arith.addf %69, %77 : vector<256x32xf32>
    %c0_33 = arith.constant 0 : index
    %c0_34 = arith.constant 0 : index
    %79 = vector.load %arg5[%c0_33, %c0_34] : memref<1x32xf32, #tpu.memory_space<vmem>>, vector<1x32xf32>
    %80 = vector.broadcast %79 : vector<1x32xf32> to vector<256x32xf32>
    %81 = arith.addf %78, %80 : vector<256x32xf32>
    %82 = arith.addf %81, %1 : vector<256x32xf32>
    %c0_35 = arith.constant 0 : index
    %c0_36 = arith.constant 0 : index
    %c0_37 = arith.constant 0 : index
    %83 = vector.load %arg7[%c0_35, %c0_36, %c0_37] : memref<1x256x32xf32, #tpu.memory_space<vmem>>, vector<1x256x32xf32>
    %84 = vector.shape_cast %83 : vector<1x256x32xf32> to vector<256x32xf32>
    %85 = vector.shape_cast %82 : vector<256x32xf32> to vector<1x256x32xf32>
    tpu.vector_store %arg7[%c0_35, %c0_36, %c0_37], %85 {strides = array<i32>} : memref<1x256x32xf32, #tpu.memory_space<vmem>>, vector<1x256x32xf32>,
    return
  }
  func.func @transform_0(%arg0: i32) -> (i32, i32, i32) {
    %c0_i32 = arith.constant 0 : i32
    %c0_i32_0 = arith.constant 0 : i32
    %c0_i32_1 = arith.constant 0 : i32
    return %arg0, %c0_i32, %c0_i32_0 : i32, i32, i32
  }
  func.func @transform_1(%arg0: i32) -> (i32, i32, i32) {
    %c0_i32 = arith.constant 0 : i32
    %c0_i32_0 = arith.constant 0 : i32
    %c0_i32_1 = arith.constant 0 : i32
    %c0_i32_2 = arith.constant 0 : i32
    return %c0_i32, %c0_i32_0, %c0_i32_1 : i32, i32, i32
  }
  func.func @transform_2(%arg0: i32) -> (i32, i32) {
    %c0_i32 = arith.constant 0 : i32
    %c0_i32_0 = arith.constant 0 : i32
    %c0_i32_1 = arith.constant 0 : i32
    return %c0_i32, %c0_i32_0 : i32, i32
  }
  func.func @transform_3(%arg0: i32) -> (i32, i32, i32) {
    %c0_i32 = arith.constant 0 : i32
    %c0_i32_0 = arith.constant 0 : i32
    %c0_i32_1 = arith.constant 0 : i32
    %c0_i32_2 = arith.constant 0 : i32
    return %c0_i32, %c0_i32_0, %c0_i32_1 : i32, i32, i32
  }
  func.func @transform_4(%arg0: i32) -> (i32, i32) {
    %c0_i32 = arith.constant 0 : i32
    %c0_i32_0 = arith.constant 0 : i32
    %c0_i32_1 = arith.constant 0 : i32
    return %c0_i32, %c0_i32_0 : i32, i32
  }
  func.func @transform_5(%arg0: i32) -> (i32, i32) {
    %c0_i32 = arith.constant 0 : i32
    %c0_i32_0 = arith.constant 0 : i32
    %c0_i32_1 = arith.constant 0 : i32
    return %c0_i32, %c0_i32_0 : i32, i32
  }
  func.func @transform_6(%arg0: i32) -> (i32, i32, i32) {
    %c0_i32 = arith.constant 0 : i32
    %c0_i32_0 = arith.constant 0 : i32
    %c0_i32_1 = arith.constant 0 : i32
    return %arg0, %c0_i32, %c0_i32_0 : i32, i32, i32
  }
}

</mosaic_0001>

<bundles_post_ra>
// kernel: tpu_custom_call.1
= control target key start
LH: loop header
LB: loop body
LE: loop exit
PB: predicated region body
PF: predicated region fallthrough
CT: control target
= control target key end

     0   :  { %s4325_s21 = smov 0   ;;  %s6648_s0 = inlined_call_operand.vmem [shape: f32[2,256,32], index: 0, kind: input, shape index: {}]   ;;  %s6649_s1 = inlined_call_operand.vmem [shape: bf16[3,96,32], index: 1, kind: input, shape index: {}]   ;;  %s6650_s2 = inlined_call_operand.vmem [shape: f32[1,32], index: 2, kind: input, shape index: {}]   ;;  %s6651_s3 = inlined_call_operand.vmem [shape: bf16[3,96,32], index: 3, kind: input, shape index: {}]   ;;  %s6652_s4 = inlined_call_operand.vmem [shape: f32[1,32], index: 4, kind: input, shape index: {}]   ;;  %s6653_s5 = inlined_call_operand.vmem [shape: f32[256,2], index: 5, kind: input, shape index: {}]   ;;  %s6654_s6 = inlined_call_operand.vmem [shape: f32[2,256,32], index: 6, kind: output, shape index: {}]  }
   0x1 LB: > { %s3517_s22 = sadd.s32 4294967295, %s4283_s21   ;;  %p3521_p0 = scmp.ge.s32.totalorder %s4283_s21, 1  ;;  %s4283_s21 = sphi %s4325_s21, %s16_s21  }
   0x2   : > { %p212_p1 = scmp.lt.s32.totalorder %s4283_s21, 3 }
   0x4   : > { %p213_p2 = pnand %p3521_p0, %p212_p1 }
   0x6   : > { %216 = sbr.rel (%p213_p2) target bundleno = 1272 (0x4f8), region = 44 }
   0xb   : > { %v302_v0 = vld [vmem:[%s6653_s5 + $0x88] sm:$0xff]  ;;  %v300_v1 = vld [vmem:[%s6653_s5 + $0x78] sm:$0xff]  ;;  %p242_p3 = scmp.lt.s32.totalorder %s3517_s22, 1  ;;  %v6661_v2 = vmov 1   ;;  %v303_v7 = vld [vmem:[%s6653_s5 + $0x90] sm:$0xff]  ;;  %vm733_vm0 = vcmask 1040384  }
   0xc   : > { %3880 = vset.pattern.permute.xlu1 %v6661_v2  ;;  %3879 = vset.pattern.permute.xlu0 %v6661_v2  ;;  %v4344_v3 = vld [vmem:[%s6653_s5 + $0x98] sm:$0xff]  ;;  %v301_v8 = vld [vmem:[%s6653_s5 + $0x80] sm:$0xff]  ;;  %v4389_v19 = vld [vmem:[%s6653_s5 + $0xb0] sm:$0xff]  ;;  %v6664_v23 = vmov 0   ;;  %vm1032_vm1 = vcmask 1046528   ;;  %s4287_s19 = smov 32  }
   0xd   : > { %610 = vperm.xlu1 %3880, %v302_v0   ;;  %602 = vperm.xlu0 %3879, %v300_v1   ;;  %s6899_s22 = smov (!%p242_p3, %s3517_s22), 1  ;;  %v4379_v14 = vld [vmem:[%s6653_s5 + $0xa0] sm:$0xff]  ;;  %v306_v33 = vld [vmem:[%s6653_s5 + $0xa8] sm:$0xff]  ;;  %v4429_v42 = vld [vmem:[%s6653_s5 + $0xb8] sm:$0xff]  ;;  %vm1194_vm2 = vcmask 1045504   ;;  %s4288_s14 = smov 64  }
   0xe   : > { %3881 = vset.pattern.permute.xlu2 %v6661_v2  ;;  %s3816_s29 = sshll.u32 %s6899_s22, 8  ;;  %v309_v41 = vld [vmem:[%s6653_s5 + $0xc0] sm:$0xff]  ;;  %v4443_v50 = vld [vmem:[%s6653_s5 + $0xc8] sm:$0xff]  ;;  %v4457_v55 = vld [vmem:[%s6653_s5 + $0xd0] sm:$0xff]  ;;  %vm1355_vm3 = vcmask 261120   ;;  %vm1388_vm4 = vcmask 523264  }
   0xf   : > { %618 = vperm.xlu2 %3881, %v4344_v3   ;;  %s4356_s8 = scalar_lea.vmem %s6648_s0, %s3816_s29  ;;  %v312_v61 = vld [vmem:[%s6653_s5 + $0xd8] sm:$0xff]  ;;  %v4473_v62 = vld [vmem:[%s6653_s5 + $0xe0] sm:$0xff]  ;;  %vm1525_vm5 = vcmask 785408   ;;  %s6377_s24 = scalar_lea.vmem %s6654_s6, %s3816_s29 }
  0x10   : > { %v268_v4 = vld [vmem:[%s4356_s8 + $0x78] sm:$0xff]  ;;  %v269_v5 = vld [vmem:[%s4356_s8 + $0x80] sm:$0xff]  ;;  %v270_v6 = vld [vmem:[%s4356_s8 + $0x88] sm:$0xff] }
  0x11   : > { %v271_v9 = vld [vmem:[%s4356_s8 + $0x90] sm:$0xff]  ;;  %v4368_v10 = vmax.f32 %v268_v4, 0.0  ;;  %v4370_v11 = vmax.f32 %v269_v5, 0.0  ;;  %v4372_v12 = vmax.f32 %v270_v6, 0.0  ;;  %v272_v27 = vld [vmem:[%s4356_s8 + $0x98] sm:$0xff]  ;;  %v273_v28 = vld [vmem:[%s4356_s8 + $0xa0] sm:$0xff] }
  0x12   : > { %v4374_v13 = vmax.f32 %v271_v9, 0.0  ;;  %v4404_v29 = vmax.f32 %v272_v27, 0.0  ;;  %v4406_v30 = vmax.f32 %v273_v28, 0.0  ;;  %v274_v43 = vld [vmem:[%s4356_s8 + $0xa8] sm:$0xff]  ;;  %v275_v44 = vld [vmem:[%s4356_s8 + $0xb0] sm:$0xff]  ;;  %v276_v63 = vld [vmem:[%s4356_s8 + $0xb8] sm:$0xff] }
  0x13   : > { %v6658_v15 = vrot.slane %v4368_v10, 7  ;;  %v765_v16 = vrot.slane %v4370_v11, 7  ;;  %v767_v17 = vrot.slane %v4372_v12, 7  ;;  %v4436_v47 = vmax.f32 %v274_v43, 0.0  ;;  %v278_v28 = vld [vmem:[%s4356_s8 + $0xc8] sm:$0xff] }
  0x14   : > { %v769_v18 = vrot.slane %v4374_v13, 7  ;;  %v771_v35 = vrot.slane %v4404_v29, 7  ;;  %v773_v36 = vrot.slane %v4406_v30, 7  ;;  %v4438_v48 = vmax.f32 %v275_v44, 0.0 }
  0x15   : > { %614 = vperm.xlu1 %3880, %v303_v7   ;;  %606 = vperm.xlu0 %3879, %v301_v8   ;;  %v4394_v20 = vsel %vm733_vm0, %v6658_v15, %v765_v16  ;;  %v768_v21 = vsel %vm733_vm0, %v765_v16, %v767_v17  ;;  %v775_v51 = vrot.slane %v4436_v47, 7 }
  0x16   : > { %v770_v22 = vsel %vm733_vm0, %v767_v17, %v769_v18  ;;  %v6657_v24 = vrot.slane %v4394_v20, 1  ;;  %v1069_v25 = vrot.slane %v768_v21, 1  ;;  %v772_v37 = vsel %vm733_vm0, %v769_v18, %v771_v35  ;;  %v4497_v18 = vld [vmem:[%s6653_s5 + $0xf0] sm:$0xff] }
  0x17   : > { %622 = vperm.xlu2 %3881, %v4379_v14   ;;  %v1071_v26 = vrot.slane %v770_v22, 1  ;;  %v774_v38 = vsel %vm733_vm0, %v771_v35, %v773_v36  ;;  %v1073_v39 = vrot.slane %v772_v37, 1  ;;  %v777_v52 = vrot.slane %v4438_v48, 7 }
  0x18   : > { %v1070_v31 = vsel %vm1032_vm1, %v6657_v24, %v1069_v25  ;;  %v1075_v40 = vrot.slane %v774_v38, 1  ;;  %v776_v53 = vsel %vm733_vm0, %v773_v36, %v775_v51 }
  0x19   : > { %v1072_v32 = vsel %vm1032_vm1, %v1069_v25, %v1071_v26  ;;  %v1074_v45 = vsel %vm1032_vm1, %v1071_v26, %v1073_v39  ;;  %v778_v54 = vsel %vm733_vm0, %v775_v51, %v777_v52  ;;  %v1077_v56 = vrot.slane %v776_v53, 1 }
  0x1a   : > { %v3886_v34 = vpack.i.bf16 %v1072_v32, %v1070_v31  ;;  %v1076_v46 = vsel %vm1032_vm1, %v1073_v39, %v1075_v40  ;;  %v1079_v57 = vrot.slane %v778_v54, 1  ;;  %v279_v31 = vld [vmem:[%s4356_s8 + $0xd0] sm:$0xff]  ;;  %v4515_v32 = vmax.f32 %v278_v28, 0.0 }
  0x1b   : > { %v3893_v49 = vpack.i.bf16 %v1076_v46, %v1074_v45  ;;  %v1078_v58 = vsel %vm1032_vm1, %v1075_v40, %v1077_v56 }
  0x1c   : > { %v1080_v59 = vsel %vm1032_vm1, %v1077_v56, %v1079_v57 }
  0x1d   : > { %630 = vperm.xlu1 %3880, %v4389_v19   ;;  %3883 = vset.pattern.permute.xlu0 %v6664_v23  ;;  %v3900_v60 = vpack.i.bf16 %v1080_v59, %v1078_v58 }
  0x1e   : > { %431 = vperm.xlu0 %3883, %v301_v8  }
  0x1f   : > { %3882 = vset.pattern.permute.xlu2 %v6664_v23 }
  0x20   : > { %426 = vperm.xlu2 %3882, %v300_v1   ;;  %v4479_v1 = vmax.f32 %v276_v63, 0.0 }
  0x22   : > { %v779_v4 = vrot.slane %v4479_v1, 7 }
  0x24   : > { %v780_v6 = vsel %vm733_vm0, %v777_v52, %v779_v4 }
  0x25   : > { %3885 = vset.pattern.permute.xlu1 %v6664_v23  ;;  %v1081_v8 = vrot.slane %v780_v6, 1 }
  0x26   : > { %436 = vperm.xlu1 %3885, %v302_v0   ;;  %3884 = vset.pattern.permute.xlu0 %v6661_v2  ;;  %v277_v0 = vld [vmem:[%s4356_s8 + $0xc0] sm:$0xff] }
  0x27   : > { %626 = vperm.xlu0 %3884, %v306_v33  }
  0x28   : > { %3887 = vrot.lane.b32.xlu2 %v3886_v34, %s4287_s19 }
  0x29   : > { %3891 = vset.pattern.permute.xlu2 %v6661_v2 }
  0x2e   : > { %441 = vperm.xlu1 %3885, %v303_v7  }
  0x2f   : > { %638 = vperm.xlu0 %3884, %v309_v41  }
  0x30   : > { %634 = vperm.xlu2 %3891, %v4429_v42  }
  0x36   : > { %3894 = vrot.lane.b32.xlu1 %v3893_v49, %s4287_s19 }
  0x37   : > { %3898 = vset.pattern.permute.xlu1 %v6661_v2  ;;  %642 = vperm.xlu0 %3884, %v4443_v50  }
  0x38   : > { %3892 = vset.pattern.permute.xlu2 %v6664_v23 }
  0x39   : > { %446 = vperm.xlu2 %3892, %v4344_v3   ;;  %v4481_v3 = vmax.f32 %v277_v0, 0.0 }
  0x3b   : > { %v781_v5 = vrot.slane %v4481_v3, 7 }
  0x3d   : > { %v4487_v7 = vsel %vm733_vm0, %v779_v4, %v781_v5 }
  0x3e   : > { %646 = vperm.xlu1 %3898, %v4457_v55   ;;  %v1083_v9 = vrot.slane %v4487_v7, 1 }
  0x3f   : > { %3899 = vset.pattern.permute.xlu0 %v6664_v23 }
  0x40   : > { %456 = vperm.xlu0 %3899, %v306_v33   ;;  %v1084_v16 = vsel %vm1032_vm1, %v1081_v8, %v1083_v9  ;;  %v4517_v33 = vmax.f32 %v279_v31, 0.0 }
  0x41   : > { %451 = vperm.xlu2 %3892, %v4379_v14   ;;  %v1082_v14 = vsel %vm1032_vm1, %v1079_v57, %v1081_v8 }
  0x42   : > { %v3912_v17 = vpack.i.bf16 %v1084_v16, %v1082_v14  ;;  %v785_v43 = vrot.slane %v4517_v33, 7 }
  0x46   : > { %3901 = vrot.lane.b32.xlu1 %v3900_v60, %s4287_s19 }
  0x48   : > { %461 = vperm.xlu0 %3899, %v4389_v19  }
  0x49   : > { %3905 = vset.pattern.permute.xlu2 %v6661_v2 }
  0x4a   : > { %654 = vperm.xlu2 %3905, %v4473_v62  }
  0x4e   : > { %650 = vperm.xlu1 %3898, %v312_v61  }
  0x50   : > { %471 = vperm.xlu0 %3899, %v309_v41   ;;  %v783_v41 = vrot.slane %v4515_v32, 7 }
  0x52   : > { %3913 = vrot.lane.b32.xlu2 %v3912_v17, %s4287_s19  ;;  %v784_v56 = vsel %vm733_vm0, %v781_v5, %v783_v41  ;;  %v4543_v57 = vsel %vm733_vm0, %v783_v41, %v785_v43 }
  0x53   : > { %v1085_v6 = vrot.slane %v784_v56, 1  ;;  %v1087_v7 = vrot.slane %v4543_v57, 1 }
  0x55   : > { %v1088_v41 = vsel %vm1032_vm1, %v1085_v6, %v1087_v7 }
  0x56   : > { %3911 = vset.pattern.permute.xlu1 %v6664_v23 }
  0x58   : > { %486 = vperm.xlu0 %3899, %v312_v61  }
  0x5a   : > { %662 = vperm.xlu2 %3905, %v4497_v18  }
  0x60   : > { %3951 = vset.pattern.permute.xlu0 %v6661_v2 }
  0x62   : > { %3935 = vset.pattern.permute.xlu2 %v6664_v23 }
  0x69   : > { %v4500_v19 = vpop.permute.xlu2 %618 }
  0x6a   : > { %6738 = vst [vmem:[#allocation2_spill] sm:$0xff] %v4500_v19  ;;  %v688_v26 = vmul.f32 %v4500_v19, %v4404_v29 }
  0x6c   : > { %v1000_v34 = vrot.slane %v688_v26, 7 }
  0x71   : > { %v4503_v21 = vpop.permute.xlu2 %622 }
  0x72   : > { %6739 = vst [vmem:[#allocation3_spill] sm:$0xff] %v4503_v21  ;;  %v689_v27 = vmul.f32 %v4503_v21, %v4406_v30 }
  0x74   : > { %v1002_v35 = vrot.slane %v689_v27, 7 }
  0x76   : > { %v1003_v44 = vsel %vm733_vm0, %v1000_v34, %v1002_v35 }
  0x77   : > { %v1237_v54 = vrot.slane %v1003_v44, 2 }
  0x7a   : > { %v4519_v36 = vpop.permute.xlu2 %426 }
  0x7b   : > { %6742 = vst [vmem:[#allocation6_spill] sm:$0xff] %v4519_v36 }
  0x7f   : > { %v4505_v22 = vpop.permute.xlu1 %610  ;;  %v4507_v25 = vpop.permute.xlu0 %602 }
  0x80   : > { %6740 = vst [vmem:[#allocation4_spill] sm:$0xff] %v4505_v22  ;;  %v686_v37 = vmul.f32 %v4505_v22, %v4372_v12  ;;  %v4525_v38 = vmul.f32 %v4507_v25, %v4368_v10 }
  0x81   : > { %6741 = vst [vmem:[#allocation5_spill] sm:$0xff] %v4507_v25 }
  0x82   : > { %v996_v49 = vrot.slane %v686_v37, 7  ;;  %v6656_v51 = vrot.slane %v4525_v38, 7  ;;  %v4555_v8 = vpop.permute.xlu2 %3887  ;;  %v1086_v37 = vsel %vm1032_vm1, %v1083_v9, %v1085_v6 }
  0x83   : > { %v3924_v44 = vpack.i.bf16 %v1088_v41, %v1086_v37  ;;  %v280_v37 = vld [vmem:[%s4356_s8 + $0xd8] sm:$0xff]  ;;  %v281_v41 = vld [vmem:[%s4356_s8 + $0xe0] sm:$0xff] }
  0x87   : > { %v4527_v39 = vpop.permute.xlu1 %614  ;;  %v4529_v40 = vpop.permute.xlu0 %606 }
  0x88   : > { %6743 = vst [vmem:[#allocation7_spill] sm:$0xff] %v4527_v39  ;;  %v687_v45 = vmul.f32 %v4527_v39, %v4374_v13  ;;  %v685_v46 = vmul.f32 %v4529_v40, %v4370_v11 }
  0x89   : > { %6744 = vst [vmem:[#allocation8_spill] sm:$0xff] %v4529_v40 }
  0x8a   : > { %v998_v52 = vrot.slane %v687_v45, 7  ;;  %v994_v53 = vrot.slane %v685_v46, 7 }
  0x8c   : > { %v999_v58 = vsel %vm733_vm0, %v996_v49, %v998_v52  ;;  %v1001_v59 = vsel %vm733_vm0, %v998_v52, %v1000_v34  ;;  %v4550_v60 = vsel %vm733_vm0, %v6656_v51, %v994_v53  ;;  %v997_v61 = vsel %vm733_vm0, %v994_v53, %v996_v49  ;;  %v4577_v49 = vpop.permute.xlu2 %634 }
  0x8d   : > { %v1233_v63 = vrot.slane %v999_v58, 2  ;;  %v1235_v0 = vrot.slane %v1001_v59, 2  ;;  %v6655_v4 = vrot.slane %v4550_v60, 2  ;;  %v1231_v5 = vrot.slane %v997_v61, 2  ;;  %6748 = vst [vmem:[#allocation12_spill] sm:$0xff] %v4577_v49 }
  0x8e   : > { %v692_v56 = vmul.f32 %v4577_v49, %v4479_v1 }
  0x8f   : > { %v4557_v14 = vpop.permute.xlu1 %630  ;;  %v1236_v16 = vsel %vm1194_vm2, %v1233_v63, %v1235_v0  ;;  %v1238_v17 = vsel %vm1194_vm2, %v1235_v0, %v1237_v54  ;;  %v1232_v26 = vsel %vm1194_vm2, %v6655_v4, %v1231_v5  ;;  %v1234_v27 = vsel %vm1194_vm2, %v1231_v5, %v1233_v63 }
  0x90   : > { %6745 = vst [vmem:[#allocation9_spill] sm:$0xff] %v4557_v14  ;;  %v4565_v28 = vpop.permute.xlu0 %431  ;;  %v3919_v31 = vpack.i.bf16 %v1238_v17, %v1236_v16  ;;  %v3906_v34 = vpack.i.bf16 %v1234_v27, %v1232_v26  ;;  %v691_v45 = vmul.f32 %v4557_v14, %v4438_v48  ;;  %v1008_v5 = vrot.slane %v692_v56, 7 }
  0x91   : > { %6746 = vst [vmem:[#allocation10_spill] sm:$0xff] %v4565_v28  ;;  %v4611_v56 = vmax.f32 %v280_v37, 0.0 }
  0x92   : > { %3920 = vrot.lane.b32.xlu2 %v3919_v31, %s4288_s14  ;;  %3907 = vrot.lane.b32.xlu1 %v3906_v34, %s4288_s14  ;;  %v1006_v9 = vrot.slane %v691_v45, 7 }
  0x94   : > { %v1009_v31 = vsel %vm733_vm0, %v1006_v9, %v1008_v5 }
  0x95   : > { %v1243_v45 = vrot.slane %v1009_v31, 2 }
  0x98   : > { %v4575_v46 = vpop.permute.xlu1 %436 }
  0x99   : > { %6747 = vst [vmem:[#allocation11_spill] sm:$0xff] %v4575_v46  ;;  %v4579_v52 = vpop.permute.xlu0 %626 }
  0x9a   : > { %6749 = vst [vmem:[#allocation13_spill] sm:$0xff] %v4579_v52  ;;  %v690_v53 = vmul.f32 %v4579_v52, %v4436_v47  ;;  %466 = vperm.xlu1 %3911, %v4429_v42   ;;  %3925 = vrot.lane.b32.xlu2 %v3924_v44, %s4287_s19  ;;  %v4594_v42 = vld [vmem:[%s6653_s5 + $0xe8] sm:$0xff] }
  0x9c   : > { %v1004_v58 = vrot.slane %v690_v53, 7 }
  0x9e   : > { %v1005_v59 = vsel %vm733_vm0, %v1002_v35, %v1004_v58  ;;  %v1007_v61 = vsel %vm733_vm0, %v1004_v58, %v1006_v9  ;;  %v4613_v58 = vmax.f32 %v281_v41, 0.0 }
  0x9f   : > { %v1239_v63 = vrot.slane %v1005_v59, 2  ;;  %v1241_v0 = vrot.slane %v1007_v61, 2 }
  0xa0   : > { %v4589_v6 = vpop.permute.xlu1 %441 }
  0xa1   : > { %6750 = vst [vmem:[#allocation14_spill] sm:$0xff] %v4589_v6  ;;  %v4596_v16 = vpop.permute.xlu0 %638  ;;  %v1240_v17 = vsel %vm1194_vm2, %v1237_v54, %v1239_v63  ;;  %v1242_v35 = vsel %vm1194_vm2, %v1239_v63, %v1241_v0  ;;  %v4609_v54 = vpop.permute.xlu2 %446  ;;  %v1244_v61 = vsel %vm1194_vm2, %v1241_v0, %v1243_v45 }
  0xa2   : > { %6751 = vst [vmem:[#allocation15_spill] sm:$0xff] %v4596_v16  ;;  %v693_v26 = vmul.f32 %v4596_v16, %v4481_v3  ;;  %3917 = vset.pattern.permute.xlu1 %v6661_v2  ;;  %v3930_v27 = vpack.i.bf16 %v1242_v35, %v1240_v17  ;;  %v787_v35 = vrot.slane %v4611_v56, 7 }
  0xa3   : > { %658 = vperm.xlu1 %3917, %v4594_v42   ;;  %6752 = vst [vmem:[#allocation16_spill] sm:$0xff] %v4609_v54 }
  0xa4   : > { %v1010_v34 = vrot.slane %v693_v26, 7  ;;  %3931 = vrot.lane.b32.xlu2 %v3930_v27, %s4288_s14  ;;  %v789_v26 = vrot.slane %v4613_v58, 7  ;;  %v788_v31 = vsel %vm733_vm0, %v785_v43, %v787_v35 }
  0xa6   : > { %v1011_v44 = vsel %vm733_vm0, %v1008_v5, %v1010_v34  ;;  %v4636_v37 = vsel %vm733_vm0, %v787_v35, %v789_v26 }
  0xa7   : > { %v1245_v53 = vrot.slane %v1011_v44, 2  ;;  %v6663_v43 = vrot.slane %v4636_v37, 1 }
  0xa8   : > { %v4615_v59 = vpop.permute.xlu1 %3894 }
  0xa9   : > { %v1246_v9 = vsel %vm1194_vm2, %v1243_v45, %v1245_v53  ;;  %v4619_v63 = vpop.permute.xlu0 %642  ;;  %v4640_v44 = vpop.permute.xlu2 %451 }
  0xaa   : > { %6753 = vst [vmem:[#allocation17_spill] sm:$0xff] %v4619_v63  ;;  %v3941_v17 = vpack.i.bf16 %v1246_v9, %v1244_v61  ;;  %v694_v5 = vmul.f32 %v4619_v63, %v4515_v32  ;;  %v4653_v9 = vld [vmem:[%s6653_s5 + $0x18] sm:$0xff]  ;;  %v3889_v63 = vunpack.i.l.bf16 %v4555_v8 }
  0xab   : > { %3918 = vset.pattern.permute.xlu1 %v6664_v23  ;;  %6755 = vst [vmem:[#allocation19_spill] sm:$0xff] %v4640_v44 }
  0xac   : > { %3942 = vrot.lane.b32.xlu0 %v3941_v17, %s4288_s14  ;;  %476 = vperm.xlu1 %3918, %v4443_v50   ;;  %v1012_v27 = vrot.slane %v694_v5, 7 }
  0xad   : > { %481 = vperm.xlu2 %3935, %v4457_v55   ;;  %v4647_v55 = vld [vmem:[%s6653_s5 + $0xf8] sm:$0xff] }
  0xae   : > { %v1013_v0 = vsel %vm733_vm0, %v1010_v34, %v1012_v27  ;;  %v1089_v34 = vrot.slane %v788_v31, 1 }
  0xaf   : > { %v1247_v45 = vrot.slane %v1013_v0, 2 }
  0xb0   : > { %v4638_v41 = vpop.permute.xlu1 %646  ;;  %v1090_v0 = vsel %vm1032_vm1, %v1087_v7, %v1089_v34  ;;  %v1092_v31 = vsel %vm1032_vm1, %v1089_v34, %v6663_v43  ;;  %v4681_v7 = vld [vmem:[%s6653_s5 + $0x8] sm:$0xff] }
  0xb1   : > { %6754 = vst [vmem:[#allocation18_spill] sm:$0xff] %v4638_v41  ;;  %v695_v50 = vmul.f32 %v4638_v41, %v4517_v33  ;;  %v1248_v35 = vsel %vm1194_vm2, %v1245_v53, %v1247_v45  ;;  %v3936_v51 = vpack.i.bf16 %v1092_v31, %v1090_v0  ;;  %v4670_v24 = vpop.permute.xlu2 %654 }
  0xb2   : > { %6756 = vst [vmem:[#allocation20_spill] sm:$0xff] %v4670_v24  ;;  %v4676_v57 = vmul.f32 %v4670_v24, %v4613_v58  ;;  %v4798_v41 = vpop.permute.xlu0 %456 }
  0xb3   : > { %v1014_v61 = vrot.slane %v695_v50, 7  ;;  %6762 = vst [vmem:[#allocation23_spill] sm:$0xff] %v4798_v41 }
  0xb4   : > { %3929 = vset.pattern.permute.xlu1 %v6661_v2  ;;  %v6660_v34 = vrot.slane %v4676_v57, 7 }
  0xb5   : > { %v1015_v17 = vsel %vm733_vm0, %v1012_v27, %v1014_v61  ;;  %666 = vperm.xlu1 %3929, %v4647_v55   ;;  %3952 = vset.pattern.permute.xlu2 %v6661_v2 }
  0xb6   : > { %v1249_v5 = vrot.slane %v1015_v17, 2  ;;  %554 = vperm.xlu2 %3952, %v4653_v9  }
  0xb8   : > { %v1250_v50 = vsel %vm1194_vm2, %v1247_v45, %v1249_v5  ;;  %v4668_v27 = vpop.permute.xlu1 %3901 }
  0xb9   : > { %v3946_v4 = vpack.i.bf16 %v1250_v50, %v1248_v35 }
  0xbb   : > { %3947 = vrot.lane.b32.xlu0 %v3946_v4, %s4288_s14 }
  0xbd   : > { %3937 = vrot.lane.b32.xlu1 %v3936_v51, %s4287_s19  ;;  %v287_v51 = vld [vmem:[%s6653_s5 + $0x10] sm:$0xff] }
  0xc0   : > { %v4683_v53 = vpop.permute.xlu1 %650 }
  0xc1   : > { %6757 = vst [vmem:[#allocation21_spill] sm:$0xff] %v4683_v53  ;;  %v696_v45 = vmul.f32 %v4683_v53, %v4611_v56 }
  0xc3   : > { %546 = vperm.xlu0 %3951, %v4681_v7   ;;  %v1016_v4 = vrot.slane %v696_v45, 7  ;;  %v4706_v45 = vld [vmem:[%s6653_s5 + $0x30] sm:$0xff] }
  0xc5   : > { %550 = vperm.xlu1 %3929, %v287_v51   ;;  %v1017_v17 = vsel %vm733_vm0, %v1014_v61, %v1016_v4  ;;  %v4696_v35 = vsel %vm733_vm0, %v1016_v4, %v6660_v34  ;;  %v4711_v4 = vld [vmem:[%s6653_s5 + $0x20] sm:$0xff] }
  0xc6   : > { %v1251_v0 = vrot.slane %v1017_v17, 2  ;;  %v6659_v31 = vrot.slane %v4696_v35, 2  ;;  %v3829_v17 = vld [vmem:[%s6649_s1 + $0x58] sm:$0xff] }
  0xc7   : > { %3854 = vmatpush.bf16.msra.mxu2 %v3829_v17  ;;  %1576 = vmatpush.bf16.msra.mxu0 %v3829_v17  ;;  %v3828_v17 = vld [vmem:[%s6649_s1 + $0x50] sm:$0xff] }
  0xc8   : > { %v1252_v50 = vsel %vm1194_vm2, %v1249_v5, %v1251_v0  ;;  %v1254_v15 = vsel %vm1194_vm2, %v1251_v0, %v6659_v31  ;;  %v283_v5 = vld [vmem:[%s4356_s8 + $0xf0] sm:$0xff] }
  0xc9   : > { %v3953_v61 = vpack.i.bf16 %v1254_v15, %v1252_v50  ;;  %v4720_v0 = vmax.f32 %v283_v5, 0.0  ;;  %v4725_v15 = vld [vmem:[%s6653_s5] sm:$0xff]  ;;  %v282_v50 = vld [vmem:[%s4356_s8 + $0xe8] sm:$0xff] }
  0xca   : > { %v4729_v31 = vmax.f32 %v282_v50, 0.0 }
  0xcb   : > { %3954 = vrot.lane.b32.xlu2 %v3953_v61, %s4288_s14  ;;  %566 = vperm.xlu0 %3951, %v4706_v45   ;;  %v6666_v61 = vrot.slane %v4720_v0, 7 }
  0xcc   : > { %v791_v5 = vrot.slane %v4729_v31, 7  ;;  %3855 = vmatpush.bf16.msra.mxu2 %v3828_v17  ;;  %1577 = vmatpush.bf16.msra.mxu0 %v3828_v17  ;;  %v6760_v17 = vmov 0  }
  0xcd   : > { %558 = vperm.xlu1 %3929, %v4711_v4  }
  0xce   : > { %v792_v34 = vsel %vm733_vm0, %v789_v26, %v791_v5  ;;  %v4745_v50 = vsel %vm733_vm0, %v791_v5, %v6666_v61 }
  0xcf   : > { %v1093_v2 = vrot.slane %v792_v34, 1  ;;  %v6667_v43 = vrot.slane %v4745_v50, 1  ;;  %v6759_v34 = vmov 1  }
  0xd1   : > { %v1096_v5 = vsel %vm1032_vm1, %v1093_v2, %v6667_v43 }
  0xd3   : > { %542 = vperm.xlu2 %3952, %v4725_v15   ;;  %3969 = vset.pattern.permute.xlu0 %v6664_v23 }
  0xd4   : > { %491 = vperm.xlu0 %3969, %v4473_v62   ;;  %v3827_v62 = vld [vmem:[%s6649_s1 + $0x48] sm:$0xff] }
  0xd5   : > { %3958 = vset.pattern.permute.xlu1 %v6664_v23  ;;  %v6758_v23 = vrot.slane %v4636_v37, 1  ;;  %3856 = vmatpush.bf16.msra.mxu2 %v3827_v62  ;;  %v3825_v37 = vld [vmem:[%s6649_s1 + $0x38] sm:$0xff] }
  0xd6   : > { %496 = vperm.xlu1 %3958, %v4594_v42   ;;  %1578 = vmatpush.bf16.msra.mxu0 %v3827_v62  ;;  %v3826_v42 = vld [vmem:[%s6649_s1 + $0x40] sm:$0xff] }
  0xd7   : > { %v1094_v26 = vsel %vm1032_vm1, %v6758_v23, %v1093_v2  ;;  %v4768_v2 = vld [vmem:[%s6653_s5 + $0x28] sm:$0xff]  ;;  %v4770_v23 = vpop.permute.xlu2 %3913 }
  0xd8   : > { %v3959_v61 = vpack.i.bf16 %v1096_v5, %v1094_v26  ;;  %v4789_v5 = vmul.f32 %v4519_v36, %v4368_v10 }
  0xd9   : > { %3857 = vmatpush.bf16.msra.mxu2 %v3826_v42 }
  0xda   : > { %1579 = vmatpush.bf16.msra.mxu0 %v3826_v42  ;;  %v525_v42 = vmul.f32 %v4565_v28, %v4370_v11 }
  0xdb   : > { %3960 = vrot.lane.b32.xlu2 %v3959_v61, %s4287_s19  ;;  %v4780_v61 = vld [vmem:[%s6653_s5 + $0x38] sm:$0xff] }
  0xdc   : > { %361 = vperm.xlu0 %3969, %v287_v51   ;;  %v3824_v51 = vld [vmem:[%s6649_s1 + $0x30] sm:$0xff]  ;;  %v864_v43 = vrot.slane %v525_v42, 7 }
  0xdd   : > { %3858 = vmatpush.bf16.msra.mxu2 %v3825_v37 }
  0xde   : > { %1580 = vmatpush.bf16.msra.mxu0 %v3825_v37  ;;  %v526_v37 = vmul.f32 %v4575_v46, %v4372_v12  ;;  %v284_v12 = vld [vmem:[%s4356_s8 + $0xf8] sm:$0xff] }
  0xdf   : > { %v4784_v62 = vpop.permute.xlu2 %662  ;;  %v4807_v14 = vmax.f32 %v284_v12, 0.0  ;;  %v527_v12 = vmul.f32 %v4589_v6, %v4374_v13 }
  0xe0   : > { %6761 = vst [vmem:[#allocation22_spill] sm:$0xff] %v4784_v62  ;;  %v866_v24 = vrot.slane %v526_v37, 7 }
  0xe1   : > { %3859 = vmatpush.bf16.msra.mxu2 %v3824_v51 }
  0xe2   : > { %1581 = vmatpush.bf16.msra.mxu0 %v3824_v51  ;;  %v6678_v51 = vrot.slane %v4789_v5, 7  ;;  %v867_v11 = vsel %vm733_vm0, %v864_v43, %v866_v24 }
  0xe3   : > { %562 = vperm.xlu2 %3952, %v4768_v2  }
  0xe4   : > { %3982 = vset.pattern.permute.xlu0 %v6759_v34  ;;  %v865_v16 = vsel %vm733_vm0, %v6678_v51, %v864_v43 }
  0xe5   : > { %570 = vperm.xlu0 %3982, %v4780_v61   ;;  %v1374_v52 = vsel %vm1355_vm3, %v865_v16, %v3889_v63  ;;  %v4820_v16 = vpop.permute.xlu0 %461  ;;  %v6765_v63 = vrot.slane %v4720_v0, 7 }
  0xe6   : > { %6764 = vst [vmem:[#allocation25_spill] sm:$0xff] %v4820_v16 }
  0xeb   : > { %3970 = vset.pattern.permute.xlu2 %v6760_v17 }
  0xec   : > { %506 = vperm.xlu2 %3970, %v4647_v55   ;;  %v3921_v26 = vpop.permute.xlu2 %3920  ;;  %v3890_v55 = vunpack.i.h.bf16 %v4555_v8  ;;  %v795_v8 = vrot.slane %v4807_v14, 7 }
  0xed   : > { %v4851_v6 = vpop.permute.xlu0 %471 }
  0xee   : > { %v1375_v21 = vsel %vm1355_vm3, %v867_v11, %v3890_v55  ;;  %v868_v55 = vrot.slane %v527_v12, 7  ;;  %v6768_v11 = vrot.slane %v4745_v50, 1  ;;  %v3923_v50 = vunpack.i.h.bf16 %v3921_v26  ;;  %6770 = vst [vmem:[#allocation29_spill] sm:$0xff] %v4851_v6 }
  0xf0   : > { %v869_v12 = vsel %vm733_vm0, %v866_v24, %v868_v55 }
  0xf4   : > { %v4796_v53 = vpop.permute.xlu2 %3925 }
  0xfe   : > { %v3932_v39 = vpop.permute.xlu2 %3931 }
 0x104   : > { %v3908_v49 = vpop.permute.xlu1 %3907 }
 0x105   : > { %v3910_v42 = vunpack.i.h.bf16 %v3908_v49  ;;  %v3909_v37 = vunpack.i.l.bf16 %v3908_v49  ;;  %v528_v49 = vmul.f32 %v4609_v54, %v4404_v29  ;;  %v3922_v54 = vunpack.i.l.bf16 %v3921_v26 }
 0x107   : > { %v1407_v19 = vsel %vm1388_vm4, %v1374_v52, %v3909_v37  ;;  %v1408_v51 = vsel %vm1388_vm4, %v1375_v21, %v3910_v42  ;;  %v796_v52 = vsel %vm733_vm0, %v6765_v63, %v795_v8  ;;  %v4828_v21 = vsel %vm733_vm0, %v795_v8, 0.0 }
 0x108   : > { %v4814_v43 = vpack.c.bf16 %v1408_v51, %v1407_v19  ;;  %6766 = vst [vmem:[#allocation26_spill] sm:$0xff] %v4828_v21  ;;  %v1450_v19 = vrot.slane %v796_v52, 1  ;;  %v6682_v51 = vrot.slane %v4828_v21, 1  ;;  %v870_v29 = vrot.slane %v528_v49, 7 }
 0x109   : > { %v3897_v63 = vunpack.i.h.bf16 %v4615_v59  ;;  %v3896_v52 = vunpack.i.l.bf16 %v4615_v59 }
 0x10a   : > { %6763 = vst [vmem:[#allocation24_spill] sm:$0xff] %v4814_v43  ;;  %3570 = vmatmul.msk.bf16.vlgmr.msra.gmra.mxu2 %vm1525_vm5, %v4814_v43  ;;  %v4836_v42 = vsel %vm1032_vm1, %v6768_v11, %v1450_v19  ;;  %v4841_v37 = vsel %vm1032_vm1, %v1450_v19, %v6682_v51  ;;  %v871_v49 = vsel %vm733_vm0, %v868_v55, %v870_v29  ;;  %v4849_v11 = vpop.permute.xlu2 %481  ;;  %v4866_v55 = vld [vmem:[%s6653_s5 + $0x48] sm:$0xff]  ;;  %v260_v43 = vld [vmem:[%s4356_s8 + $0x38] sm:$0xff] }
 0x10b   : > { %6769 = vst [vmem:[#allocation28_spill] sm:$0xff] %v4849_v11  ;;  %v1376_v19 = vsel %vm1355_vm3, %v869_v12, %v3896_v52  ;;  %v699_v51 = vmul.f32 %v4784_v62, %v4720_v0  ;;  %v1377_v8 = vsel %vm1355_vm3, %v871_v49, %v3897_v63  ;;  %578 = vperm.xlu0 %3982, %v4866_v55   ;;  %v6776_v62 = vrot.slane %v4696_v35, 2 }
 0x10c   : > { %v4831_v13 = vpop.permute.xlu1 %466  ;;  %v1409_v59 = vsel %vm1388_vm4, %v1376_v19, %v3922_v54  ;;  %v1410_v24 = vsel %vm1388_vm4, %v1377_v8, %v3923_v50  ;;  %v529_v63 = vmul.f32 %v4640_v44, %v4406_v30  ;;  %v530_v54 = vmul.f32 %v4798_v41, %v4436_v47 }
 0x10d   : > { %6767 = vst [vmem:[#allocation27_spill] sm:$0xff] %v4831_v13  ;;  %v1022_v52 = vrot.slane %v699_v51, 7  ;;  %v4868_v46 = vpack.c.bf16 %v1410_v24, %v1409_v59  ;;  %v6773_v8 = vrot.slane %v4676_v57, 7  ;;  %v4881_v59 = vpop.permute.xlu0 %486  ;;  %v3933_v35 = vunpack.i.l.bf16 %v3932_v39 }
 0x10e   : > { %6774 = vst [vmem:[#allocation32_spill] sm:$0xff] %v4881_v59  ;;  %v874_v30 = vrot.slane %v530_v54, 7  ;;  %v3934_v54 = vunpack.i.h.bf16 %v3932_v39  ;;  %v4909_v39 = vmul.f32 %v4831_v13, %v4479_v1 }
 0x10f   : > { %6772 = vst [vmem:[#allocation31_spill] sm:$0xff] %v4868_v46 }
 0x112   : > { %v4883_v24 = vpop.permute.xlu2 %554 }
 0x113   : > { %6775 = vst [vmem:[#allocation33_spill] sm:$0xff] %v4883_v24 }
 0x115   : > { %v4857_v22 = vpop.permute.xlu1 %658 }
 0x116   : > { %6771 = vst [vmem:[#allocation30_spill] sm:$0xff] %v4857_v22  ;;  %v698_v26 = vmul.f32 %v4857_v22, %v4729_v31  ;;  %v3904_v22 = vunpack.i.h.bf16 %v4668_v27 }
 0x118   : > { %v1020_v12 = vrot.slane %v698_v26, 7  ;;  %v872_v26 = vrot.slane %v529_v63, 7 }
 0x11a   : > { %v1021_v49 = vsel %vm733_vm0, %v6773_v8, %v1020_v12  ;;  %v1023_v50 = vsel %vm733_vm0, %v1020_v12, %v1022_v52  ;;  %3571 = vmatmul.msk.bf16.gmra.mxu2 %vm1525_vm5, %v4868_v46  ;;  %v875_v63 = vsel %vm733_vm0, %v872_v26, %v874_v30 }
 0x11b   : > { %v1255_v51 = vrot.slane %v1021_v49, 2  ;;  %v1257_v19 = vrot.slane %v1023_v50, 2  ;;  %v3903_v49 = vunpack.i.l.bf16 %v4668_v27  ;;  %v873_v50 = vsel %vm733_vm0, %v870_v29, %v872_v26  ;;  %v253_v26 = vld [vmem:[%s4356_s8] sm:$0xff] }
 0x11c   : > { %v531_v27 = vmul.f32 %v4820_v16, %v4438_v48  ;;  %v4918_v48 = vmax.f32 %v253_v26, 0.0  ;;  %v3915_v26 = vunpack.i.l.bf16 %v4770_v23 }
 0x11d   : > { %v1256_v47 = vsel %vm1194_vm2, %v6776_v62, %v1255_v51  ;;  %v1258_v57 = vsel %vm1194_vm2, %v1255_v51, %v1257_v19  ;;  %v1378_v62 = vsel %vm1355_vm3, %v873_v50, %v3903_v49  ;;  %v1379_v51 = vsel %vm1355_vm3, %v875_v63, %v3904_v22  ;;  %v256_v63 = vld [vmem:[%s4356_s8 + $0x18] sm:$0xff] }
 0x11e   : > { %v4889_v8 = vpop.permute.xlu1 %476  ;;  %v3964_v12 = vpack.i.bf16 %v1258_v57, %v1256_v47  ;;  %v3943_v41 = vpop.permute.xlu0 %3942  ;;  %v1411_v47 = vsel %vm1388_vm4, %v1378_v62, %v3933_v35  ;;  %v1412_v57 = vsel %vm1388_vm4, %v1379_v51, %v3934_v54  ;;  %v876_v50 = vrot.slane %v531_v27, 7  ;;  %v254_v27 = vld [vmem:[%s4356_s8 + $0x8] sm:$0xff] }
 0x11f   : > { %6777 = vst [vmem:[#allocation34_spill] sm:$0xff] %v4889_v8  ;;  %v3945_v28 = vunpack.i.h.bf16 %v3943_v41  ;;  %v3944_v25 = vunpack.i.l.bf16 %v3943_v41  ;;  %v4956_v21 = vmax.f32 %v254_v27, 0.0 }
 0x120   : > { %3965 = vrot.lane.b32.xlu1 %v3964_v12, %s4288_s14  ;;  %v4914_v12 = vpack.c.bf16 %v1412_v57, %v1411_v47 }
 0x122   : > { %6779 = vst [vmem:[#allocation36_spill] sm:$0xff] %v4914_v12 }
 0x125   : > { %v4900_v44 = vpop.permute.xlu2 %3954 }
 0x127   : > { %v4904_v29 = vpop.permute.xlu1 %666 }
 0x128   : > { %6778 = vst [vmem:[#allocation35_spill] sm:$0xff] %v4904_v29  ;;  %v700_v22 = vmul.f32 %v4904_v29, %v4807_v14  ;;  %501 = vperm.xlu1 %3958, %v4497_v18   ;;  %v257_v18 = vld [vmem:[%s4356_s8 + $0x20] sm:$0xff] }
 0x129   : > { %v4946_v16 = vmax.f32 %v257_v18, 0.0  ;;  %v258_v18 = vld [vmem:[%s4356_s8 + $0x28] sm:$0xff] }
 0x12a   : > { %v1024_v49 = vrot.slane %v700_v22, 7  ;;  %3572 = vmatmul.msk.bf16.gmra.mxu2 %vm1525_vm5, %v4914_v12  ;;  %v4933_v22 = vmax.f32 %v256_v63, 0.0  ;;  %v6783_v63 = vrot.slane %v4909_v39, 7 }
 0x12c   : > { %v1025_v54 = vsel %vm733_vm0, %v1022_v52, %v1024_v49  ;;  %v4924_v35 = vsel %vm733_vm0, %v1024_v49, 0.0  ;;  %v255_v52 = vld [vmem:[%s4356_s8 + $0x10] sm:$0xff]  ;;  %v877_v49 = vsel %vm733_vm0, %v874_v30, %v876_v50  ;;  %v879_v40 = vsel %vm733_vm0, %v876_v50, %v6783_v63 }
 0x12d   : > { %6780 = vst [vmem:[#allocation37_spill] sm:$0xff] %v4924_v35  ;;  %v1461_v62 = vrot.slane %v1025_v54, 2  ;;  %v4928_v47 = vpop.permute.xlu0 %3947  ;;  %v4930_v57 = vpop.permute.xlu2 %542  ;;  %v6782_v29 = vrot.slane %v4924_v35, 2  ;;  %v6784_v30 = vpack.i.bf16 %v4841_v37, %v4836_v42  ;;  %v739_v50 = vrot.slane %v4933_v22, 7 }
 0x12e   : > { %6781 = vst [vmem:[#allocation38_spill] sm:$0xff] %v4930_v57  ;;  %v669_v1 = vmul.f32 %v4930_v57, %v4918_v48  ;;  %v1380_v63 = vsel %vm1355_vm3, %v877_v49, %v3915_v26  ;;  %v6699_v42 = vrot.slane %v4956_v21, 7  ;;  %v741_v37 = vrot.slane %v4946_v16, 7 }
 0x12f   : > { %v4940_v54 = vpop.permute.xlu1 %3937  ;;  %v1462_v51 = vsel %vm1194_vm2, %v1257_v19, %v1461_v62  ;;  %v1464_v13 = vsel %vm1194_vm2, %v1461_v62, %v6782_v29  ;;  %v3916_v19 = vunpack.i.h.bf16 %v4770_v23  ;;  %v4959_v29 = vmax.f32 %v255_v52, 0.0  ;;  %v259_v62 = vld [vmem:[%s4356_s8 + $0x30] sm:$0xff] }
 0x130   : > { %3972 = vrot.lane.b32.xlu1 %v6784_v30, %s4287_s19  ;;  %v3976_v36 = vpack.i.bf16 %v1464_v13, %v1462_v51  ;;  %v963_v41 = vrot.slane %v669_v1, 7  ;;  %v1413_v51 = vsel %vm1388_vm4, %v1380_v63, %v3944_v25  ;;  %v4972_v52 = vmax.f32 %v258_v18, 0.0  ;;  %v4991_v25 = vld [vmem:[%s6653_s5 + $0x40] sm:$0xff] }
 0x131   : > { %3981 = vset.pattern.permute.xlu1 %v6759_v34  ;;  %v737_v13 = vrot.slane %v4959_v29, 7  ;;  %v1381_v23 = vsel %vm1355_vm3, %v879_v40, %v3916_v19  ;;  %v4974_v30 = vmax.f32 %v259_v62, 0.0  ;;  %v4980_v1 = vmul.f32 %v4889_v8, %v4515_v32 }
 0x132   : > { %3977 = vrot.lane.b32.xlu2 %v3976_v36, %s4288_s14  ;;  %v1414_v27 = vsel %vm1388_vm4, %v1381_v23, %v3945_v28  ;;  %v533_v36 = vmul.f32 %v4851_v6, %v4481_v3  ;;  %v4984_v40 = vmul.f32 %v4883_v24, %v4933_v22  ;;  %v4996_v3 = vsel %vm733_vm0, 0.0, %v963_v41 }
 0x133   : > { %v5000_v32 = vpack.c.bf16 %v1414_v27, %v1413_v51  ;;  %v5005_v19 = vsel %vm733_vm0, %v6699_v42, %v737_v13  ;;  %v740_v18 = vsel %vm733_vm0, %v737_v13, %v739_v50  ;;  %v742_v62 = vsel %vm733_vm0, %v739_v50, %v741_v37 }
 0x134   : > { %v743_v8 = vrot.slane %v4972_v52, 7  ;;  %v880_v27 = vrot.slane %v533_v36, 7  ;;  %v968_v42 = vrot.slane %v4984_v40, 7  ;;  %v1041_v12 = vrot.slane %v740_v18, 1 }
 0x135   : > { %v4986_v26 = vpop.permute.xlu0 %546  ;;  %6786 = vst [vmem:[#allocation40_spill] sm:$0xff] %v5000_v32  ;;  %v1043_v51 = vrot.slane %v742_v62, 1  ;;  %v3928_v36 = vunpack.i.h.bf16 %v4796_v53  ;;  %v6787_v35 = vrot.slane %v4974_v30, 7  ;;  %v6789_v62 = vrot.slane %v4996_v3, 2 }
 0x136   : > { %v670_v28 = vmul.f32 %v4986_v26, %v4956_v21  ;;  %v744_v40 = vsel %vm733_vm0, %v741_v37, %v743_v8 }
 0x137   : > { %v4998_v49 = vpop.permute.xlu1 %550 }
 0x138   : > { %6785 = vst [vmem:[#allocation39_spill] sm:$0xff] %v4998_v49  ;;  %v964_v63 = vrot.slane %v670_v28, 7  ;;  %v671_v23 = vmul.f32 %v4998_v49, %v4959_v29  ;;  %574 = vperm.xlu1 %3981, %v4991_v25   ;;  %v261_v49 = vld [vmem:[%s4356_s8 + $0x40] sm:$0xff] }
 0x13a   : > { %v965_v13 = vsel %vm733_vm0, %v963_v41, %v964_v63  ;;  %v966_v50 = vrot.slane %v671_v23, 7  ;;  %356 = vperm.xlu2 %3970, %v4681_v7   ;;  %3573 = vmatmul.msk.bf16.gmra.mxu2 %vm1525_vm5, %v5000_v32  ;;  %v5028_v41 = vsel %vm733_vm0, %v743_v8, %v6787_v35  ;;  %v3927_v7 = vunpack.i.l.bf16 %v4796_v53 }
 0x13b   : > { %v1199_v46 = vrot.slane %v965_v13, 2  ;;  %v6788_v23 = vrot.slane %v4909_v39, 7  ;;  %v734_v32 = vrot.slane %v4918_v48, 7  ;;  %v6791_v35 = vrot.slane %v5005_v19, 1 }
 0x13c   : > { %v967_v6 = vsel %vm733_vm0, %v964_v63, %v966_v50  ;;  %v6790_v63 = vrot.slane %v4980_v1, 7  ;;  %v969_v8 = vsel %vm733_vm0, %v966_v50, %v968_v42  ;;  %v3949_v50 = vunpack.i.l.bf16 %v4928_v47 }
 0x13d   : > { %v881_v28 = vsel %vm733_vm0, %v6788_v23, %v880_v27  ;;  %v1201_v18 = vrot.slane %v967_v6, 2  ;;  %v1200_v13 = vsel %vm1194_vm2, %v6789_v62, %v1199_v46  ;;  %v1042_v53 = vsel %vm1032_vm1, %v6791_v35, %v1041_v12 }
 0x13e   : > { %v883_v37 = vsel %vm733_vm0, %v880_v27, %v6790_v63  ;;  %v1044_v23 = vsel %vm1032_vm1, %v1041_v12, %v1043_v51  ;;  %v1045_v62 = vrot.slane %v744_v40, 1  ;;  %v5050_v27 = vpop.permute.xlu0 %566  ;;  %v3950_v63 = vunpack.i.h.bf16 %v4928_v47 }
 0x13f   : > { %v5045_v39 = vpop.permute.xlu1 %558  ;;  %v1202_v6 = vsel %vm1194_vm2, %v1199_v46, %v1201_v18  ;;  %6793 = vst [vmem:[#allocation42_spill] sm:$0xff] %v5050_v27  ;;  %v1203_v24 = vrot.slane %v969_v8, 2  ;;  %v1383_v12 = vsel %vm1355_vm3, %v883_v37, %v3928_v36  ;;  %v1382_v47 = vsel %vm1355_vm3, %v881_v28, %v3927_v7 }
 0x140   : > { %6792 = vst [vmem:[#allocation41_spill] sm:$0xff] %v5045_v39  ;;  %v5056_v35 = vmul.f32 %v5045_v39, %v4946_v16  ;;  %3983 = vset.pattern.permute.xlu1 %v6760_v17  ;;  %v4010_v46 = vpack.i.bf16 %v1202_v6, %v1200_v13  ;;  %v3984_v39 = vpack.i.bf16 %v1044_v23, %v1042_v53  ;;  %v6794_v13 = vrot.slane %v5028_v41, 1  ;;  %v5091_v23 = vpop.permute.xlu2 %3960 }
 0x141   : > { %366 = vperm.xlu1 %3983, %v4653_v9   ;;  %v1046_v57 = vsel %vm1032_vm1, %v1043_v51, %v1045_v62  ;;  %v799_v9 = vsel %vm733_vm0, 0.0, %v734_v32  ;;  %v1416_v28 = vsel %vm1388_vm4, %v1383_v12, %v3950_v63  ;;  %v1204_v37 = vsel %vm1194_vm2, %v1201_v18, %v1203_v24 }
 0x142   : > { %v6716_v40 = vrot.slane %v5056_v35, 7  ;;  %351 = vperm.xlu2 %3970, %v4725_v15   ;;  %4011 = vrot.lane.b32.xlu0 %v4010_v46, %s4288_s14  ;;  %v1048_v8 = vsel %vm1032_vm1, %v1045_v62, %v6794_v13  ;;  %v1415_v15 = vsel %vm1388_vm4, %v1382_v47, %v3949_v50  ;;  %v5081_v51 = vmax.f32 %v260_v43, 0.0 }
 0x143   : > { %v5083_v53 = vmax.f32 %v261_v49, 0.0  ;;  %v5087_v6 = vmul.f32 %v4881_v59, %v4611_v56  ;;  %v4016_v63 = vpack.i.bf16 %v1048_v8, %v1046_v57  ;;  %v4289_v50 = vmov 0.0  }
 0x144   : > { %v5075_v36 = vsel %vm733_vm0, %v968_v42, %v6716_v40  ;;  %v535_v42 = vmul.f32 %v4849_v11, %v4517_v33  ;;  %v5096_v18 = vrot.slane %v4289_v50, 1  ;;  %v1035_v43 = vrot.slane %v799_v9, 1  ;;  %v263_v40 = vld [vmem:[%s4356_s8 + $0x50] sm:$0xff] }
 0x145   : > { %v6713_v7 = vrot.slane %v5075_v36, 2  ;;  %v5098_v49 = vpack.c.bf16 %v1416_v28, %v1415_v15  ;;  %v747_v33 = vrot.slane %v5081_v51, 7  ;;  %v6715_v12 = vrot.slane %v5083_v53, 7 }
 0x146   : > { %v5101_v56 = vpop.permute.xlu0 %491  ;;  %v884_v47 = vrot.slane %v535_v42, 7  ;;  %v1036_v57 = vsel %vm1032_vm1, %v5096_v18, %v1035_v43  ;;  %v3939_v8 = vunpack.i.l.bf16 %v4940_v54  ;;  %v6798_v9 = vrot.slane %v4974_v30, 7 }
 0x147   : > { %v1206_v62 = vsel %vm1194_vm2, %v1203_v24, %v6713_v7  ;;  %6795 = vst [vmem:[#allocation43_spill] sm:$0xff] %v5098_v49  ;;  %v6714_v24 = vrot.slane %v5087_v6, 7  ;;  %v5123_v28 = vsel %vm733_vm0, %v747_v33, %v6715_v12  ;;  %v262_v12 = vld [vmem:[%s4356_s8 + $0x48] sm:$0xff] }
 0x148   : > { %v3989_v46 = vpack.i.bf16 %v1206_v62, %v1204_v37  ;;  %6796 = vst [vmem:[#allocation44_spill] sm:$0xff] %v5101_v56  ;;  %v748_v15 = vsel %vm733_vm0, %v6798_v9, %v747_v33  ;;  %v6799_v37 = vrot.slane %v4980_v1, 7  ;;  %v3940_v62 = vunpack.i.h.bf16 %v4940_v54  ;;  %v5144_v54 = vld [vmem:[%s6653_s5 + $0x60] sm:$0xff] }
 0x149   : > { %3985 = vrot.lane.b32.xlu1 %v3984_v39, %s4287_s19  ;;  %v6797_v39 = vrot.slane %v4956_v21, 7  ;;  %v887_v33 = vsel %vm733_vm0, %v884_v47, %v6714_v24  ;;  %v3956_v1 = vunpack.i.l.bf16 %v4900_v44  ;;  %v1049_v9 = vrot.slane %v748_v15, 1 }
 0x14a   : > { %3574 = vmatmul.msk.bf16.gmra.mxu2 %vm1525_vm5, %v5098_v49  ;;  %3990 = vrot.lane.b32.xlu2 %v3989_v46, %s4288_s14  ;;  %v885_v42 = vsel %vm733_vm0, %v6799_v37, %v884_v47  ;;  %v1051_v37 = vrot.slane %v5123_v28, 1  ;;  %v1385_v47 = vsel %vm1355_vm3, %v887_v33, %v3940_v62  ;;  %v6801_v15 = vrot.slane %v5005_v19, 1 }
 0x14b   : > { %4017 = vrot.lane.b32.xlu0 %v4016_v63, %s4287_s19  ;;  %3994 = vset.pattern.permute.xlu1 %v6759_v34  ;;  %v736_v13 = vsel %vm733_vm0, %v734_v32, %v6797_v39  ;;  %v5132_v32 = vld [vmem:[%s6653_s5 + $0x50] sm:$0xff]  ;;  %v3995_v63 = vpack.i.bf16 %v1036_v57, %v5096_v18  ;;  %v5138_v39 = vrot.slane %v4289_v50, 2  ;;  %v5147_v57 = vpop.permute.xlu2 %562  ;;  %v1384_v7 = vsel %vm1355_vm3, %v885_v42, %v3939_v8 }
 0x14c   : > { %v1037_v46 = vrot.slane %v736_v13, 1  ;;  %6800 = vst [vmem:[#allocation45_spill] sm:$0xff] %v5147_v57  ;;  %v3957_v13 = vunpack.i.h.bf16 %v4900_v44  ;;  %v675_v44 = vmul.f32 %v5050_v27, %v4974_v30  ;;  %v6802_v8 = vrot.slane %v4996_v3, 2 }
 0x14d   : > { %v674_v62 = vmul.f32 %v5147_v57, %v4972_v52  ;;  %v6803_v19 = vrot.slane %v5028_v41, 1  ;;  %v5177_v59 = vmax.f32 %v262_v12, 0.0  ;;  %v5179_v3 = vmax.f32 %v263_v40, 0.0 }
 0x14e   : > { %v5152_v50 = vpop.permute.xlu0 %361  ;;  %v1038_v24 = vsel %vm1032_vm1, %v1035_v43, %v1037_v46  ;;  %v1040_v28 = vsel %vm1032_vm1, %v1037_v46, %v6801_v15  ;;  %v1198_v42 = vsel %vm1194_vm2, %v5138_v39, %v6802_v8  ;;  %v1417_v43 = vsel %vm1388_vm4, %v1384_v7, %v3956_v1 }
 0x14f   : > { %v1052_v46 = vsel %vm1032_vm1, %v1049_v9, %v1051_v37  ;;  %v4000_v33 = vpack.i.bf16 %v1040_v28, %v1038_v24  ;;  %v1418_v15 = vsel %vm1388_vm4, %v1385_v47, %v3957_v13  ;;  %v4005_v8 = vpack.i.bf16 %v1198_v42, %v5138_v39 }
 0x150   : > { %v974_v11 = vrot.slane %v675_v44, 7  ;;  %v972_v57 = vrot.slane %v674_v62, 7  ;;  %v5182_v49 = vpack.c.bf16 %v1418_v15, %v1417_v43  ;;  %v751_v41 = vrot.slane %v5177_v59, 7  ;;  %v299_v62 = vld [vmem:[%s6653_s5 + $0x70] sm:$0xff] }
 0x151   : > { %582 = vperm.xlu1 %3994, %v5132_v32   ;;  %v753_v7 = vrot.slane %v5179_v3, 7  ;;  %v6804_v12 = vrot.slane %v5056_v35, 7  ;;  %v6805_v47 = vrot.slane %v5083_v53, 7 }
 0x152   : > { %3996 = vrot.lane.b32.xlu2 %v3995_v63, %s4287_s19  ;;  %v1050_v63 = vsel %vm1032_vm1, %v6803_v19, %v1049_v9  ;;  %v975_v9 = vsel %vm733_vm0, %v972_v57, %v974_v11 }
 0x153   : > { %590 = vperm.xlu0 %3982, %v5144_v54   ;;  %v4028_v27 = vpack.i.bf16 %v1052_v46, %v1050_v63  ;;  %v973_v1 = vsel %vm733_vm0, %v6804_v12, %v972_v57  ;;  %v752_v28 = vsel %vm733_vm0, %v6805_v47, %v751_v41  ;;  %v5209_v44 = vsel %vm733_vm0, %v751_v41, %v753_v7  ;;  %v266_v41 = vld [vmem:[%s4356_s8 + $0x68] sm:$0xff]  ;;  %v267_v12 = vld [vmem:[%s4356_s8 + $0x70] sm:$0xff] }
 0x154   : > { %v1209_v42 = vrot.slane %v975_v9, 2  ;;  %v1053_v43 = vrot.slane %v752_v28, 1  ;;  %v6726_v19 = vrot.slane %v5209_v44, 1  ;;  %v6806_v63 = vrot.slane %v5075_v36, 2  ;;  %v296_v36 = vld [vmem:[%s6653_s5 + $0x58] sm:$0xff]  ;;  %v3835_v9 = vld [vmem:[%s6649_s1 + $0x88] sm:$0xff] }
 0x155   : > { %1856 = vmatpush.bf16.msrb.mxu2 %v3835_v9  ;;  %v3833_v9 = vld [vmem:[%s6649_s1 + $0x78] sm:$0xff] }
 0x156   : > { %v1054_v15 = vsel %vm1032_vm1, %v1051_v37, %v1053_v43  ;;  %v5245_v37 = vmax.f32 %v266_v41, 0.0 }
 0x157   : > { %v5187_v24 = vpop.permute.xlu0 %570 }
 0x158   : > { %v5194_v40 = vmul.f32 %v5187_v24, %v5081_v51  ;;  %v6725_v47 = vrot.slane %v5245_v37, 7 }
 0x159   : > { %4001 = vrot.lane.b32.xlu1 %v4000_v33, %s4287_s19 }
 0x15a   : > { %3575 = vmatmul.msk.bf16.gmra.mxu2 %vm1525_vm5, %v5182_v49  ;;  %4006 = vrot.lane.b32.xlu2 %v4005_v8, %s4288_s14  ;;  %v976_v13 = vrot.slane %v5194_v40, 7  ;;  %v511_v40 = vmul.f32 %v5152_v50, %v4959_v29 }
 0x15b   : > { %4029 = vrot.lane.b32.xlu0 %v4028_v27, %s4287_s19  ;;  %4015 = vset.pattern.permute.xlu1 %v6760_v17  ;;  %v1207_v27 = vrot.slane %v973_v1, 2  ;;  %v5247_v1 = vmax.f32 %v267_v12, 0.0  ;;  %v3962_v12 = vunpack.i.l.bf16 %v5091_v23 }
 0x15c   : > { %v5214_v35 = vsel %vm733_vm0, %v974_v11, %v976_v13 }
 0x15d   : > { %v1211_v57 = vrot.slane %v5214_v35, 2  ;;  %v1208_v11 = vsel %vm1194_vm2, %v6806_v63, %v1207_v27  ;;  %v1210_v46 = vsel %vm1194_vm2, %v1207_v27, %v1209_v42  ;;  %v761_v28 = vrot.slane %v5247_v1, 7 }
 0x15e   : > { %v4021_v8 = vpack.i.bf16 %v1210_v46, %v1208_v11  ;;  %v5269_v11 = vld [vmem:[%s6653_s5 + $0x68] sm:$0xff]  ;;  %v6808_v46 = vrot.slane %v4394_v20, 1  ;;  %v537_v20 = vmul.f32 %v5101_v56, %v4613_v58  ;;  %v3963_v58 = vunpack.i.h.bf16 %v5091_v23 }
 0x15f   : > { %v5230_v33 = vsel %vm1194_vm2, %v1209_v42, %v1211_v57  ;;  %v5260_v27 = vsel %vm733_vm0, %v6725_v47, %v761_v28  ;;  %v6807_v42 = vrot.slane %v4368_v10, 7 }
 0x160   : > { %v888_v41 = vrot.slane %v537_v20, 7  ;;  %v3820_v20 = vld [vmem:[%s6649_s1 + $0x10] sm:$0xff] }
 0x161   : > { %371 = vperm.xlu1 %4015, %v4711_v4   ;;  %v1056_v4 = vsel %vm1032_vm1, %v1053_v43, %v6726_v19  ;;  %v764_v43 = vsel %vm733_vm0, %v761_v28, %v6807_v42  ;;  %v6811_v28 = vrot.slane %v5087_v6, 7 }
 0x162   : > { %376 = vperm.xlu2 %3970, %v4768_v2   ;;  %v4040_v2 = vpack.i.bf16 %v1056_v4, %v1054_v15  ;;  %v1065_v63 = vrot.slane %v764_v43, 1  ;;  %v5279_v4 = vpop.permute.xlu2 %506 }
 0x163   : > { %598 = vperm.xlu0 %3982, %v299_v62   ;;  %6809 = vst [vmem:[#allocation46_spill] sm:$0xff] %v5279_v4  ;;  %v889_v42 = vsel %vm733_vm0, %v6811_v28, %v888_v41  ;;  %v3830_v28 = vld [vmem:[%s6649_s1 + $0x60] sm:$0xff] }
 0x164   : > { %v1068_v10 = vsel %vm1032_vm1, %v1065_v63, %v6808_v46  ;;  %v1386_v46 = vsel %vm1355_vm3, %v889_v42, %v3962_v12 }
 0x169   : > { %4022 = vrot.lane.b32.xlu1 %v4021_v8, %s4288_s14  ;;  %v5287_v8 = vpop.permute.xlu1 %496 }
 0x16a   : > { %4026 = vset.pattern.permute.xlu2 %v6759_v34  ;;  %6810 = vst [vmem:[#allocation47_spill] sm:$0xff] %v5287_v8 }
 0x16b   : > { %4041 = vrot.lane.b32.xlu0 %v4040_v2, %s4287_s19  ;;  %586 = vperm.xlu2 %4026, %v296_v36   ;;  %v538_v2 = vmul.f32 %v5287_v8, %v4729_v31  ;;  %v3821_v31 = vld [vmem:[%s6649_s1 + $0x18] sm:$0xff] }
 0x16c   : > { %4050 = vset.pattern.permute.xlu0 %v6760_v17 }
 0x171   : > { %381 = vperm.xlu1 %4015, %v4706_v45   ;;  %v6724_v45 = vrot.slane %v5260_v27, 1 }
 0x173   : > { %406 = vperm.xlu0 %4050, %v296_v36   ;;  %4027 = vset.pattern.permute.xlu2 %v6760_v17 }
 0x174   : > { %386 = vperm.xlu2 %4027, %v4780_v61   ;;  %v1066_v61 = vsel %vm1032_vm1, %v6724_v45, %v1065_v63 }
 0x175   : > { %v4071_v15 = vpack.i.bf16 %v1068_v10, %v1066_v61 }
 0x17b   : > { %421 = vperm.xlu0 %4050, %v299_v62   ;;  %v3834_v62 = vld [vmem:[%s6649_s1 + $0x80] sm:$0xff] }
 0x17c   : > { %4038 = vset.pattern.permute.xlu2 %v6759_v34  ;;  %1857 = vmatpush.bf16.msrb.mxu2 %v3834_v62 }
 0x17d   : > { %594 = vperm.xlu2 %4038, %v5269_v11  }
 0x180   : > { %1858 = vmatpush.bf16.msrb.mxu2 %v3833_v9  ;;  %v3818_v9 = vld [vmem:[%s6649_s1] sm:$0xff] }
 0x183   : > { %4072 = vrot.lane.b32.xlu0 %v4071_v15, %s4287_s19 }
 0x184   : > { %4241 = vset.pattern.permute.xlu0 %v6759_v34  ;;  %v3823_v34 = vld [vmem:[%s6649_s1 + $0x28] sm:$0xff] }
 0x185   : > { %4039 = vset.pattern.permute.xlu2 %v6760_v17  ;;  %1704 = vmatpush.bf16.msra.mxu1 %v3823_v34  ;;  %v890_v17 = vrot.slane %v538_v2, 7  ;;  %v3832_v2 = vld [vmem:[%s6649_s1 + $0x70] sm:$0xff] }
 0x186   : > { %396 = vperm.xlu2 %4039, %v4866_v55   ;;  %3860 = vmatpush.bf16.msra.mxu3 %v3823_v34  ;;  %v3822_v55 = vld [vmem:[%s6649_s1 + $0x20] sm:$0xff]  ;;  %v3819_v34 = vld [vmem:[%s6649_s1 + $0x8] sm:$0xff] }
 0x187   : > { %1859 = vmatpush.bf16.msrb.mxu2 %v3832_v2 }
 0x189   : > { %1705 = vmatpush.bf16.msra.mxu1 %v3822_v55 }
 0x18a   : > { %3861 = vmatpush.bf16.msra.mxu3 %v3822_v55 }
 0x18c   : > { %v3978_v36 = vpop.permute.xlu2 %3977 }
 0x18d   : > { %1706 = vmatpush.bf16.msra.mxu1 %v3821_v31 }
 0x18e   : > { %401 = vperm.xlu2 %4039, %v5132_v32   ;;  %v891_v32 = vsel %vm733_vm0, %v888_v41, %v890_v17  ;;  %3862 = vmatpush.bf16.msra.mxu3 %v3821_v31  ;;  %v3831_v41 = vld [vmem:[%s6649_s1 + $0x68] sm:$0xff] }
 0x18f   : > { %v1387_v10 = vsel %vm1355_vm3, %v891_v32, %v3963_v58  ;;  %v5339_v58 = vmul.f32 %v5279_v4, %v4807_v14  ;;  %1860 = vmatpush.bf16.msrb.mxu2 %v3831_v41 }
 0x191   : > { %1707 = vmatpush.bf16.msra.mxu1 %v3820_v20  ;;  %6813 = vst [vmem:[#allocation49_spill] sm:$0xff] %v5339_v58  ;;  %v6723_v42 = vrot.slane %v5339_v58, 7 }
 0x192   : > { %v3966_v43 = vpop.permute.xlu1 %3965  ;;  %3863 = vmatpush.bf16.msra.mxu3 %v3820_v20 }
 0x193   : > { %v3968_v63 = vunpack.i.h.bf16 %v3966_v43  ;;  %v3967_v23 = vunpack.i.l.bf16 %v3966_v43  ;;  %1861 = vmatpush.bf16.msrb.mxu2 %v3830_v28 }
 0x194   : > { %v5313_v61 = vpop.permute.xlu2 %356 }
 0x195   : > { %v1419_v15 = vsel %vm1388_vm4, %v1386_v46, %v3967_v23  ;;  %v1420_v6 = vsel %vm1388_vm4, %v1387_v10, %v3968_v63  ;;  %1708 = vmatpush.bf16.msra.mxu1 %v3819_v34  ;;  %v3980_v63 = vunpack.i.h.bf16 %v3978_v36  ;;  %v3979_v23 = vunpack.i.l.bf16 %v3978_v36 }
 0x196   : > { %v5319_v62 = vpack.c.bf16 %v1420_v6, %v1419_v15  ;;  %3864 = vmatpush.bf16.msra.mxu3 %v3819_v34  ;;  %v510_v35 = vmul.f32 %v5313_v61, %v4956_v21 }
 0x198   : > { %3576 = vmatmul.msk.bf16.gmra.mxu2 %vm1525_vm5, %v5319_v62 }
 0x199   : > { %1709 = vmatpush.bf16.msra.mxu1 %v3818_v9 }
 0x19a   : > { %v5335_v55 = vpop.permute.xlu1 %501  ;;  %3865 = vmatpush.bf16.msra.mxu3 %v3818_v9 }
 0x19b   : > { %6812 = vst [vmem:[#allocation48_spill] sm:$0xff] %v5335_v55  ;;  %v539_v12 = vmul.f32 %v5335_v55, %v4720_v0 }
 0x19c   : > { %v5343_v31 = vpop.permute.xlu2 %351 }
 0x19d   : > { %v892_v14 = vrot.slane %v539_v12, 7  ;;  %v5368_v12 = vpop.permute.xlu0 %578 }
 0x19f   : > { %v893_v46 = vsel %vm733_vm0, %v890_v17, %v892_v14  ;;  %v895_v10 = vsel %vm733_vm0, %v892_v14, %v6723_v42 }
 0x1a2   : > { %v3973_v0 = vpop.permute.xlu1 %3972 }
 0x1a3   : > { %v3975_v32 = vunpack.i.h.bf16 %v3973_v0  ;;  %v3974_v43 = vunpack.i.l.bf16 %v3973_v0 }
 0x1a4   : > { %v3991_v15 = vpop.permute.xlu2 %3990 }
 0x1a5   : > { %v1472_v6 = vsel %vm1355_vm3, %v895_v10, %v3975_v32  ;;  %v1471_v20 = vsel %vm1355_vm3, %v893_v46, %v3974_v43  ;;  %v3993_v21 = vunpack.i.h.bf16 %v3991_v15 }
 0x1a6   : > { %v1473_v2 = vsel %vm1388_vm4, %v1471_v20, %v3979_v23  ;;  %v1474_v34 = vsel %vm1388_vm4, %v1472_v6, %v3980_v63  ;;  %v5381_v23 = vpop.f32.mrf.mxu2 }
 0x1a7   : > { %v5360_v41 = vpack.c.bf16 %v1474_v34, %v1473_v2  ;;  %6814 = vst [vmem:[#allocation50_spill] sm:$0xff] %v5381_v23 }
 0x1a9   : > { %3577 = vmatmul.msk.bf16.gmra.mxu2 %vm1525_vm5, %v5360_v41 }
 0x1aa   : > { %v5364_v36 = vpop.permute.xlu1 %574 }
 0x1ab   : > { %v677_v17 = vmul.f32 %v5364_v36, %v5083_v53 }
 0x1ac   : > { %v3997_v9 = vpop.permute.xlu2 %3996 }
 0x1ad   : > { %v978_v28 = vrot.slane %v677_v17, 7  ;;  %v3999_v32 = vunpack.i.h.bf16 %v3997_v9  ;;  %v3998_v43 = vunpack.i.l.bf16 %v3997_v9 }
 0x1af   : > { %v5373_v14 = vsel %vm733_vm0, %v976_v13, %v978_v28  ;;  %v1357_v13 = vsel %vm1355_vm3, 0.0, %v3999_v32  ;;  %v1356_v6 = vsel %vm1355_vm3, 0.0, %v3998_v43  ;;  %v836_v32 = vrot.slane %v511_v40, 7 }
 0x1b0   : > { %v6727_v0 = vrot.slane %v5373_v14, 2  ;;  %v834_v43 = vrot.slane %v510_v35, 7 }
 0x1b2   : > { %v1214_v63 = vsel %vm1194_vm2, %v1211_v57, %v6727_v0 }
 0x1b3   : > { %v5383_v46 = vpop.permute.xlu1 %366  ;;  %v4033_v10 = vpack.i.bf16 %v1214_v63, %v5230_v33 }
 0x1b4   : > { %v5390_v20 = vpop.permute.xlu0 %4011  ;;  %v4007_v2 = vpop.permute.xlu2 %4006  ;;  %v5396_v57 = vmul.f32 %v5383_v46, %v4933_v22  ;;  %v3992_v22 = vunpack.i.l.bf16 %v3991_v15 }
 0x1b5   : > { %4034 = vrot.lane.b32.xlu1 %v4033_v10, %s4288_s14  ;;  %v4009_v33 = vunpack.i.h.bf16 %v4007_v2  ;;  %v4008_v34 = vunpack.i.l.bf16 %v4007_v2  ;;  %v678_v10 = vmul.f32 %v5368_v12, %v5177_v59  ;;  %v4014_v56 = vunpack.i.h.bf16 %v5390_v20 }
 0x1b6   : > { %v6728_v63 = vrot.slane %v5396_v57, 7 }
 0x1b7   : > { %v5400_v29 = vsel %vm1388_vm4, %v1356_v6, %v4008_v34  ;;  %v1390_v17 = vsel %vm1388_vm4, %v1357_v13, %v4009_v33  ;;  %v837_v13 = vsel %vm733_vm0, %v834_v43, %v836_v32  ;;  %v5417_v33 = vpop.f32.mrf.mxu2  ;;  %v980_v45 = vrot.slane %v678_v10, 7 }
 0x1b8   : > { %v1421_v9 = vpack.c.bf16 %v1390_v17, %v5400_v29  ;;  %v839_v40 = vsel %vm733_vm0, %v836_v32, %v6728_v63  ;;  %6815 = vst [vmem:[#allocation51_spill] sm:$0xff] %v5417_v33  ;;  %v509_v32 = vmul.f32 %v5343_v31, %v4918_v48 }
 0x1ba   : > { %3602 = vmatmul.msk.bf16.vlgmr.msra.gmra.mxu1 %vm1525_vm5, %v1421_v9  ;;  %v265_v9 = vld [vmem:[%s4356_s8 + $0x60] sm:$0xff] }
 0x1bb   : > { %v3986_v2 = vpop.permute.xlu1 %3985  ;;  %v5429_v63 = vmax.f32 %v265_v9, 0.0 }
 0x1bc   : > { %v3988_v6 = vunpack.i.h.bf16 %v3986_v2  ;;  %v3987_v34 = vunpack.i.l.bf16 %v3986_v2  ;;  %v5408_v42 = vpop.permute.xlu2 %376  ;;  %v264_v2 = vld [vmem:[%s4356_s8 + $0x58] sm:$0xff] }
 0x1bd   : > { %v5414_v35 = vpop.permute.xlu0 %4017  ;;  %391 = vperm.xlu1 %4015, %v4991_v25   ;;  %v5431_v25 = vmax.f32 %v264_v2, 0.0 }
 0x1be   : > { %v1361_v15 = vsel %vm1355_vm3, %v839_v40, %v3988_v6  ;;  %v1360_v17 = vsel %vm1355_vm3, %v837_v13, %v3987_v34  ;;  %v981_v6 = vsel %vm733_vm0, %v978_v28, %v980_v45 }
 0x1bf   : > { %v1393_v47 = vsel %vm1388_vm4, %v1360_v17, %v3992_v22  ;;  %v1394_v19 = vsel %vm1388_vm4, %v1361_v15, %v3993_v21  ;;  %v6734_v22 = vrot.slane %v5429_v63, 7  ;;  %v755_v21 = vrot.slane %v5431_v25, 7  ;;  %v5460_v2 = vpop.f32.mrf.mxu2 }
 0x1c0   : > { %v5425_v0 = vpack.c.bf16 %v1394_v19, %v1393_v47  ;;  %v833_v47 = vrot.slane %v509_v32, 7  ;;  %v1215_v10 = vrot.slane %v981_v6, 2  ;;  %6817 = vst [vmem:[#allocation53_spill] sm:$0xff] %v5460_v2  ;;  %v4013_v2 = vunpack.i.l.bf16 %v5390_v20 }
 0x1c1   : > { %v756_v17 = vsel %vm733_vm0, %v753_v7, %v755_v21  ;;  %v5458_v9 = vsel %vm733_vm0, %v755_v21, %v6734_v22  ;;  %v6818_v7 = vrot.slane %v5373_v14, 2 }
 0x1c2   : > { %3654 = vmatmul.msk.bf16.vlgmr.msrb.gmra.mxu2 %vm1525_vm5, %v5425_v0  ;;  %v929_v4 = vsel %vm733_vm0, 0.0, %v833_v47  ;;  %v1057_v21 = vrot.slane %v756_v17, 1 }
 0x1c3   : > { %v5436_v34 = vpop.permute.xlu1 %582  ;;  %v1216_v58 = vsel %vm1194_vm2, %v6818_v7, %v1215_v10 }
 0x1c4   : > { %v679_v19 = vmul.f32 %v5436_v34, %v5179_v3 }
 0x1c5   : > { %v5442_v48 = vpop.permute.xlu0 %590  ;;  %v5448_v15 = vpop.permute.xlu2 %586 }
 0x1c6   : > { %6816 = vst [vmem:[#allocation52_spill] sm:$0xff] %v5442_v48  ;;  %v982_v13 = vrot.slane %v679_v19, 7  ;;  %v5446_v40 = vmul.f32 %v5442_v48, %v5429_v63  ;;  %v680_v28 = vmul.f32 %v5448_v15, %v5431_v25  ;;  %v835_v19 = vsel %vm733_vm0, %v833_v47, %v834_v43 }
 0x1c8   : > { %v983_v32 = vsel %vm733_vm0, %v980_v45, %v982_v13  ;;  %v986_v6 = vrot.slane %v5446_v40, 7  ;;  %v984_v8 = vrot.slane %v680_v28, 7 }
 0x1c9   : > { %v1217_v55 = vrot.slane %v983_v32, 2 }
 0x1ca   : > { %v985_v45 = vsel %vm733_vm0, %v982_v13, %v984_v8  ;;  %v987_v40 = vsel %vm733_vm0, %v984_v8, %v986_v6  ;;  %v6819_v13 = vrot.slane %v5209_v44, 1 }
 0x1cb   : > { %v4002_v43 = vpop.permute.xlu1 %4001  ;;  %v1218_v47 = vsel %vm1194_vm2, %v1215_v10, %v1217_v55  ;;  %v1219_v32 = vrot.slane %v985_v45, 2  ;;  %v1221_v28 = vrot.slane %v987_v40, 2 }
 0x1cc   : > { %v4004_v33 = vunpack.i.h.bf16 %v4002_v43  ;;  %v4003_v23 = vunpack.i.l.bf16 %v4002_v43  ;;  %v4045_v14 = vpack.i.bf16 %v1218_v47, %v1216_v58  ;;  %v1058_v45 = vsel %vm1032_vm1, %v6819_v13, %v1057_v21 }
 0x1cd   : > { %v5475_v48 = vpop.permute.xlu0 %4029  ;;  %v1220_v8 = vsel %vm1194_vm2, %v1217_v55, %v1219_v32  ;;  %v1222_v20 = vsel %vm1194_vm2, %v1219_v32, %v1221_v28  ;;  %v514_v58 = vmul.f32 %v5408_v42, %v4972_v52  ;;  %v5494_v55 = vpop.f32.mrf.mxu2  ;;  %v4020_v32 = vunpack.i.h.bf16 %v5414_v35 }
 0x1ce   : > { %v1358_v17 = vsel %vm1355_vm3, %v929_v4, %v4003_v23  ;;  %v1359_v7 = vsel %vm1355_vm3, %v835_v19, %v4004_v33  ;;  %v5479_v22 = vpop.permute.xlu2 %386  ;;  %4046 = vrot.lane.b32.xlu1 %v4045_v14, %s4288_s14  ;;  %v4056_v4 = vpack.i.bf16 %v1222_v20, %v1220_v8  ;;  %v6820_v33 = vrot.slane %v5458_v9, 1 }
 0x1cf   : > { %v1391_v10 = vsel %vm1388_vm4, %v1358_v17, %v4013_v2  ;;  %v1392_v23 = vsel %vm1388_vm4, %v1359_v7, %v4014_v56  ;;  %v842_v52 = vrot.slane %v514_v58, 7  ;;  %v6821_v8 = vrot.slane %v5245_v37, 7 }
 0x1d0   : > { %v1060_v19 = vsel %vm1032_vm1, %v1057_v21, %v6820_v33  ;;  %v1422_v40 = vpack.c.bf16 %v1392_v23, %v1391_v10  ;;  %4057 = vrot.lane.b32.xlu2 %v4056_v4, %s4288_s14  ;;  %v4019_v10 = vunpack.i.l.bf16 %v5414_v35  ;;  %v6823_v13 = vrot.slane %v5396_v57, 7 }
 0x1d1   : > { %v4051_v2 = vpack.i.bf16 %v1060_v19, %v1058_v45 }
 0x1d2   : > { %3562 = vmatmul.msk.bf16.vlgmr.msra.gmra.mxu0 %vm1525_vm5, %v1422_v40  ;;  %3603 = vmatmul.msk.bf16.gmra.mxu1 %vm1525_vm5, %v1422_v40 }
 0x1d3   : > { %v5499_v44 = vpop.permute.xlu1 %371 }
 0x1d4   : > { %v513_v56 = vmul.f32 %v5499_v44, %v4946_v16  ;;  %v6822_v16 = vrot.slane %v5429_v63, 7 }
 0x1d5   : > { %v5503_v43 = vpop.permute.xlu0 %598  ;;  %v5525_v40 = vpop.f32.mrf.mxu2 }
 0x1d6   : > { %v840_v47 = vrot.slane %v513_v56, 7  ;;  %v683_v21 = vmul.f32 %v5503_v43, %v5247_v1  ;;  %4052 = vrot.lane.b32.xlu1 %v4051_v2, %s4287_s19  ;;  %v760_v20 = vsel %vm733_vm0, %v6822_v16, %v6821_v8 }
 0x1d7   : > { %v5509_v14 = vpop.permute.xlu2 %594  ;;  %v1061_v19 = vrot.slane %v760_v20, 1  ;;  %v6824_v20 = vrot.slane %v5458_v9, 1 }
 0x1d8   : > { %v843_v17 = vsel %vm733_vm0, %v840_v47, %v842_v52  ;;  %v682_v7 = vmul.f32 %v5509_v14, %v5245_v37  ;;  %v841_v45 = vsel %vm733_vm0, %v6823_v13, %v840_v47  ;;  %v990_v58 = vrot.slane %v683_v21, 7  ;;  %416 = vperm.xlu2 %4039, %v5269_v11  }
 0x1d9   : > { %v1363_v33 = vsel %vm1355_vm3, %v843_v17, %v4020_v32  ;;  %v1362_v47 = vsel %vm1355_vm3, %v841_v45, %v4019_v10  ;;  %v1062_v13 = vsel %vm1032_vm1, %v6824_v20, %v1061_v19  ;;  %v6826_v45 = vrot.slane %v4525_v38, 7 }
 0x1da   : > { %v988_v4 = vrot.slane %v682_v7, 7 }
 0x1db   : > { %v4023_v23 = vpop.permute.xlu1 %4022 }
 0x1dc   : > { %v989_v2 = vsel %vm733_vm0, %v986_v6, %v988_v4  ;;  %v991_v56 = vsel %vm733_vm0, %v988_v4, %v990_v58  ;;  %v4025_v8 = vunpack.i.h.bf16 %v4023_v23  ;;  %v4024_v35 = vunpack.i.l.bf16 %v4023_v23 }
 0x1dd   : > { %v1223_v16 = vrot.slane %v989_v2, 2  ;;  %v1225_v57 = vrot.slane %v991_v56, 2  ;;  %v6825_v4 = vrot.slane %v5260_v27, 1  ;;  %v4031_v27 = vunpack.i.l.bf16 %v5475_v48 }
 0x1de   : > { %v1395_v21 = vsel %vm1388_vm4, %v1362_v47, %v4024_v35  ;;  %v1396_v11 = vsel %vm1388_vm4, %v1363_v33, %v4025_v8  ;;  %411 = vperm.xlu1 %4015, %v5144_v54   ;;  %v993_v23 = vsel %vm733_vm0, %v990_v58, %v6826_v45  ;;  %v5555_v33 = vpop.f32.mrf.mxu2 }
 0x1df   : > { %v1424_v32 = vpack.c.bf16 %v1396_v11, %v1395_v21  ;;  %v1224_v17 = vsel %vm1194_vm2, %v1221_v28, %v1223_v16  ;;  %v1226_v7 = vsel %vm1194_vm2, %v1223_v16, %v1225_v57  ;;  %v1064_v10 = vsel %vm1032_vm1, %v1061_v19, %v6825_v4 }
 0x1e0   : > { %v4066_v6 = vpack.i.bf16 %v1226_v7, %v1224_v17  ;;  %v4061_v28 = vpack.i.bf16 %v1064_v10, %v1062_v13  ;;  %v1227_v2 = vrot.slane %v993_v23, 2  ;;  %v4032_v17 = vunpack.i.h.bf16 %v5475_v48 }
 0x1e1   : > { %3655 = vmatmul.msk.bf16.gmra.mxu2 %vm1525_vm5, %v1424_v32 }
 0x1e2   : > { %4067 = vrot.lane.b32.xlu2 %v4066_v6, %s4288_s14  ;;  %3563 = vmatmul.msk.bf16.gmra.mxu0 %vm1525_vm5, %v5425_v0  ;;  %v1228_v8 = vsel %vm1194_vm2, %v1225_v57, %v1227_v2 }
 0x1e3   : > { %3604 = vmatmul.msk.bf16.gmra.mxu1 %vm1525_vm5, %v5425_v0  ;;  %v5547_v54 = vpop.permute.xlu1 %381 }
 0x1e4   : > { %v515_v9 = vmul.f32 %v5547_v54, %v4974_v30  ;;  %v6827_v30 = vrot.slane %v4550_v60, 2  ;;  %v516_v60 = vmul.f32 %v5479_v22, %v5081_v51 }
 0x1e6   : > { %v844_v19 = vrot.slane %v515_v9, 7  ;;  %4062 = vrot.lane.b32.xlu1 %v4061_v28, %s4287_s19  ;;  %v1230_v35 = vsel %vm1194_vm2, %v1227_v2, %v6827_v30  ;;  %v5565_v38 = vpop.f32.mrf.mxu2  ;;  %v846_v21 = vrot.slane %v516_v60, 7 }
 0x1e7   : > { %v4076_v16 = vpack.i.bf16 %v1230_v35, %v1228_v8 }
 0x1e8   : > { %v845_v0 = vsel %vm733_vm0, %v842_v52, %v844_v19  ;;  %v847_v7 = vsel %vm733_vm0, %v844_v19, %v846_v21  ;;  %v4042_v19 = vpop.permute.xlu0 %4041 }
 0x1e9   : > { %v1364_v56 = vsel %vm1355_vm3, %v845_v0, %v4031_v27  ;;  %v1365_v13 = vsel %vm1355_vm3, %v847_v7, %v4032_v17  ;;  %v5595_v27 = vpop.permute.xlu2 %396  ;;  %v4044_v8 = vunpack.i.h.bf16 %v4042_v19  ;;  %v4043_v30 = vunpack.i.l.bf16 %v4042_v19 }
 0x1ea   : > { %v518_v45 = vmul.f32 %v5595_v27, %v5177_v59 }
 0x1ec   : > { %v850_v2 = vrot.slane %v518_v45, 7 }
 0x1ee   : > { %4077 = vrot.lane.b32.xlu1 %v4076_v16, %s4288_s14  ;;  %v5569_v58 = vpop.f32.mrf.mxu2 }
 0x1f1   : > { %v5603_v35 = vpop.permute.xlu2 %401 }
 0x1f2   : > { %3564 = vmatmul.msk.bf16.gmra.mxu0 %vm1525_vm5, %v1424_v32 }
 0x1f3   : > { %3605 = vmatmul.msk.bf16.gmra.mxu1 %vm1525_vm5, %v1424_v32 }
 0x1f6   : > { %v5571_v52 = vpop.f32.mrf.mxu2 }
 0x1fe   : > { %v5573_v47 = vpop.f32.mrf.mxu2 }
 0x206   : > { %v5575_v57 = vpop.f32.mrf.mxu2 }
 0x207   : > { %6828 = vst [vmem:[#allocation54_spill] sm:$0xff] %v5575_v57 }
 0x20e   : > { %v5579_v11 = vpop.f32.mrf.mxu2 }
 0x20f   : > { %6829 = vst [vmem:[#allocation55_spill] sm:$0xff] %v5579_v11 }
 0x21b   : > { %v5584_v4 = vpop.f32.mrf.mxu2 }
 0x21c   : > { %6830 = vst [vmem:[#allocation56_spill] sm:$0xff] %v5584_v4 }
 0x223   : > { %v5591_v51 = vpop.f32.mrf.mxu2 }
 0x224   : > { %6831 = vst [vmem:[#allocation57_spill] sm:$0xff] %v5591_v51 }
 0x227   : > { %v4035_v6 = vpop.permute.xlu1 %4034 }
 0x228   : > { %v4037_v32 = vunpack.i.h.bf16 %v4035_v6  ;;  %v4036_v20 = vunpack.i.l.bf16 %v4035_v6 }
 0x22a   : > { %v1397_v10 = vsel %vm1388_vm4, %v1364_v56, %v4036_v20  ;;  %v1398_v28 = vsel %vm1388_vm4, %v1365_v13, %v4037_v32  ;;  %v5611_v13 = vpop.permute.xlu0 %406 }
 0x22b   : > { %v1425_v9 = vpack.c.bf16 %v1398_v28, %v1397_v10  ;;  %v520_v28 = vmul.f32 %v5611_v13, %v5431_v25 }
 0x22c   : > { %v5601_v56 = vpop.f32.mrf.mxu2 }
 0x22d   : > { %3565 = vmatmul.msk.bf16.gmra.mxu0 %vm1525_vm5, %v1425_v9  ;;  %3606 = vmatmul.msk.bf16.gmra.mxu1 %vm1525_vm5, %v1425_v9  ;;  %6832 = vst [vmem:[#allocation58_spill] sm:$0xff] %v5601_v56 }
 0x22e   : > { %3656 = vmatmul.msk.bf16.gmra.mxu2 %vm1525_vm5, %v1425_v9 }
 0x22f   : > { %v5593_v48 = vpop.permute.xlu1 %391 }
 0x230   : > { %v517_v23 = vmul.f32 %v5593_v48, %v5083_v53 }
 0x232   : > { %v848_v0 = vrot.slane %v517_v23, 7  ;;  %v854_v23 = vrot.slane %v520_v28, 7 }
 0x234   : > { %v849_v16 = vsel %vm733_vm0, %v846_v21, %v848_v0  ;;  %v851_v60 = vsel %vm733_vm0, %v848_v0, %v850_v2  ;;  %v519_v21 = vmul.f32 %v5603_v35, %v5179_v3  ;;  %v5619_v9 = vpop.f32.mrf.mxu2  ;;  %v4058_v0 = vpop.permute.xlu2 %4057 }
 0x235   : > { %v1366_v59 = vsel %vm1355_vm3, %v849_v16, %v4043_v30  ;;  %v1367_v53 = vsel %vm1355_vm3, %v851_v60, %v4044_v8  ;;  %6833 = vst [vmem:[#allocation59_spill] sm:$0xff] %v5619_v9 }
 0x236   : > { %v852_v19 = vrot.slane %v519_v21, 7 }
 0x237   : > { %v1711_v16 = vpop.f32.mrf.mxu1 }
 0x238   : > { %v853_v25 = vsel %vm733_vm0, %v850_v2, %v852_v19  ;;  %v855_v60 = vsel %vm733_vm0, %v852_v19, %v854_v23  ;;  %v5637_v19 = vld [vmem:[%s6650_s2] ss:$0 sm:$0xff] }
 0x23c   : > { %v5630_v28 = vpop.permute.xlu2 %416 }
 0x240   : > { %v4047_v17 = vpop.permute.xlu1 %4046 }
 0x241   : > { %v4049_v7 = vunpack.i.h.bf16 %v4047_v17  ;;  %v4048_v6 = vunpack.i.l.bf16 %v4047_v17 }
 0x243   : > { %v1399_v32 = vsel %vm1388_vm4, %v1366_v59, %v4048_v6  ;;  %v1400_v20 = vsel %vm1388_vm4, %v1367_v53, %v4049_v7  ;;  %v4060_v7 = vunpack.i.h.bf16 %v4058_v0  ;;  %v4059_v6 = vunpack.i.l.bf16 %v4058_v0 }
 0x244   : > { %v1426_v10 = vpack.c.bf16 %v1400_v20, %v1399_v32  ;;  %v5626_v32 = vpop.permute.xlu0 %421 }
 0x245   : > { %v1863_v59 = vpop.f32.mrf.mxu2 }
 0x246   : > { %3566 = vmatmul.msk.bf16.gmra.mxu0 %vm1525_vm5, %v1426_v10  ;;  %3607 = vmatmul.msk.bf16.gmra.mxu1 %vm1525_vm5, %v1426_v10 }
 0x247   : > { %3657 = vmatmul.msk.bf16.gmra.mxu2 %vm1525_vm5, %v1426_v10 }
 0x248   : > { %v4053_v45 = vpop.permute.xlu1 %4052 }
 0x249   : > { %v4055_v8 = vunpack.i.h.bf16 %v4053_v45  ;;  %v4054_v30 = vunpack.i.l.bf16 %v4053_v45 }
 0x24b   : > { %v1368_v3 = vsel %vm1355_vm3, %v853_v25, %v4054_v30  ;;  %v1369_v17 = vsel %vm1355_vm3, %v855_v60, %v4055_v8  ;;  %v1713_v30 = vpop.f32.mrf.mxu1 }
 0x24c   : > { %v1401_v21 = vsel %vm1388_vm4, %v1368_v3, %v4059_v6  ;;  %v1402_v2 = vsel %vm1388_vm4, %v1369_v17, %v4060_v7  ;;  %v523_v3 = vmul.f32 %v5626_v32, %v5247_v1 }
 0x24d   : > { %v1427_v8 = vpack.c.bf16 %v1402_v2, %v1401_v21  ;;  %v1865_v6 = vpop.f32.mrf.mxu2 }
 0x24e   : > { %v860_v9 = vrot.slane %v523_v3, 7 }
 0x24f   : > { %v1583_v53 = vpop.f32.mrf.mxu0 }
 0x250   : > { %v1712_v20 = vadd.f32 %v1711_v16, %v1583_v53  ;;  %v5628_v10 = vpop.permute.xlu1 %411  ;;  %v522_v16 = vmul.f32 %v5630_v28, %v5245_v37 }
 0x251   : > { %v521_v0 = vmul.f32 %v5628_v10, %v5429_v63 }
 0x252   : > { %v1943_v45 = vadd.f32 %v1863_v59, %v1712_v20  ;;  %v4073_v20 = vpop.permute.xlu0 %4072  ;;  %v858_v37 = vrot.slane %v522_v16, 7 }
 0x253   : > { %v856_v17 = vrot.slane %v521_v0, 7  ;;  %v4075_v4 = vunpack.i.h.bf16 %v4073_v20  ;;  %v4074_v1 = vunpack.i.l.bf16 %v4073_v20 }
 0x254   : > { %v1979_v25 = vadd.f32 %v5637_v19, %v1943_v45  ;;  %v4068_v45 = vpop.permute.xlu2 %4067  ;;  %v861_v3 = vsel %vm733_vm0, %v858_v37, %v860_v9 }
 0x255   : > { %v857_v56 = vsel %vm733_vm0, %v854_v23, %v856_v17 }
 0x256   : > { %3567 = vmatmul.msk.bf16.gmra.mxu0 %vm1525_vm5, %v1427_v8  ;;  %3608 = vmatmul.msk.bf16.gmra.mxu1 %vm1525_vm5, %v1427_v8  ;;  %v2011_v21 = vmax.f32 %v1979_v25, 0.0 }
 0x257   : > { %3658 = vmatmul.msk.bf16.gmra.mxu2 %vm1525_vm5, %v1427_v8  ;;  %v1585_v60 = vpop.f32.mrf.mxu0  ;;  %v859_v8 = vsel %vm733_vm0, %v856_v17, %v858_v37  ;;  %v6834_v17 = vrot.slane %v4789_v5, 7  ;;  %v1372_v5 = vsel %vm1355_vm3, %v861_v3, %v4074_v1 }
 0x258   : > { %v1714_v7 = vadd.f32 %v1713_v30, %v1585_v60  ;;  %v4063_v63 = vpop.permute.xlu1 %4062  ;;  %v4070_v60 = vunpack.i.h.bf16 %v4068_v45  ;;  %v5655_v16 = vmul.f32 %v2011_v21, %v5343_v31 }
 0x259   : > { %v4065_v59 = vunpack.i.h.bf16 %v4063_v63  ;;  %v4064_v53 = vunpack.i.l.bf16 %v4063_v63  ;;  %v4069_v63 = vunpack.i.l.bf16 %v4068_v45 }
 0x25a   : > { %v1944_v2 = vadd.f32 %v1865_v6, %v1714_v7  ;;  %v1716_v7 = vpop.f32.mrf.mxu1  ;;  %v863_v6 = vsel %vm733_vm0, %v860_v9, %v6834_v17  ;;  %v6736_v37 = vrot.slane %v5655_v16, 7  ;;  %v6835_v9 = vld [vmem:[#allocation38_spill] sm:$0xff] }
 0x25b   : > { %v1370_v0 = vsel %vm1355_vm3, %v857_v56, %v4064_v53  ;;  %v1371_v30 = vsel %vm1355_vm3, %v859_v8, %v4065_v59  ;;  %v1373_v53 = vsel %vm1355_vm3, %v863_v6, %v4075_v4  ;;  %v2075_v17 = vmul.f32 %v2011_v21, %v6835_v9 }
 0x25c   : > { %v1980_v51 = vadd.f32 %v5637_v19, %v1944_v2  ;;  %v1403_v56 = vsel %vm1388_vm4, %v1370_v0, %v4069_v63  ;;  %v1404_v59 = vsel %vm1388_vm4, %v1371_v30, %v4070_v60  ;;  %v2139_v6 = vrot.slane %v2011_v21, 7 }
 0x25d   : > { %v1428_v57 = vpack.c.bf16 %v1404_v59, %v1403_v56  ;;  %v2368_v3 = vrot.slane %v2075_v17, 7  ;;  %v6836_v59 = vld [vmem:[#allocation39_spill] sm:$0xff] }
 0x25e   : > { %v2012_v25 = vmax.f32 %v1980_v51, 0.0 }
 0x25f   : > { %v1588_v23 = vpop.f32.mrf.mxu0  ;;  %v2433_v9 = vsel %vm733_vm0, 0.0, %v2368_v3 }
 0x260   : > { %v2044_v20 = vmul.f32 %v2012_v25, %v5313_v61  ;;  %v4078_v2 = vpop.permute.xlu1 %4077  ;;  %v2076_v31 = vmul.f32 %v2012_v25, %v4986_v26  ;;  %v1717_v11 = vadd.f32 %v1716_v7, %v1588_v23  ;;  %v2140_v60 = vrot.slane %v2012_v25, 7 }
 0x261   : > { %v4080_v51 = vunpack.i.h.bf16 %v4078_v2  ;;  %v4079_v45 = vunpack.i.l.bf16 %v4078_v2  ;;  %v2204_v2 = vsel %vm733_vm0, 0.0, %v2139_v6 }
 0x262   : > { %v2239_v8 = vrot.slane %v2044_v20, 7  ;;  %v2369_v7 = vrot.slane %v2076_v31, 7  ;;  %v2141_v23 = vsel %vm733_vm0, %v2139_v6, %v2140_v60  ;;  %v1718_v20 = vpop.f32.mrf.mxu1 }
 0x263   : > { %v1405_v0 = vsel %vm1388_vm4, %v1372_v5, %v4079_v45  ;;  %v1406_v30 = vsel %vm1388_vm4, %v1373_v53, %v4080_v51  ;;  %v2438_v5 = vrot.slane %v2141_v23, 1 }
 0x264   : > { %v1868_v61 = vpop.f32.mrf.mxu2  ;;  %v1429_v63 = vpack.c.bf16 %v1406_v30, %v1405_v0  ;;  %v5674_v26 = vsel %vm733_vm0, %v6736_v37, %v2239_v8  ;;  %v2370_v21 = vsel %vm733_vm0, %v2368_v3, %v2369_v7  ;;  %v2436_v30 = vrot.slane %v2204_v2, 1 }
 0x265   : > { %v1945_v4 = vadd.f32 %v1868_v61, %v1717_v11  ;;  %v2594_v6 = vrot.slane %v2370_v21, 2  ;;  %v2592_v3 = vrot.slane %v2433_v9, 2 }
 0x266   : > { %3568 = vmatmul.msk.bf16.gmra.mxu0 %vm1525_vm5, %v1428_v57  ;;  %3609 = vmatmul.msk.bf16.gmra.mxu1 %vm1525_vm5, %v1428_v57 }
 0x267   : > { %v1981_v1 = vadd.f32 %v5637_v19, %v1945_v4  ;;  %3610 = vmatmul.msk.bf16.vlgmr.msra.gmra.mxu3 %vm1525_vm5, %v1429_v63  ;;  %3659 = vmatmul.msk.bf16.gmra.mxu2 %vm1525_vm5, %v1428_v57  ;;  %v1590_v11 = vpop.f32.mrf.mxu0 }
 0x268   : > { %v1719_v51 = vadd.f32 %v1718_v20, %v1590_v11  ;;  %v2439_v11 = vsel %vm1032_vm1, %v2436_v30, %v2438_v5 }
 0x269   : > { %v2013_v25 = vmax.f32 %v1981_v1, 0.0 }
 0x26b   : > { %v2045_v56 = vmul.f32 %v2013_v25, %v5152_v50  ;;  %v2077_v53 = vmul.f32 %v2013_v25, %v6836_v59  ;;  %v2142_v31 = vrot.slane %v2013_v25, 7 }
 0x26c   : > { %v1870_v45 = vpop.f32.mrf.mxu2 }
 0x26d   : > { %v2241_v57 = vrot.slane %v2045_v56, 7  ;;  %v2371_v17 = vrot.slane %v2077_v53, 7  ;;  %v1946_v61 = vadd.f32 %v1870_v45, %v1719_v51  ;;  %v2143_v0 = vsel %vm733_vm0, %v2140_v60, %v2142_v31  ;;  %v6837_v53 = vld [vmem:[#allocation33_spill] sm:$0xff] }
 0x26e   : > { %v2440_v4 = vrot.slane %v2143_v0, 1  ;;  %v2595_v60 = vsel %vm1194_vm2, %v2592_v3, %v2594_v6 }
 0x26f   : > { %v1982_v1 = vadd.f32 %v5637_v19, %v1946_v61  ;;  %v2372_v50 = vsel %vm733_vm0, %v2369_v7, %v2371_v17  ;;  %v5691_v59 = vsel %vm733_vm0, %v2239_v8, %v2241_v57 }
 0x270   : > { %v2441_v25 = vsel %vm1032_vm1, %v2438_v5, %v2440_v4  ;;  %v2596_v23 = vrot.slane %v2372_v50, 2 }
 0x271   : > { %v2014_v20 = vmax.f32 %v1982_v1, 0.0  ;;  %v4081_v56 = vpack.i.bf16 %v2441_v25, %v2439_v11  ;;  %v2437_v1 = vsel %vm1032_vm1, %v5096_v18, %v2436_v30  ;;  %v2593_v25 = vsel %vm1194_vm2, %v5138_v39, %v2592_v3  ;;  %v1593_v30 = vpop.f32.mrf.mxu0  ;;  %v6841_v3 = vld [vmem:[#allocation40_spill] sm:$0xff] }
 0x272   : > { %v2597_v2 = vsel %vm1194_vm2, %v2594_v6, %v2596_v23 }
 0x273   : > { %v2046_v21 = vmul.f32 %v2014_v20, %v5383_v46  ;;  %v2078_v51 = vmul.f32 %v2014_v20, %v6837_v53  ;;  %v2144_v7 = vrot.slane %v2014_v20, 7  ;;  %4082 = vrot.lane.b32.xlu2 %v4081_v56, %s4287_s19  ;;  %v4086_v8 = vpack.i.bf16 %v2597_v2, %v2595_v60  ;;  %v6838_v46 = vld [vmem:[#allocation24_spill] sm:$0xff]  ;;  %v6839_v20 = vld [vmem:[#allocation31_spill] sm:$0xff] }
 0x275   : > { %v2373_v45 = vrot.slane %v2078_v51, 7  ;;  %4087 = vrot.lane.b32.xlu0 %v4086_v8, %s4288_s14  ;;  %v2145_v5 = vsel %vm733_vm0, %v2142_v31, %v2144_v7  ;;  %v2243_v9 = vrot.slane %v2046_v21, 7 }
 0x276   : > { %v2442_v61 = vrot.slane %v2145_v5, 1  ;;  %3569 = vmatmul.msk.bf16.gmra.mxu0 %vm1525_vm5, %v1429_v63  ;;  %v3847_v5 = vld [vmem:[%s6651_s3 + $0x58] sm:$0xff] }
 0x277   : > { %v2374_v0 = vsel %vm733_vm0, %v2371_v17, %v2373_v45  ;;  %v5705_v6 = vsel %vm733_vm0, %v2241_v57, %v2243_v9  ;;  %3611 = vmatmul.msk.bf16.gmra.mxu3 %vm1525_vm5, %v6838_v46  ;;  %3660 = vmatmul.msk.bf16.gmra.mxu2 %vm1525_vm5, %v1429_v63  ;;  %v6840_v63 = vld [vmem:[#allocation36_spill] sm:$0xff] }
 0x278   : > { %v2443_v50 = vsel %vm1032_vm1, %v2440_v4, %v2442_v61  ;;  %v2598_v31 = vrot.slane %v2374_v0, 2  ;;  %v1721_v4 = vpop.f32.mrf.mxu1  ;;  %2963 = vmatpush.bf16.msrb.mxu3 %v3847_v5  ;;  %v3840_v5 = vld [vmem:[%s6651_s3 + $0x20] sm:$0xff] }
 0x279   : > { %v4091_v11 = vpack.i.bf16 %v2443_v50, %v2437_v1  ;;  %v1722_v60 = vadd.f32 %v1721_v4, %v1593_v30  ;;  %v6842_v1 = vld [vmem:[#allocation41_spill] sm:$0xff]  ;;  %v3846_v4 = vld [vmem:[%s6651_s3 + $0x50] sm:$0xff] }
 0x27a   : > { %v2599_v17 = vsel %vm1194_vm2, %v2596_v23, %v2598_v31  ;;  %v1595_v23 = vpop.f32.mrf.mxu0 }
 0x27b   : > { %4092 = vrot.lane.b32.xlu1 %v4091_v11, %s4287_s19  ;;  %v4096_v57 = vpack.i.bf16 %v2599_v17, %v2593_v25  ;;  %v6843_v25 = vld [vmem:[#allocation43_spill] sm:$0xff] }
 0x27c   : > { %2964 = vmatpush.bf16.msrb.mxu3 %v3846_v4  ;;  %v3843_v4 = vld [vmem:[%s6651_s3 + $0x38] sm:$0xff] }
 0x27d   : > { %4097 = vrot.lane.b32.xlu2 %v4096_v57, %s4288_s14 }
 0x280   : > { %v1723_v56 = vpop.f32.mrf.mxu1 }
 0x281   : > { %v1724_v0 = vadd.f32 %v1723_v56, %v1595_v23 }
 0x287   : > { %3612 = vmatmul.msk.bf16.gmra.mxu3 %vm1525_vm5, %v6839_v20  ;;  %3661 = vmatmul.msk.bf16.gmra.mxu2 %vm1525_vm5, %v6838_v46 }
 0x288   : > { %v1726_v57 = vpop.f32.mrf.mxu1 }
 0x297   : > { %3613 = vmatmul.msk.bf16.gmra.mxu3 %vm1525_vm5, %v6840_v63  ;;  %3662 = vmatmul.msk.bf16.gmra.mxu2 %vm1525_vm5, %v6839_v20 }
 0x2a7   : > { %3614 = vmatmul.msk.bf16.gmra.mxu3 %vm1525_vm5, %v6841_v3  ;;  %3663 = vmatmul.msk.bf16.gmra.mxu2 %vm1525_vm5, %v6840_v63 }
 0x2aa   : > { %v1598_v51 = vpop.f32.mrf.mxu0 }
 0x2b1   : > { %v1873_v2 = vpop.f32.mrf.mxu2 }
 0x2b2   : > { %v1947_v21 = vadd.f32 %v1873_v2, %v1722_v60 }
 0x2b4   : > { %v1983_v53 = vadd.f32 %v5637_v19, %v1947_v21  ;;  %v3841_v21 = vld [vmem:[%s6651_s3 + $0x28] sm:$0xff] }
 0x2b5   : > { %3091 = vmatpush.bf16.msrb.mxu0 %v3841_v21 }
 0x2b6   : > { %v5731_v8 = vmax.f32 %v1983_v53, 0.0 }
 0x2b7   : > { %3615 = vmatmul.msk.bf16.gmra.mxu3 %vm1525_vm5, %v6843_v25  ;;  %3664 = vmatmul.msk.bf16.gmra.mxu2 %vm1525_vm5, %v6841_v3 }
 0x2b8   : > { %v2047_v46 = vmul.f32 %v5731_v8, %v5499_v44  ;;  %v5740_v50 = vmul.f32 %v5731_v8, %v6842_v1  ;;  %v2146_v11 = vrot.slane %v5731_v8, 7  ;;  %v1728_v1 = vpop.f32.mrf.mxu1 }
 0x2b9   : > { %v1875_v17 = vpop.f32.mrf.mxu2  ;;  %3092 = vmatpush.bf16.msrb.mxu0 %v3840_v5 }
 0x2ba   : > { %v2245_v20 = vrot.slane %v2047_v46, 7  ;;  %v2375_v63 = vrot.slane %v5740_v50, 7  ;;  %v1948_v30 = vadd.f32 %v1875_v17, %v1724_v0  ;;  %v5749_v44 = vsel %vm733_vm0, %v2144_v7, %v2146_v11  ;;  %v3844_v46 = vld [vmem:[%s6651_s3 + $0x40] sm:$0xff] }
 0x2bb   : > { %v2444_v23 = vrot.slane %v5749_v44, 1  ;;  %v6844_v50 = vld [vmem:[#allocation26_spill] sm:$0xff] }
 0x2bc   : > { %v1984_v56 = vadd.f32 %v5637_v19, %v1948_v30  ;;  %v5757_v3 = vsel %vm733_vm0, %v2373_v45, %v2375_v63  ;;  %v5760_v60 = vsel %vm733_vm0, %v2243_v9, %v2245_v20  ;;  %v3845_v45 = vld [vmem:[%s6651_s3 + $0x48] sm:$0xff]  ;;  %v6845_v17 = vrot.slane %v6844_v50, 1 }
 0x2bd   : > { %v2445_v2 = vsel %vm1032_vm1, %v2442_v61, %v2444_v23  ;;  %v6737_v7 = vrot.slane %v5757_v3, 2  ;;  %v1600_v61 = vpop.f32.mrf.mxu0  ;;  %2965 = vmatpush.bf16.msrb.mxu3 %v3845_v45  ;;  %v3838_v45 = vld [vmem:[%s6651_s3 + $0x10] sm:$0xff] }
 0x2be   : > { %v2016_v53 = vmax.f32 %v1984_v56, 0.0  ;;  %2506 = vrot.lane.b32.xlu0 %v2445_v2, %s4287_s19  ;;  %v1791_v30 = vsel %vm1032_vm1, %v6845_v17, %v5096_v18  ;;  %v6846_v2 = vld [vmem:[#allocation45_spill] sm:$0xff] }
 0x2bf   : > { %v2601_v9 = vsel %vm1194_vm2, %v2598_v31, %v6737_v7 }
 0x2c0   : > { %v2048_v8 = vmul.f32 %v2016_v53, %v5408_v42  ;;  %2662 = vrot.lane.b32.xlu1 %v2601_v9, %s4288_s14  ;;  %v3839_v42 = vld [vmem:[%s6651_s3 + $0x18] sm:$0xff]  ;;  %v2080_v21 = vmul.f32 %v2016_v53, %v6846_v2  ;;  %v1731_v5 = vpop.f32.mrf.mxu1  ;;  %v6847_v2 = vld [vmem:[#allocation42_spill] sm:$0xff] }
 0x2c1   : > { %2966 = vmatpush.bf16.msrb.mxu3 %v3844_v46  ;;  %3093 = vmatpush.bf16.msrb.mxu0 %v3839_v42  ;;  %v2148_v46 = vrot.slane %v2016_v53, 7 }
 0x2c2   : > { %v2247_v0 = vrot.slane %v2048_v8, 7  ;;  %v3842_v8 = vld [vmem:[%s6651_s3 + $0x30] sm:$0xff] }
 0x2c3   : > { %v2149_v17 = vsel %vm733_vm0, %v2146_v11, %v2148_v46 }
 0x2c4   : > { %v5785_v31 = vsel %vm733_vm0, %v2245_v20, %v2247_v0  ;;  %v1727_v20 = vadd.f32 %v1726_v57, %v1598_v51  ;;  %v3837_v51 = vld [vmem:[%s6651_s3 + $0x8] sm:$0xff] }
 0x2c5   : > { %v1603_v56 = vpop.f32.mrf.mxu0  ;;  %2967 = vmatpush.bf16.msrb.mxu3 %v3843_v4  ;;  %3094 = vmatpush.bf16.msrb.mxu0 %v3838_v45 }
 0x2c7   : > { %3616 = vmatmul.msk.bf16.gmra.mxu3 %vm1525_vm5, %v5182_v49  ;;  %3665 = vmatmul.msk.bf16.gmra.mxu2 %vm1525_vm5, %v6843_v25  ;;  %v2377_v25 = vrot.slane %v2080_v21, 7  ;;  %v3836_v21 = vld [vmem:[%s6651_s3] sm:$0xff] }
 0x2c8   : > { %1792 = vrot.lane.b32.xlu1 %v1791_v30, %s4287_s19  ;;  %v1729_v30 = vadd.f32 %v1728_v1, %v1600_v61  ;;  %v1733_v1 = vpop.f32.mrf.mxu1 }
 0x2c9   : > { %2968 = vmatpush.bf16.msrb.mxu3 %v3842_v8  ;;  %3095 = vmatpush.bf16.msrb.mxu0 %v3837_v51  ;;  %v2378_v45 = vsel %vm733_vm0, %v2375_v63, %v2377_v25  ;;  %v2446_v8 = vrot.slane %v2149_v17, 1 }
 0x2ca   : > { %v1878_v9 = vpop.f32.mrf.mxu2 }
 0x2cb   : > { %v1949_v42 = vadd.f32 %v1878_v9, %v1727_v20  ;;  %v2447_v17 = vsel %vm1032_vm1, %v2444_v23, %v2446_v8  ;;  %v1732_v23 = vadd.f32 %v1731_v5, %v1603_v56 }
 0x2cd   : > { %v1985_v50 = vadd.f32 %v5637_v19, %v1949_v42  ;;  %v1605_v20 = vpop.f32.mrf.mxu0  ;;  %3096 = vmatpush.bf16.msrb.mxu0 %v3836_v21 }
 0x2cf   : > { %v2017_v57 = vmax.f32 %v1985_v50, 0.0 }
 0x2d1   : > { %v2049_v4 = vmul.f32 %v2017_v57, %v5547_v54  ;;  %v2081_v37 = vmul.f32 %v2017_v57, %v6847_v2  ;;  %v2150_v53 = vrot.slane %v2017_v57, 7  ;;  %v2602_v54 = vrot.slane %v2378_v45, 2 }
 0x2d2   : > { %v1880_v9 = vpop.f32.mrf.mxu2 }
 0x2d3   : > { %v2249_v42 = vrot.slane %v2049_v4, 7  ;;  %v2379_v50 = vrot.slane %v2081_v37, 7  ;;  %v1950_v7 = vadd.f32 %v1880_v9, %v1729_v30  ;;  %v2151_v11 = vsel %vm733_vm0, %v2148_v46, %v2150_v53 }
 0x2d4   : > { %v2448_v61 = vrot.slane %v2151_v11, 1 }
 0x2d5   : > { %v1986_v51 = vadd.f32 %v5637_v19, %v1950_v7  ;;  %v5823_v57 = vsel %vm733_vm0, %v2377_v25, %v2379_v50  ;;  %v5826_v63 = vsel %vm733_vm0, %v2247_v0, %v2249_v42  ;;  %v6848_v25 = vrot.slane %v5757_v3, 2  ;;  %v1736_v3 = vpop.f32.mrf.mxu1 }
 0x2d6   : > { %v2449_v37 = vsel %vm1032_vm1, %v2446_v8, %v2448_v61  ;;  %v2604_v46 = vrot.slane %v5823_v57, 2  ;;  %v1608_v8 = vpop.f32.mrf.mxu0 }
 0x2d7   : > { %v2018_v30 = vmax.f32 %v1986_v51, 0.0  ;;  %3617 = vmatmul.msk.bf16.gmra.mxu3 %vm1525_vm5, %v5319_v62  ;;  %3666 = vmatmul.msk.bf16.gmra.mxu2 %vm1525_vm5, %v5182_v49  ;;  %v4101_v7 = vpack.i.bf16 %v2449_v37, %v2447_v17  ;;  %v2603_v0 = vsel %vm1194_vm2, %v6848_v25, %v2602_v54 }
 0x2d8   : > { %v2605_v44 = vsel %vm1194_vm2, %v2602_v54, %v2604_v46 }
 0x2d9   : > { %v2050_v4 = vmul.f32 %v2018_v30, %v5479_v22  ;;  %4102 = vrot.lane.b32.xlu2 %v4101_v7, %s4287_s19  ;;  %v4106_v2 = vpack.i.bf16 %v2605_v44, %v2603_v0  ;;  %v2082_v45 = vmul.f32 %v2018_v30, %v5187_v24  ;;  %v2152_v9 = vrot.slane %v2018_v30, 7  ;;  %v6849_v24 = vld [vmem:[#allocation37_spill] sm:$0xff]  ;;  %v4083_v7 = vpop.permute.xlu2 %4082 }
 0x2da   : > { %v1883_v21 = vpop.f32.mrf.mxu2  ;;  %v6850_v17 = vrot.slane %v6849_v24, 2  ;;  %v1734_v30 = vadd.f32 %v1733_v1, %v1605_v20 }
 0x2db   : > { %v2251_v49 = vrot.slane %v2050_v4, 7  ;;  %v1951_v11 = vadd.f32 %v1883_v21, %v1732_v23  ;;  %4107 = vrot.lane.b32.xlu0 %v4106_v2, %s4288_s14  ;;  %v2381_v56 = vrot.slane %v2082_v45, 7  ;;  %v2153_v5 = vsel %vm733_vm0, %v2150_v53, %v2152_v9 }
 0x2dc   : > { %v1795_v37 = vsel %vm1194_vm2, %v6850_v17, %v5138_v39  ;;  %v2450_v53 = vrot.slane %v2153_v5, 1  ;;  %v4084_v45 = vunpack.i.l.bf16 %v4083_v7 }
 0x2dd   : > { %v1987_v51 = vadd.f32 %v5637_v19, %v1951_v11  ;;  %v5849_v54 = vsel %vm733_vm0, %v2249_v42, %v2251_v49  ;;  %v2382_v23 = vsel %vm733_vm0, %v2379_v50, %v2381_v56 }
 0x2de   : > { %v1610_v11 = vpop.f32.mrf.mxu0  ;;  %v2451_v24 = vsel %vm1032_vm1, %v2448_v61, %v2450_v53 }
 0x2df   : > { %v5851_v22 = vmax.f32 %v1987_v51, 0.0 }
 0x2e1   : > { %v2051_v25 = vmul.f32 %v5851_v22, %v5593_v48  ;;  %v5862_v0 = vmul.f32 %v5851_v22, %v5364_v36  ;;  %v2154_v42 = vrot.slane %v5851_v22, 7  ;;  %1796 = vrot.lane.b32.xlu2 %v1795_v37, %s4288_s14  ;;  %v3853_v36 = vld [vmem:[%s6651_s3 + $0x88] sm:$0xff]  ;;  %v4085_v48 = vunpack.i.h.bf16 %v4083_v7 }
 0x2e2   : > { %v1885_v44 = vpop.f32.mrf.mxu2  ;;  %v2606_v22 = vrot.slane %v2382_v23, 2  ;;  %3243 = vmatpush.bf16.msrb.mxu1 %v3853_v36  ;;  %v1737_v36 = vadd.f32 %v1736_v3, %v1608_v8 }
 0x2e3   : > { %v2253_v4 = vrot.slane %v2051_v25, 7  ;;  %v2383_v2 = vrot.slane %v5862_v0, 7  ;;  %v1952_v20 = vadd.f32 %v1885_v44, %v1734_v30  ;;  %v5869_v1 = vsel %vm733_vm0, %v2152_v9, %v2154_v42  ;;  %v1738_v30 = vpop.f32.mrf.mxu1 }
 0x2e4   : > { %v2452_v21 = vrot.slane %v5869_v1, 1  ;;  %v2749_v61 = vsel %vm1355_vm3, %v5674_v26, %v4085_v48 }
 0x2e5   : > { %v1988_v51 = vadd.f32 %v5637_v19, %v1952_v20  ;;  %v5877_v50 = vsel %vm733_vm0, %v2381_v56, %v2383_v2  ;;  %v5880_v5 = vsel %vm733_vm0, %v2251_v49, %v2253_v4  ;;  %v6851_v49 = vrot.slane %v5655_v16, 7 }
 0x2e6   : > { %v2453_v17 = vsel %vm1032_vm1, %v2450_v53, %v2452_v21  ;;  %v2608_v37 = vrot.slane %v5877_v50, 2  ;;  %v2607_v16 = vsel %vm1194_vm2, %v2604_v46, %v2606_v22 }
 0x2e7   : > { %v4088_v9 = vpop.permute.xlu0 %4087  ;;  %v2020_v7 = vmax.f32 %v1988_v51, 0.0  ;;  %3667 = vmatmul.msk.bf16.gmra.mxu2 %vm1525_vm5, %v5319_v62  ;;  %v4111_v0 = vpack.i.bf16 %v2453_v17, %v2451_v24  ;;  %v2334_v44 = vsel %vm733_vm0, 0.0, %v6851_v49  ;;  %v5906_v24 = vpop.permute.xlu2 %4097 }
 0x2e8   : > { %v4090_v56 = vunpack.i.h.bf16 %v4088_v9  ;;  %v4089_v25 = vunpack.i.l.bf16 %v4088_v9  ;;  %v2609_v53 = vsel %vm1194_vm2, %v2606_v22, %v2608_v37  ;;  %v2748_v23 = vsel %vm1355_vm3, %v2334_v44, %v4084_v45  ;;  %v1613_v22 = vpop.f32.mrf.mxu0 }
 0x2e9   : > { %v2052_v20 = vmul.f32 %v2020_v7, %v5595_v27  ;;  %4112 = vrot.lane.b32.xlu0 %v4111_v0, %s4287_s19  ;;  %v2084_v51 = vmul.f32 %v2020_v7, %v5368_v12  ;;  %v4116_v9 = vpack.i.bf16 %v2609_v53, %v2607_v16  ;;  %v2156_v27 = vrot.slane %v2020_v7, 7 }
 0x2ea   : > { %v2780_v62 = vsel %vm1388_vm4, %v2749_v61, %v4090_v56  ;;  %v2779_v26 = vsel %vm1388_vm4, %v2748_v23, %v4089_v25  ;;  %v1888_v48 = vpop.f32.mrf.mxu2  ;;  %v4099_v57 = vunpack.i.l.bf16 %v5906_v24  ;;  %v1739_v53 = vadd.f32 %v1738_v30, %v1610_v11 }
 0x2eb   : > { %v2255_v45 = vrot.slane %v2052_v20, 7  ;;  %v5908_v17 = vpack.c.bf16 %v2780_v62, %v2779_v26  ;;  %v1953_v56 = vadd.f32 %v1888_v48, %v1737_v36  ;;  %4117 = vrot.lane.b32.xlu1 %v4116_v9, %s4288_s14  ;;  %v2385_v46 = vrot.slane %v2084_v51, 7  ;;  %v1741_v61 = vpop.f32.mrf.mxu1 }
 0x2ec   : > { %v2157_v44 = vsel %vm733_vm0, %v2154_v42, %v2156_v27  ;;  %v3852_v42 = vld [vmem:[%s6651_s3 + $0x80] sm:$0xff] }
 0x2ed   : > { %v5911_v0 = vpop.permute.xlu1 %4092  ;;  %3706 = vmatmul.msk.bf16.vlgmr.msrb.gmra.mxu3 %vm1525_vm5, %v5908_v17  ;;  %v1989_v8 = vadd.f32 %v5637_v19, %v1953_v56  ;;  %v5919_v3 = vsel %vm733_vm0, %v2253_v4, %v2255_v45  ;;  %v2386_v4 = vsel %vm733_vm0, %v2383_v2, %v2385_v46  ;;  %v2454_v26 = vrot.slane %v2157_v44, 1  ;;  %3244 = vmatpush.bf16.msrb.mxu1 %v3852_v42 }
 0x2ee   : > { %v4094_v12 = vunpack.i.l.bf16 %v5911_v0 }
 0x2ef   : > { %v2021_v25 = vmax.f32 %v1989_v8, 0.0 }
 0x2f0   : > { %v2747_v7 = vsel %vm1355_vm3, 0.0, %v4094_v12 }
 0x2f1   : > { %v2778_v49 = vsel %vm1388_vm4, %v2747_v7, %v4099_v57  ;;  %v2053_v20 = vmul.f32 %v2021_v25, %v5603_v35  ;;  %v2085_v62 = vmul.f32 %v2021_v25, %v5436_v34  ;;  %v2158_v16 = vrot.slane %v2021_v25, 7 }
 0x2f2   : > { %v2809_v23 = vpack.c.bf16 %v2778_v49, %v5400_v29  ;;  %v1890_v36 = vpop.f32.mrf.mxu2  ;;  %v2610_v34 = vrot.slane %v2386_v4, 2  ;;  %v2455_v57 = vsel %vm1032_vm1, %v2452_v21, %v2454_v26  ;;  %v1742_v7 = vadd.f32 %v1741_v61, %v1613_v22  ;;  %v1615_v49 = vpop.f32.mrf.mxu0 }
 0x2f3   : > { %v1954_v51 = vadd.f32 %v1890_v36, %v1739_v53  ;;  %v2257_v48 = vrot.slane %v2053_v20, 7  ;;  %v2387_v11 = vrot.slane %v2085_v62, 7  ;;  %v2159_v30 = vsel %vm733_vm0, %v2156_v27, %v2158_v16  ;;  %v1743_v53 = vpop.f32.mrf.mxu1 }
 0x2f4   : > { %3746 = vmatmul.msk.bf16.vlgmr.msrb.gmra.mxu0 %vm1525_vm5, %v2809_v23  ;;  %v2456_v9 = vrot.slane %v2159_v30, 1  ;;  %v5951_v23 = vpop.f32.mrf.mxu3  ;;  %v1744_v62 = vadd.f32 %v1743_v53, %v1615_v49 }
 0x2f5   : > { %v1990_v35 = vadd.f32 %v5637_v19, %v1954_v51  ;;  %v2388_v56 = vsel %vm733_vm0, %v2385_v46, %v2387_v11  ;;  %v5936_v2 = vsel %vm733_vm0, %v2255_v45, %v2257_v48  ;;  %v2611_v45 = vsel %vm1194_vm2, %v2608_v37, %v2610_v34  ;;  %v6852_v51 = vld [vmem:[#allocation52_spill] sm:$0xff] }
 0x2f6   : > { %v2457_v27 = vsel %vm1032_vm1, %v2454_v26, %v2456_v9  ;;  %v2612_v8 = vrot.slane %v2388_v56, 2 }
 0x2f7   : > { %v2022_v12 = vmax.f32 %v1990_v35, 0.0  ;;  %3668 = vmatmul.msk.bf16.gmra.mxu2 %vm1525_vm5, %v5360_v41  ;;  %v4121_v25 = vpack.i.bf16 %v2457_v27, %v2455_v57 }
 0x2f8   : > { %v2613_v41 = vsel %vm1194_vm2, %v2610_v34, %v2612_v8 }
 0x2f9   : > { %v2054_v44 = vmul.f32 %v2022_v12, %v5611_v13  ;;  %v2086_v46 = vmul.f32 %v2022_v12, %v5448_v15  ;;  %4122 = vrot.lane.b32.xlu2 %v4121_v25, %s4287_s19  ;;  %v4126_v21 = vpack.i.bf16 %v2613_v41, %v2611_v45  ;;  %v2160_v20 = vrot.slane %v2022_v12, 7 }
 0x2fa   : > { %v1893_v1 = vpop.f32.mrf.mxu2  ;;  %v1618_v34 = vpop.f32.mrf.mxu0 }
 0x2fb   : > { %v2259_v22 = vrot.slane %v2054_v44, 7  ;;  %v1955_v61 = vadd.f32 %v1893_v1, %v1742_v7  ;;  %4127 = vrot.lane.b32.xlu0 %v4126_v21, %s4288_s14  ;;  %v2389_v13 = vrot.slane %v2086_v46, 7  ;;  %v2161_v36 = vsel %vm733_vm0, %v2158_v16, %v2160_v20  ;;  %v1746_v16 = vpop.f32.mrf.mxu1 }
 0x2fc   : > { %v5965_v25 = vpop.f32.mrf.mxu3 }
 0x2fd   : > { %v1991_v15 = vadd.f32 %v5637_v19, %v1955_v61  ;;  %v5956_v50 = vsel %vm733_vm0, %v2257_v48, %v2259_v22  ;;  %v2390_v30 = vsel %vm733_vm0, %v2387_v11, %v2389_v13  ;;  %v2458_v48 = vrot.slane %v2161_v36, 1 }
 0x2fe   : > { %v2614_v7 = vrot.slane %v2390_v30, 2 }
 0x2ff   : > { %v2023_v37 = vmax.f32 %v1991_v15, 0.0  ;;  %v2459_v41 = vsel %vm1032_vm1, %v2456_v9, %v2458_v48  ;;  %v3850_v9 = vld [vmem:[%s6651_s3 + $0x70] sm:$0xff] }
 0x300   : > { %v2615_v53 = vsel %vm1194_vm2, %v2612_v8, %v2614_v7 }
 0x301   : > { %v2055_v4 = vmul.f32 %v2023_v37, %v5628_v10  ;;  %v2087_v26 = vmul.f32 %v2023_v37, %v6852_v51  ;;  %v2162_v42 = vrot.slane %v2023_v37, 7 }
 0x302   : > { %v1895_v35 = vpop.f32.mrf.mxu2 }
 0x303   : > { %v2261_v56 = vrot.slane %v2055_v4, 7  ;;  %v2391_v12 = vrot.slane %v2087_v26, 7  ;;  %v1956_v57 = vadd.f32 %v1895_v35, %v1744_v62  ;;  %v2163_v27 = vsel %vm733_vm0, %v2160_v20, %v2162_v42  ;;  %v1620_v4 = vpop.f32.mrf.mxu0  ;;  %v3849_v26 = vld [vmem:[%s6651_s3 + $0x68] sm:$0xff]  ;;  %v1748_v30 = vpop.f32.mrf.mxu1 }
 0x304   : > { %3747 = vmatmul.msk.bf16.gmra.mxu0 %vm1525_vm5, %v5908_v17  ;;  %v2460_v49 = vrot.slane %v2163_v27, 1  ;;  %v3851_v17 = vld [vmem:[%s6651_s3 + $0x78] sm:$0xff]  ;;  %v1747_v20 = vadd.f32 %v1746_v16, %v1618_v34  ;;  %v5993_v35 = vpop.f32.mrf.mxu3 }
 0x305   : > { %v1992_v10 = vadd.f32 %v5637_v19, %v1956_v57  ;;  %v2392_v11 = vsel %vm733_vm0, %v2389_v13, %v2391_v12  ;;  %v5970_v44 = vsel %vm733_vm0, %v2259_v22, %v2261_v56  ;;  %3245 = vmatpush.bf16.msrb.mxu1 %v3851_v17  ;;  %v1749_v57 = vadd.f32 %v1748_v30, %v1620_v4 }
 0x306   : > { %v2616_v46 = vrot.slane %v2392_v11, 2  ;;  %v2461_v1 = vsel %vm1032_vm1, %v2458_v48, %v2460_v49  ;;  %v3848_v11 = vld [vmem:[%s6651_s3 + $0x60] sm:$0xff] }
 0x307   : > { %v2024_v45 = vmax.f32 %v1992_v10, 0.0  ;;  %v4131_v21 = vpack.i.bf16 %v2461_v1, %v2459_v41 }
 0x308   : > { %v2617_v61 = vsel %vm1194_vm2, %v2614_v7, %v2616_v46 }
 0x309   : > { %v2056_v22 = vmul.f32 %v2024_v45, %v5630_v28  ;;  %v2088_v13 = vmul.f32 %v2024_v45, %v5509_v14  ;;  %v4136_v15 = vpack.i.bf16 %v2617_v61, %v2615_v53  ;;  %4132 = vrot.lane.b32.xlu1 %v4131_v21, %s4287_s19  ;;  %v2164_v8 = vrot.slane %v2024_v45, 7  ;;  %3246 = vmatpush.bf16.msrb.mxu1 %v3850_v9 }
 0x30a   : > { %v1898_v37 = vpop.f32.mrf.mxu2 }
 0x30b   : > { %v2263_v62 = vrot.slane %v2056_v22, 7  ;;  %v1957_v36 = vadd.f32 %v1898_v37, %v1747_v20  ;;  %4137 = vrot.lane.b32.xlu2 %v4136_v15, %s4288_s14  ;;  %v2393_v51 = vrot.slane %v2088_v13, 7  ;;  %v2165_v48 = vsel %vm733_vm0, %v2162_v42, %v2164_v8 }
 0x30c   : > { %v2462_v1 = vrot.slane %v2165_v48, 1  ;;  %v1758_v4 = vpop.f32.mrf.mxu3 }
 0x30d   : > { %v1993_v28 = vadd.f32 %v5637_v19, %v1957_v36  ;;  %v5988_v14 = vsel %vm733_vm0, %v2261_v56, %v2263_v62  ;;  %3247 = vmatpush.bf16.msrb.mxu1 %v3849_v26  ;;  %v2394_v56 = vsel %vm733_vm0, %v2391_v12, %v2393_v51  ;;  %v6853_v36 = vld [vmem:[#allocation50_spill] sm:$0xff]  ;;  %v6855_v26 = vld [vmem:[#allocation5_spill] sm:$0xff] }
 0x30e   : > { %v2618_v42 = vrot.slane %v2394_v56, 2  ;;  %v2463_v22 = vsel %vm1032_vm1, %v2460_v49, %v2462_v1  ;;  %v6856_v56 = vld [vmem:[#allocation51_spill] sm:$0xff] }
 0x30f   : > { %v2025_v34 = vmax.f32 %v1993_v28, 0.0  ;;  %v6854_v28 = vld [vmem:[#allocation6_spill] sm:$0xff] }
 0x310   : > { %v2619_v37 = vsel %vm1194_vm2, %v2616_v46, %v2618_v42 }
 0x311   : > { %v2057_v27 = vmul.f32 %v2025_v34, %v5626_v32  ;;  %v2089_v7 = vmul.f32 %v2025_v34, %v5503_v43  ;;  %v2166_v16 = vrot.slane %v2025_v34, 7  ;;  %3248 = vmatpush.bf16.msrb.mxu1 %v3848_v11 }
 0x312   : > { %v1900_v10 = vpop.f32.mrf.mxu2 }
 0x313   : > { %v2265_v17 = vrot.slane %v2057_v27, 7  ;;  %v2395_v45 = vrot.slane %v2089_v7, 7  ;;  %v1958_v41 = vadd.f32 %v1900_v10, %v1749_v57  ;;  %v2167_v21 = vsel %vm733_vm0, %v2164_v8, %v2166_v16 }
 0x314   : > { %v2464_v53 = vrot.slane %v2167_v21, 1  ;;  %v1752_v8 = vadd.f32 %v5951_v23, %v6853_v36  ;;  %v1754_v10 = vadd.f32 %v5965_v25, %v6856_v56  ;;  %v6858_v21 = vld [vmem:[#allocation8_spill] sm:$0xff] }
 0x315   : > { %v1994_v32 = vadd.f32 %v5637_v19, %v1958_v41  ;;  %v2396_v43 = vsel %vm733_vm0, %v2393_v51, %v2395_v45  ;;  %v6006_v12 = vsel %vm733_vm0, %v2263_v62, %v2265_v17  ;;  %v6857_v41 = vld [vmem:[#allocation10_spill] sm:$0xff]  ;;  %v6861_v56 = vld [vmem:[#allocation4_spill] sm:$0xff] }
 0x316   : > { %v2620_v61 = vrot.slane %v2396_v43, 2  ;;  %v2465_v13 = vsel %vm1032_vm1, %v2462_v1, %v2464_v53 }
 0x317   : > { %v2026_v20 = vmax.f32 %v1994_v32, 0.0  ;;  %v4141_v15 = vpack.i.bf16 %v2465_v13, %v2463_v22  ;;  %v6028_v22 = vpop.f32.mrf.mxu3 }
 0x318   : > { %v2621_v9 = vsel %vm1194_vm2, %v2618_v42, %v2620_v61 }
 0x319   : > { %v2058_v51 = vmul.f32 %v2026_v20, %v6854_v28  ;;  %v2090_v62 = vmul.f32 %v2026_v20, %v6855_v26  ;;  %v4146_v30 = vpack.i.bf16 %v2621_v9, %v2619_v37  ;;  %4142 = vrot.lane.b32.xlu0 %v4141_v15, %s4287_s19  ;;  %v2168_v48 = vrot.slane %v2026_v20, 7 }
 0x31a   : > { %v1903_v34 = vpop.f32.mrf.mxu2 }
 0x31b   : > { %v2267_v49 = vrot.slane %v2058_v51, 7  ;;  %v1959_v57 = vadd.f32 %v1903_v34, %v1752_v8  ;;  %4147 = vrot.lane.b32.xlu1 %v4146_v30, %s4288_s14  ;;  %v2397_v46 = vrot.slane %v2090_v62, 7  ;;  %v2169_v11 = vsel %vm733_vm0, %v2166_v16, %v2168_v48 }
 0x31c   : > { %v2466_v37 = vrot.slane %v2169_v11, 1 }
 0x31d   : > { %v1995_v27 = vadd.f32 %v5637_v19, %v1959_v57  ;;  %v6020_v7 = vsel %vm733_vm0, %v2265_v17, %v2267_v49  ;;  %v2398_v43 = vsel %vm733_vm0, %v2395_v45, %v2397_v46 }
 0x31e   : > { %v2622_v25 = vrot.slane %v2398_v43, 2  ;;  %v2467_v26 = vsel %vm1032_vm1, %v2464_v53, %v2466_v37  ;;  %v4095_v53 = vunpack.i.h.bf16 %v5911_v0  ;;  %v4100_v0 = vunpack.i.h.bf16 %v5906_v24 }
 0x31f   : > { %v2027_v23 = vmax.f32 %v1995_v27, 0.0 }
 0x320   : > { %v2623_v34 = vsel %vm1194_vm2, %v2620_v61, %v2622_v25 }
 0x321   : > { %v2059_v1 = vmul.f32 %v2027_v23, %v6857_v41  ;;  %v2091_v42 = vmul.f32 %v2027_v23, %v6858_v21  ;;  %v2170_v32 = vrot.slane %v2027_v23, 7  ;;  %v6053_v21 = vpop.f32.mrf.mxu3 }
 0x322   : > { %v1905_v20 = vpop.f32.mrf.mxu2 }
 0x323   : > { %v2269_v13 = vrot.slane %v2059_v1, 7  ;;  %v2399_v15 = vrot.slane %v2091_v42, 7  ;;  %v1960_v17 = vadd.f32 %v1905_v20, %v1754_v10  ;;  %v6031_v9 = vsel %vm733_vm0, %v2168_v48, %v2170_v32  ;;  %v6859_v48 = vld [vmem:[#allocation53_spill] sm:$0xff] }
 0x324   : > { %v2468_v36 = vrot.slane %v6031_v9, 1  ;;  %v1757_v27 = vadd.f32 %v5993_v35, %v6859_v48  ;;  %v1759_v9 = vadd.f32 %v1758_v4, %v5494_v55 }
 0x325   : > { %v1996_v16 = vadd.f32 %v5637_v19, %v1960_v17  ;;  %v6036_v8 = vsel %vm733_vm0, %v2397_v46, %v2399_v15  ;;  %v6039_v45 = vsel %vm733_vm0, %v2267_v49, %v2269_v13  ;;  %v6860_v46 = vld [vmem:[#allocation11_spill] sm:$0xff] }
 0x326   : > { %v2624_v28 = vrot.slane %v6036_v8, 2  ;;  %v2469_v62 = vsel %vm1032_vm1, %v2466_v37, %v2468_v36  ;;  %v2750_v37 = vsel %vm1355_vm3, %v5691_v59, %v4095_v53  ;;  %v6862_v8 = vld [vmem:[#allocation14_spill] sm:$0xff] }
 0x327   : > { %v2028_v51 = vmax.f32 %v1996_v16, 0.0  ;;  %v4151_v30 = vpack.i.bf16 %v2469_v62, %v2467_v26  ;;  %v2781_v24 = vsel %vm1388_vm4, %v2750_v37, %v4100_v0  ;;  %v6864_v37 = vld [vmem:[#allocation16_spill] sm:$0xff] }
 0x328   : > { %v2625_v57 = vsel %vm1194_vm2, %v2622_v25, %v2624_v28 }
 0x329   : > { %v2060_v23 = vmul.f32 %v2028_v51, %v6860_v46  ;;  %v2092_v49 = vmul.f32 %v2028_v51, %v6861_v56  ;;  %v4156_v10 = vpack.i.bf16 %v2625_v57, %v2623_v34  ;;  %4152 = vrot.lane.b32.xlu2 %v4151_v30, %s4287_s19  ;;  %v2172_v61 = vrot.slane %v2028_v51, 7  ;;  %v1766_v53 = vpop.f32.mrf.mxu3 }
 0x32a   : > { %v1908_v11 = vpop.f32.mrf.mxu2 }
 0x32b   : > { %v2271_v41 = vrot.slane %v2060_v23, 7  ;;  %v1961_v1 = vadd.f32 %v1908_v11, %v1757_v27  ;;  %4157 = vrot.lane.b32.xlu0 %v4156_v10, %s4288_s14  ;;  %v2401_v42 = vrot.slane %v2092_v49, 7  ;;  %v2173_v16 = vsel %vm733_vm0, %v2170_v32, %v2172_v61  ;;  %v6082_v23 = vld [vmem:[%s6650_s2] ss:$0 sm:$0xff] }
 0x32c   : > { %v2470_v57 = vrot.slane %v2173_v16, 1 }
 0x32d   : > { %v1997_v35 = vadd.f32 %v5637_v19, %v1961_v1  ;;  %v6057_v43 = vsel %vm733_vm0, %v2269_v13, %v2271_v41  ;;  %v6863_v13 = vld [vmem:[#allocation7_spill] sm:$0xff]  ;;  %v2402_v59 = vsel %vm733_vm0, %v2399_v15, %v2401_v42 }
 0x32e   : > { %v2626_v46 = vrot.slane %v2402_v59, 2 }
 0x32f   : > { %v6059_v20 = vmax.f32 %v1997_v35, 0.0 }
 0x330   : > { %v2507_v17 = vpop.permute.xlu0 %2506 }
 0x331   : > { %v2751_v25 = vsel %vm1355_vm3, %v5705_v6, %v2507_v17  ;;  %v2061_v19 = vmul.f32 %v6059_v20, %v6862_v8  ;;  %v2093_v51 = vmul.f32 %v6059_v20, %v6863_v13  ;;  %v2174_v26 = vrot.slane %v6059_v20, 7  ;;  %v6866_v13 = vld [vmem:[#allocation49_spill] sm:$0xff] }
 0x332   : > { %v2663_v62 = vpop.permute.xlu1 %2662  ;;  %v1910_v30 = vpop.f32.mrf.mxu2  ;;  %v2627_v17 = vsel %vm1194_vm2, %v2624_v28, %v2626_v46 }
 0x333   : > { %v2782_v55 = vsel %vm1388_vm4, %v2751_v25, %v2663_v62  ;;  %v2273_v4 = vrot.slane %v2061_v19, 7  ;;  %v2403_v6 = vrot.slane %v2093_v51, 7  ;;  %v1962_v34 = vadd.f32 %v1910_v30, %v1759_v9  ;;  %v6076_v32 = vpop.permute.xlu2 %4102  ;;  %v6865_v9 = vld [vmem:[#allocation2_spill] sm:$0xff] }
 0x334   : > { %v2811_v48 = vpack.c.bf16 %v2782_v55, %v2781_v24  ;;  %v2175_v27 = vsel %vm733_vm0, %v2172_v61, %v2174_v26  ;;  %v2471_v61 = vsel %vm1032_vm1, %v2468_v36, %v2470_v57  ;;  %v6867_v51 = vrot.slane %v6866_v13, 7 }
 0x335   : > { %v1998_v15 = vadd.f32 %v6082_v23, %v1962_v34  ;;  %v2472_v56 = vrot.slane %v2175_v27, 1  ;;  %v2404_v49 = vsel %vm733_vm0, %v2401_v42, %v2403_v6  ;;  %v6087_v10 = vsel %vm733_vm0, %v2271_v41, %v2273_v4 }
 0x336   : > { %3707 = vmatmul.msk.bf16.gmra.mxu3 %vm1525_vm5, %v2811_v48  ;;  %3748 = vmatmul.msk.bf16.gmra.mxu0 %vm1525_vm5, %v2811_v48  ;;  %v2628_v11 = vrot.slane %v2404_v49, 2  ;;  %v1762_v41 = vadd.f32 %v6028_v22, %v5525_v40  ;;  %v930_v62 = vsel %vm733_vm0, %v6867_v51, 0.0  ;;  %v1764_v27 = vadd.f32 %v6053_v21, %v5555_v33  ;;  %v6868_v49 = vld [vmem:[#allocation19_spill] sm:$0xff] }
 0x337   : > { %v2030_v1 = vmax.f32 %v1998_v15, 0.0  ;;  %3798 = vmatmul.msk.bf16.vlgmr.msrb.gmra.mxu1 %vm1525_vm5, %v2811_v48  ;;  %v2473_v35 = vsel %vm1032_vm1, %v2470_v57, %v2472_v56  ;;  %v1768_v15 = vpop.f32.mrf.mxu3 }
 0x338   : > { %v4161_v20 = vpack.i.bf16 %v2473_v35, %v2471_v61  ;;  %v2629_v42 = vsel %vm1194_vm2, %v2626_v46, %v2628_v11  ;;  %v6869_v61 = vld [vmem:[#allocation3_spill] sm:$0xff] }
 0x339   : > { %v2062_v0 = vmul.f32 %v2030_v1, %v6864_v37  ;;  %v2094_v25 = vmul.f32 %v2030_v1, %v6865_v9  ;;  %v4166_v16 = vpack.i.bf16 %v2629_v42, %v2627_v17  ;;  %v2176_v30 = vrot.slane %v2030_v1, 7 }
 0x33a   : > { %4162 = vrot.lane.b32.xlu1 %v4161_v20, %s4287_s19  ;;  %v1913_v8 = vpop.f32.mrf.mxu2  ;;  %v1793_v28 = vpop.permute.xlu1 %1792 }
 0x33b   : > { %v2275_v19 = vrot.slane %v2062_v0, 7  ;;  %v1963_v36 = vadd.f32 %v1913_v8, %v1762_v41  ;;  %v1797_v59 = vpop.permute.xlu2 %1796  ;;  %4167 = vrot.lane.b32.xlu2 %v4166_v16, %s4288_s14  ;;  %v1799_v40 = vsel %vm1355_vm3, %v930_v62, %v1793_v28  ;;  %v2405_v22 = vrot.slane %v2094_v25, 7 }
 0x33c   : > { %v1800_v55 = vsel %vm1388_vm4, %v1799_v40, %v1797_v59  ;;  %v2177_v46 = vsel %vm733_vm0, %v2174_v26, %v2176_v30  ;;  %v1767_v59 = vadd.f32 %v1766_v53, %v5565_v38 }
 0x33d   : > { %v1999_v24 = vadd.f32 %v6082_v23, %v1963_v36  ;;  %v1801_v34 = vpack.c.bf16 %v5400_v29, %v1800_v55  ;;  %v6110_v57 = vsel %vm733_vm0, %v2273_v4, %v2275_v19  ;;  %v2406_v17 = vsel %vm733_vm0, %v2403_v6, %v2405_v22 }
 0x33e   : > { %v2474_v0 = vrot.slane %v2177_v46, 1  ;;  %v2630_v33 = vrot.slane %v2406_v17, 2  ;;  %v4104_v55 = vunpack.i.l.bf16 %v6076_v32 }
 0x33f   : > { %v2031_v48 = vmax.f32 %v1999_v24, 0.0  ;;  %3669 = vmatmul.msk.bf16.gmra.mxu2 %vm1525_vm5, %v1801_v34  ;;  %v1771_v24 = vpop.f32.mrf.mxu3 }
 0x340   : > { %v2475_v36 = vsel %vm1032_vm1, %v2472_v56, %v2474_v0  ;;  %v2631_v62 = vsel %vm1194_vm2, %v2628_v11, %v2630_v33  ;;  %v4105_v56 = vunpack.i.h.bf16 %v6076_v32  ;;  %v6871_v11 = vld [vmem:[#allocation13_spill] sm:$0xff]  ;;  %v2752_v17 = vsel %vm1355_vm3, %v5760_v60, %v4104_v55 }
 0x341   : > { %v2063_v1 = vmul.f32 %v2031_v48, %v6868_v49  ;;  %v2095_v35 = vmul.f32 %v2031_v48, %v6869_v61  ;;  %v2178_v20 = vrot.slane %v2031_v48, 7 }
 0x342   : > { %v1915_v42 = vpop.f32.mrf.mxu2  ;;  %v2753_v32 = vsel %vm1355_vm3, %v5785_v31, %v4105_v56 }
 0x343   : > { %v2277_v41 = vrot.slane %v2063_v1, 7  ;;  %v2407_v4 = vrot.slane %v2095_v35, 7  ;;  %v1964_v37 = vadd.f32 %v1915_v42, %v1764_v27  ;;  %v2179_v9 = vsel %vm733_vm0, %v2176_v30, %v2178_v20  ;;  %v6870_v30 = vld [vmem:[#allocation23_spill] sm:$0xff] }
 0x344   : > { %v2476_v25 = vrot.slane %v2179_v9, 1  ;;  %v1769_v35 = vadd.f32 %v1768_v15, %v5569_v58 }
 0x345   : > { %v2000_v21 = vadd.f32 %v6082_v23, %v1964_v37  ;;  %v6122_v26 = vsel %vm733_vm0, %v2405_v22, %v2407_v4  ;;  %v6125_v16 = vsel %vm733_vm0, %v2275_v19, %v2277_v41 }
 0x346   : > { %v2632_v8 = vrot.slane %v6122_v26, 2  ;;  %v2477_v13 = vsel %vm1032_vm1, %v2474_v0, %v2476_v25 }
 0x347   : > { %v2032_v6 = vmax.f32 %v2000_v21, 0.0  ;;  %v4171_v51 = vpack.i.bf16 %v2477_v13, %v2475_v36 }
 0x348   : > { %v2633_v28 = vsel %vm1194_vm2, %v2630_v33, %v2632_v8 }
 0x349   : > { %v2064_v40 = vmul.f32 %v2032_v6, %v6870_v30  ;;  %v4176_v19 = vpack.i.bf16 %v2633_v28, %v2631_v62  ;;  %4172 = vrot.lane.b32.xlu0 %v4171_v51, %s4287_s19  ;;  %v2096_v27 = vmul.f32 %v2032_v6, %v6871_v11  ;;  %v2180_v46 = vrot.slane %v2032_v6, 7  ;;  %v6873_v6 = vld [vmem:[#allocation9_spill] sm:$0xff] }
 0x34a   : > { %v1918_v22 = vpop.f32.mrf.mxu2 }
 0x34b   : > { %v2279_v34 = vrot.slane %v2064_v40, 7  ;;  %v1965_v48 = vadd.f32 %v1918_v22, %v1767_v59  ;;  %4177 = vrot.lane.b32.xlu1 %v4176_v19, %s4288_s14  ;;  %v2409_v37 = vrot.slane %v2096_v27, 7  ;;  %v2181_v33 = vsel %vm733_vm0, %v2178_v20, %v2180_v46  ;;  %v1773_v59 = vpop.f32.mrf.mxu3 }
 0x34c   : > { %v2478_v60 = vrot.slane %v2181_v33, 1 }
 0x34d   : > { %v2001_v38 = vadd.f32 %v6082_v23, %v1965_v48  ;;  %v4108_v53 = vpop.permute.xlu0 %4107  ;;  %v6143_v49 = vsel %vm733_vm0, %v2277_v41, %v2279_v34  ;;  %v6872_v41 = vld [vmem:[#allocation25_spill] sm:$0xff]  ;;  %v2410_v20 = vsel %vm733_vm0, %v2407_v4, %v2409_v37 }
 0x34e   : > { %v4110_v1 = vunpack.i.h.bf16 %v4108_v53  ;;  %v4109_v61 = vunpack.i.l.bf16 %v4108_v53  ;;  %v2479_v55 = vsel %vm1032_vm1, %v2476_v25, %v2478_v60  ;;  %v2634_v11 = vrot.slane %v2410_v20, 2 }
 0x34f   : > { %v2033_v42 = vmax.f32 %v2001_v38, 0.0  ;;  %v6874_v38 = vld [vmem:[#allocation27_spill] sm:$0xff] }
 0x350   : > { %v2783_v0 = vsel %vm1388_vm4, %v2752_v17, %v4109_v61  ;;  %v2784_v9 = vsel %vm1388_vm4, %v2753_v32, %v4110_v1  ;;  %v6875_v1 = vld [vmem:[#allocation12_spill] sm:$0xff] }
 0x351   : > { %v2065_v21 = vmul.f32 %v2033_v42, %v6872_v41  ;;  %v2097_v36 = vmul.f32 %v2033_v42, %v6873_v6  ;;  %v2182_v13 = vrot.slane %v2033_v42, 7  ;;  %v2812_v58 = vpack.c.bf16 %v2784_v9, %v2783_v0 }
 0x352   : > { %v1920_v15 = vpop.f32.mrf.mxu2 }
 0x353   : > { %v2281_v51 = vrot.slane %v2065_v21, 7  ;;  %v2411_v31 = vrot.slane %v2097_v36, 7  ;;  %v1966_v62 = vadd.f32 %v1920_v15, %v1769_v35  ;;  %3708 = vmatmul.msk.bf16.gmra.mxu3 %vm1525_vm5, %v2812_v58  ;;  %3749 = vmatmul.msk.bf16.gmra.mxu0 %vm1525_vm5, %v2812_v58  ;;  %v6159_v28 = vsel %vm733_vm0, %v2180_v46, %v2182_v13  ;;  %v1776_v36 = vpop.f32.mrf.mxu3 }
 0x354   : > { %3799 = vmatmul.msk.bf16.gmra.mxu1 %vm1525_vm5, %v2812_v58  ;;  %v2480_v40 = vrot.slane %v6159_v28, 1  ;;  %v1772_v46 = vadd.f32 %v1771_v24, %v5571_v52  ;;  %v6876_v28 = vld [vmem:[#allocation29_spill] sm:$0xff] }
 0x355   : > { %v2002_v30 = vadd.f32 %v6082_v23, %v1966_v62  ;;  %v6165_v19 = vsel %vm733_vm0, %v2409_v37, %v2411_v31  ;;  %v6168_v22 = vsel %vm733_vm0, %v2279_v34, %v2281_v51  ;;  %v2635_v37 = vsel %vm1194_vm2, %v2632_v8, %v2634_v11 }
 0x356   : > { %v2481_v48 = vsel %vm1032_vm1, %v2478_v60, %v2480_v40  ;;  %v2636_v4 = vrot.slane %v6165_v19, 2  ;;  %v1774_v62 = vadd.f32 %v1773_v59, %v5573_v47 }
 0x357   : > { %v2034_v56 = vmax.f32 %v2002_v30, 0.0  ;;  %v4181_v27 = vpack.i.bf16 %v2481_v48, %v2479_v55  ;;  %v6877_v30 = vld [vmem:[#allocation15_spill] sm:$0xff] }
 0x358   : > { %v2637_v34 = vsel %vm1194_vm2, %v2634_v11, %v2636_v4 }
 0x359   : > { %v2066_v53 = vmul.f32 %v2034_v56, %v6874_v38  ;;  %v2098_v61 = vmul.f32 %v2034_v56, %v6875_v1  ;;  %4182 = vrot.lane.b32.xlu2 %v4181_v27, %s4287_s19  ;;  %v2184_v32 = vrot.slane %v2034_v56, 7  ;;  %v4186_v24 = vpack.i.bf16 %v2637_v34, %v2635_v37  ;;  %v6878_v37 = vld [vmem:[#allocation54_spill] sm:$0xff] }
 0x35a   : > { %v1923_v35 = vpop.f32.mrf.mxu2 }
 0x35b   : > { %v2283_v17 = vrot.slane %v2066_v53, 7  ;;  %v1967_v25 = vadd.f32 %v1923_v35, %v1772_v46  ;;  %v4113_v42 = vpop.permute.xlu0 %4112  ;;  %v2413_v0 = vrot.slane %v2098_v61, 7  ;;  %4187 = vrot.lane.b32.xlu0 %v4186_v24, %s4288_s14  ;;  %v2185_v60 = vsel %vm733_vm0, %v2182_v13, %v2184_v32  ;;  %v6879_v24 = vld [vmem:[#allocation34_spill] sm:$0xff] }
 0x35c   : > { %v4115_v9 = vunpack.i.h.bf16 %v4113_v42  ;;  %v4114_v52 = vunpack.i.l.bf16 %v4113_v42  ;;  %v2482_v46 = vrot.slane %v2185_v60, 1 }
 0x35d   : > { %v2003_v33 = vadd.f32 %v6082_v23, %v1967_v25  ;;  %v6183_v41 = vsel %vm733_vm0, %v2281_v51, %v2283_v17  ;;  %v4118_v6 = vpop.permute.xlu1 %4117  ;;  %v2414_v51 = vsel %vm733_vm0, %v2411_v31, %v2413_v0 }
 0x35e   : > { %v2754_v21 = vsel %vm1355_vm3, %v5826_v63, %v4114_v52  ;;  %v2755_v26 = vsel %vm1355_vm3, %v5849_v54, %v4115_v9  ;;  %v4120_v8 = vunpack.i.h.bf16 %v4118_v6  ;;  %v4119_v15 = vunpack.i.l.bf16 %v4118_v6  ;;  %v1778_v9 = vpop.f32.mrf.mxu3  ;;  %v4123_v52 = vpop.permute.xlu2 %4122 }
 0x35f   : > { %v2035_v58 = vmax.f32 %v2003_v33, 0.0  ;;  %v2638_v13 = vrot.slane %v2414_v51, 2  ;;  %v2483_v34 = vsel %vm1032_vm1, %v2480_v40, %v2482_v46 }
 0x360   : > { %v2785_v56 = vsel %vm1388_vm4, %v2754_v21, %v4119_v15  ;;  %v2786_v48 = vsel %vm1388_vm4, %v2755_v26, %v4120_v8  ;;  %v6880_v21 = vld [vmem:[#allocation17_spill] sm:$0xff] }
 0x361   : > { %v2067_v20 = vmul.f32 %v2035_v58, %v6876_v28  ;;  %v2099_v63 = vmul.f32 %v2035_v58, %v6877_v30  ;;  %v2186_v19 = vrot.slane %v2035_v58, 7  ;;  %v2813_v38 = vpack.c.bf16 %v2786_v48, %v2785_v56 }
 0x362   : > { %v1925_v55 = vpop.f32.mrf.mxu2  ;;  %v2639_v42 = vsel %vm1194_vm2, %v2636_v4, %v2638_v13  ;;  %v4125_v4 = vunpack.i.h.bf16 %v4123_v52 }
 0x363   : > { %v2285_v11 = vrot.slane %v2067_v20, 7  ;;  %v2415_v54 = vrot.slane %v2099_v63, 7  ;;  %v1968_v27 = vadd.f32 %v1925_v55, %v1774_v62  ;;  %v6198_v47 = vsel %vm733_vm0, %v2184_v32, %v2186_v19  ;;  %3709 = vmatmul.msk.bf16.gmra.mxu3 %vm1525_vm5, %v2813_v38  ;;  %3750 = vmatmul.msk.bf16.gmra.mxu0 %vm1525_vm5, %v2813_v38  ;;  %v6881_v55 = vld [vmem:[#allocation55_spill] sm:$0xff] }
 0x364   : > { %v2484_v59 = vrot.slane %v6198_v47, 1  ;;  %3800 = vmatmul.msk.bf16.gmra.mxu1 %vm1525_vm5, %v2813_v38  ;;  %v4124_v62 = vunpack.i.l.bf16 %v4123_v52  ;;  %v1779_v48 = vadd.f32 %v1778_v9, %v6881_v55 }
 0x365   : > { %v2004_v31 = vadd.f32 %v6082_v23, %v1968_v27  ;;  %v6203_v53 = vsel %vm733_vm0, %v2413_v0, %v2415_v54  ;;  %v6206_v1 = vsel %vm733_vm0, %v2283_v17, %v2285_v11  ;;  %v1777_v0 = vadd.f32 %v1776_v36, %v6878_v37 }
 0x366   : > { %v2640_v61 = vrot.slane %v6203_v53, 2  ;;  %v2485_v32 = vsel %vm1032_vm1, %v2482_v46, %v2484_v59  ;;  %v2757_v27 = vsel %vm1355_vm3, %v5919_v3, %v4125_v4  ;;  %v2756_v46 = vsel %vm1355_vm3, %v5880_v5, %v4124_v62 }
 0x367   : > { %v2036_v35 = vmax.f32 %v2004_v31, 0.0  ;;  %v4191_v25 = vpack.i.bf16 %v2485_v32, %v2483_v34 }
 0x368   : > { %v2641_v17 = vsel %vm1194_vm2, %v2638_v13, %v2640_v61  ;;  %v6882_v13 = vld [vmem:[#allocation28_spill] sm:$0xff] }
 0x369   : > { %v2068_v33 = vmul.f32 %v2036_v35, %v6879_v24  ;;  %v2100_v6 = vmul.f32 %v2036_v35, %v6880_v21  ;;  %v4196_v40 = vpack.i.bf16 %v2641_v17, %v2639_v42  ;;  %4192 = vrot.lane.b32.xlu1 %v4191_v25, %s4287_s19  ;;  %v2188_v26 = vrot.slane %v2036_v35, 7  ;;  %v1781_v17 = vpop.f32.mrf.mxu3 }
 0x36a   : > { %v1928_v58 = vpop.f32.mrf.mxu2 }
 0x36b   : > { %v2287_v8 = vrot.slane %v2068_v33, 7  ;;  %v1969_v15 = vadd.f32 %v1928_v58, %v1777_v0  ;;  %4197 = vrot.lane.b32.xlu2 %v4196_v40, %s4288_s14  ;;  %v2417_v60 = vrot.slane %v2100_v6, 7  ;;  %v2189_v56 = vsel %vm733_vm0, %v2186_v19, %v2188_v26 }
 0x36c   : > { %v2486_v42 = vrot.slane %v2189_v56, 1 }
 0x36d   : > { %v2005_v36 = vadd.f32 %v6082_v23, %v1969_v15  ;;  %v6227_v51 = vsel %vm733_vm0, %v2285_v11, %v2287_v8  ;;  %v4128_v28 = vpop.permute.xlu0 %4127  ;;  %v2418_v38 = vsel %vm733_vm0, %v2415_v54, %v2417_v60  ;;  %v6883_v11 = vld [vmem:[#allocation18_spill] sm:$0xff] }
 0x36e   : > { %v4130_v30 = vunpack.i.h.bf16 %v4128_v28  ;;  %v4129_v63 = vunpack.i.l.bf16 %v4128_v28  ;;  %v2642_v52 = vrot.slane %v2418_v38, 2  ;;  %v2487_v58 = vsel %vm1032_vm1, %v2484_v59, %v2486_v42  ;;  %v6886_v28 = vld [vmem:[#allocation21_spill] sm:$0xff]  ;;  %v4138_v59 = vpop.permute.xlu2 %4137 }
 0x36f   : > { %v2037_v20 = vmax.f32 %v2005_v36, 0.0  ;;  %v4140_v53 = vunpack.i.h.bf16 %v4138_v59 }
 0x370   : > { %v2788_v32 = vsel %vm1388_vm4, %v2757_v27, %v4130_v30  ;;  %v2787_v25 = vsel %vm1388_vm4, %v2756_v46, %v4129_v63  ;;  %v2643_v30 = vsel %vm1194_vm2, %v2640_v61, %v2642_v52 }
 0x371   : > { %v2069_v31 = vmul.f32 %v2037_v20, %v6882_v13  ;;  %v2101_v35 = vmul.f32 %v2037_v20, %v6883_v11  ;;  %v2190_v34 = vrot.slane %v2037_v20, 7  ;;  %v2814_v3 = vpack.c.bf16 %v2788_v32, %v2787_v25  ;;  %v1783_v38 = vpop.f32.mrf.mxu3 }
 0x372   : > { %v1930_v19 = vpop.f32.mrf.mxu2 }
 0x373   : > { %v2289_v37 = vrot.slane %v2069_v31, 7  ;;  %v2419_v0 = vrot.slane %v2101_v35, 7  ;;  %v1970_v9 = vadd.f32 %v1930_v19, %v1779_v48  ;;  %v2191_v5 = vsel %vm733_vm0, %v2188_v26, %v2190_v34  ;;  %3710 = vmatmul.msk.bf16.gmra.mxu3 %vm1525_vm5, %v2814_v3  ;;  %3751 = vmatmul.msk.bf16.gmra.mxu0 %vm1525_vm5, %v2814_v3 }
 0x374   : > { %v2488_v24 = vrot.slane %v2191_v5, 1  ;;  %3801 = vmatmul.msk.bf16.gmra.mxu1 %vm1525_vm5, %v2814_v3  ;;  %v4139_v35 = vunpack.i.l.bf16 %v4138_v59 }
 0x375   : > { %v2006_v54 = vadd.f32 %v6082_v23, %v1970_v9  ;;  %v6243_v33 = vsel %vm733_vm0, %v2417_v60, %v2419_v0  ;;  %v6246_v21 = vsel %vm733_vm0, %v2287_v8, %v2289_v37  ;;  %v6884_v8 = vld [vmem:[#allocation56_spill] sm:$0xff] }
 0x376   : > { %v2644_v6 = vrot.slane %v6243_v33, 2  ;;  %v2489_v26 = vsel %vm1032_vm1, %v2486_v42, %v2488_v24  ;;  %v1782_v62 = vadd.f32 %v1781_v17, %v6884_v8  ;;  %v6885_v60 = vld [vmem:[#allocation32_spill] sm:$0xff]  ;;  %v6887_v17 = vld [vmem:[#allocation57_spill] sm:$0xff] }
 0x377   : > { %v2038_v40 = vmax.f32 %v2006_v54, 0.0  ;;  %v4201_v15 = vpack.i.bf16 %v2489_v26, %v2487_v58  ;;  %v1784_v3 = vadd.f32 %v1783_v38, %v6887_v17  ;;  %v6888_v54 = vld [vmem:[#allocation44_spill] sm:$0xff] }
 0x378   : > { %v2645_v4 = vsel %vm1194_vm2, %v2642_v52, %v2644_v6  ;;  %v6889_v33 = vld [vmem:[#allocation20_spill] sm:$0xff] }
 0x379   : > { %v2070_v36 = vmul.f32 %v2038_v40, %v6885_v60  ;;  %v2102_v20 = vmul.f32 %v2038_v40, %v6886_v28  ;;  %4202 = vrot.lane.b32.xlu0 %v4201_v15, %s4287_s19  ;;  %v4206_v63 = vpack.i.bf16 %v2645_v4, %v2643_v30  ;;  %v2192_v56 = vrot.slane %v2038_v40, 7 }
 0x37a   : > { %v1933_v47 = vpop.f32.mrf.mxu2 }
 0x37b   : > { %v2291_v55 = vrot.slane %v2070_v36, 7  ;;  %v1971_v48 = vadd.f32 %v1933_v47, %v1782_v62  ;;  %v2421_v27 = vrot.slane %v2102_v20, 7  ;;  %v4133_v46 = vpop.permute.xlu1 %4132  ;;  %4207 = vrot.lane.b32.xlu1 %v4206_v63, %s4288_s14  ;;  %v2193_v42 = vsel %vm733_vm0, %v2190_v34, %v2192_v56 }
 0x37c   : > { %v4135_v31 = vunpack.i.h.bf16 %v4133_v46  ;;  %v4134_v11 = vunpack.i.l.bf16 %v4133_v46  ;;  %v2490_v15 = vrot.slane %v2193_v42, 1 }
 0x37d   : > { %v2007_v13 = vadd.f32 %v6082_v23, %v1971_v48  ;;  %v6267_v61 = vsel %vm733_vm0, %v2289_v37, %v2291_v55  ;;  %v2422_v52 = vsel %vm733_vm0, %v2419_v0, %v2421_v27 }
 0x37e   : > { %v2759_v25 = vsel %vm1355_vm3, %v5956_v50, %v4135_v31  ;;  %v2758_v19 = vsel %vm1355_vm3, %v5936_v2, %v4134_v11  ;;  %v2646_v60 = vrot.slane %v2422_v52, 2  ;;  %v2491_v0 = vsel %vm1032_vm1, %v2488_v24, %v2490_v15  ;;  %v6891_v24 = vld [vmem:[#allocation30_spill] sm:$0xff] }
 0x37f   : > { %v2039_v32 = vmax.f32 %v2007_v13, 0.0  ;;  %v2789_v9 = vsel %vm1388_vm4, %v2758_v19, %v4139_v35  ;;  %v2790_v5 = vsel %vm1388_vm4, %v2759_v25, %v4140_v53 }
 0x380   : > { %v2815_v26 = vpack.c.bf16 %v2790_v5, %v2789_v9 }
 0x381   : > { %v2071_v37 = vmul.f32 %v2039_v32, %v6888_v54  ;;  %v2103_v40 = vmul.f32 %v2039_v32, %v6889_v33  ;;  %v2194_v58 = vrot.slane %v2039_v32, 7 }
 0x382   : > { %v1935_v50 = vpop.f32.mrf.mxu2 }
 0x383   : > { %v2293_v4 = vrot.slane %v2071_v37, 7  ;;  %v2423_v2 = vrot.slane %v2103_v40, 7  ;;  %v1972_v8 = vadd.f32 %v1935_v50, %v1784_v3  ;;  %v2195_v34 = vsel %vm733_vm0, %v2192_v56, %v2194_v58  ;;  %3711 = vmatmul.msk.bf16.gmra.mxu3 %vm1525_vm5, %v2815_v26  ;;  %3752 = vmatmul.msk.bf16.gmra.mxu0 %vm1525_vm5, %v2815_v26  ;;  %v4153_v50 = vpop.permute.xlu2 %4152 }
 0x384   : > { %v2492_v62 = vrot.slane %v2195_v34, 1  ;;  %3802 = vmatmul.msk.bf16.gmra.mxu1 %vm1525_vm5, %v2815_v26  ;;  %v2647_v56 = vsel %vm1194_vm2, %v2644_v6, %v2646_v60 }
 0x385   : > { %v2008_v36 = vadd.f32 %v6082_v23, %v1972_v8  ;;  %v2424_v28 = vsel %vm733_vm0, %v2421_v27, %v2423_v2  ;;  %v6288_v47 = vsel %vm733_vm0, %v2291_v55, %v2293_v4  ;;  %v6890_v27 = vld [vmem:[#allocation47_spill] sm:$0xff] }
 0x386   : > { %v2493_v20 = vsel %vm1032_vm1, %v2490_v15, %v2492_v62  ;;  %v2648_v30 = vrot.slane %v2424_v28, 2  ;;  %v4155_v15 = vunpack.i.h.bf16 %v4153_v50 }
 0x387   : > { %v6290_v63 = vmax.f32 %v2008_v36, 0.0  ;;  %v4211_v59 = vpack.i.bf16 %v2493_v20, %v2491_v0 }
 0x388   : > { %v2649_v48 = vsel %vm1194_vm2, %v2646_v60, %v2648_v30  ;;  %v2763_v60 = vsel %vm1355_vm3, %v6020_v7, %v4155_v15 }
 0x389   : > { %v6297_v46 = vmul.f32 %v6290_v63, %v6890_v27  ;;  %v6301_v38 = vmul.f32 %v6290_v63, %v6891_v24  ;;  %v2196_v55 = vrot.slane %v6290_v63, 7  ;;  %4212 = vrot.lane.b32.xlu2 %v4211_v59, %s4287_s19  ;;  %v4216_v13 = vpack.i.bf16 %v2649_v48, %v2647_v56 }
 0x38b   : > { %v2295_v31 = vrot.slane %v6297_v46, 7  ;;  %v2425_v11 = vrot.slane %v6301_v38, 7  ;;  %4217 = vrot.lane.b32.xlu0 %v4216_v13, %s4288_s14  ;;  %v6311_v6 = vsel %vm733_vm0, %v2194_v58, %v2196_v55  ;;  %v4143_v53 = vpop.permute.xlu0 %4142 }
 0x38c   : > { %v2494_v35 = vrot.slane %v6311_v6, 1  ;;  %v4145_v32 = vunpack.i.h.bf16 %v4143_v53  ;;  %v4144_v25 = vunpack.i.l.bf16 %v4143_v53 }
 0x38d   : > { %v4148_v19 = vpop.permute.xlu1 %4147  ;;  %v6317_v42 = vsel %vm733_vm0, %v2423_v2, %v2425_v11  ;;  %v6322_v17 = vsel %vm733_vm0, %v2293_v4, %v2295_v31  ;;  %v1786_v4 = vpop.f32.mrf.mxu3 }
 0x38e   : > { %v4150_v3 = vunpack.i.h.bf16 %v4148_v19  ;;  %v4149_v9 = vunpack.i.l.bf16 %v4148_v19  ;;  %v6327_v5 = vsel %vm1032_vm1, %v2492_v62, %v2494_v35  ;;  %v2650_v52 = vrot.slane %v6317_v42, 2 }
 0x38f   : > { %v2761_v54 = vsel %vm1355_vm3, %v5988_v14, %v4145_v32  ;;  %v2760_v37 = vsel %vm1355_vm3, %v5970_v44, %v4144_v25  ;;  %v3098_v14 = vpop.f32.mrf.mxu0  ;;  %v4154_v44 = vunpack.i.l.bf16 %v4153_v50 }
 0x390   : > { %v2792_v33 = vsel %vm1388_vm4, %v2761_v54, %v4150_v3  ;;  %v2791_v40 = vsel %vm1388_vm4, %v2760_v37, %v4149_v9  ;;  %v6339_v58 = vsel %vm1194_vm2, %v2648_v30, %v2650_v52  ;;  %v6364_v54 = vld [vmem:[%s6652_s4] ss:$0 sm:$0xff] }
 0x391   : > { %v2816_v26 = vpack.c.bf16 %v2792_v33, %v2791_v40  ;;  %v2762_v62 = vsel %vm1355_vm3, %v6006_v12, %v4154_v44 }
 0x393   : > { %3712 = vmatmul.msk.bf16.gmra.mxu3 %vm1525_vm5, %v2816_v26  ;;  %3753 = vmatmul.msk.bf16.gmra.mxu0 %vm1525_vm5, %v2816_v26 }
 0x394   : > { %3803 = vmatmul.msk.bf16.gmra.mxu1 %vm1525_vm5, %v2816_v26  ;;  %v4245_v26 = vld [vmem:[%s4356_s8] sm:$0xff] }
 0x395   : > { %v1788_v30 = vpop.f32.mrf.mxu3  ;;  %v4168_v59 = vpop.permute.xlu2 %4167 }
 0x396   : > { %v4170_v24 = vunpack.i.h.bf16 %v4168_v59  ;;  %v4169_v13 = vunpack.i.l.bf16 %v4168_v59 }
 0x397   : > { %v3100_v20 = vpop.f32.mrf.mxu0 }
 0x39d   : > { %v4158_v2 = vpop.permute.xlu0 %4157  ;;  %v2970_v7 = vpop.f32.mrf.mxu3 }
 0x39e   : > { %v4160_v8 = vunpack.i.h.bf16 %v4158_v2  ;;  %v4159_v34 = vunpack.i.l.bf16 %v4158_v2  ;;  %v3099_v9 = vadd.f32 %v3098_v14, %v2970_v7 }
 0x39f   : > { %v6353_v56 = vpop.f32.mrf.mxu0 }
 0x3a0   : > { %v2793_v36 = vsel %vm1388_vm4, %v2762_v62, %v4159_v34  ;;  %v2794_v28 = vsel %vm1388_vm4, %v2763_v60, %v4160_v8 }
 0x3a1   : > { %v2817_v0 = vpack.c.bf16 %v2794_v28, %v2793_v36 }
 0x3a3   : > { %3713 = vmatmul.msk.bf16.gmra.mxu3 %vm1525_vm5, %v2817_v0  ;;  %3754 = vmatmul.msk.bf16.gmra.mxu0 %vm1525_vm5, %v2817_v0 }
 0x3a4   : > { %3804 = vmatmul.msk.bf16.gmra.mxu1 %vm1525_vm5, %v2817_v0 }
 0x3a7   : > { %v6366_v40 = vpop.f32.mrf.mxu0 }
 0x3ac   : > { %v4163_v12 = vpop.permute.xlu1 %4162 }
 0x3ad   : > { %v4165_v48 = vunpack.i.h.bf16 %v4163_v12  ;;  %v4164_v27 = vunpack.i.l.bf16 %v4163_v12 }
 0x3af   : > { %v2765_v53 = vsel %vm1355_vm3, %v6057_v43, %v4165_v48  ;;  %v2764_v32 = vsel %vm1355_vm3, %v6039_v45, %v4164_v27  ;;  %v2972_v43 = vpop.f32.mrf.mxu3  ;;  %v4246_v27 = vld [vmem:[%s4356_s8 + $0x8] sm:$0xff] }
 0x3b0   : > { %v2795_v25 = vsel %vm1388_vm4, %v2764_v32, %v4169_v13  ;;  %v2796_v19 = vsel %vm1388_vm4, %v2765_v53, %v4170_v24  ;;  %v3101_v50 = vadd.f32 %v3100_v20, %v2972_v43  ;;  %v6892_v13 = vld [vmem:[#allocation58_spill] sm:$0xff] }
 0x3b1   : > { %v2818_v3 = vpack.c.bf16 %v2796_v19, %v2795_v25  ;;  %v1787_v53 = vadd.f32 %v1786_v4, %v6892_v13  ;;  %v6894_v4 = vld [vmem:[#allocation48_spill] sm:$0xff]  ;;  %v6895_v43 = vld [vmem:[#allocation22_spill] sm:$0xff] }
 0x3b3   : > { %3714 = vmatmul.msk.bf16.gmra.mxu3 %vm1525_vm5, %v2818_v3  ;;  %3755 = vmatmul.msk.bf16.gmra.mxu0 %vm1525_vm5, %v2818_v3  ;;  %v6382_v60 = vpop.f32.mrf.mxu0 }
 0x3b4   : > { %v3250_v37 = vpop.f32.mrf.mxu1  ;;  %3805 = vmatmul.msk.bf16.gmra.mxu1 %vm1525_vm5, %v2818_v3 }
 0x3b5   : > { %v3330_v33 = vadd.f32 %v3250_v37, %v3099_v9  ;;  %v6893_v37 = vld [vmem:[#allocation59_spill] sm:$0xff] }
 0x3b7   : > { %v3366_v45 = vadd.f32 %v6364_v54, %v3330_v33  ;;  %v1789_v33 = vadd.f32 %v1788_v30, %v6893_v37 }
 0x3b9   : > { %v3398_v14 = vadd.f32 %v4245_v26, %v3366_v45  ;;  %v2975_v25 = vpop.f32.mrf.mxu3 }
 0x3bb   : > { %3430 = vst.msk [vmem:[%s6377_s24] sm:$0xff] %vm1355_vm3, %v3398_v14  ;;  %v4173_v44 = vpop.permute.xlu0 %4172 }
 0x3bc   : > { %v3252_v15 = vpop.f32.mrf.mxu1  ;;  %v4175_v8 = vunpack.i.h.bf16 %v4173_v44  ;;  %v4174_v34 = vunpack.i.l.bf16 %v4173_v44 }
 0x3bd   : > { %v3331_v2 = vadd.f32 %v3252_v15, %v3101_v50  ;;  %v4178_v62 = vpop.permute.xlu1 %4177 }
 0x3be   : > { %v4180_v36 = vunpack.i.h.bf16 %v4178_v62  ;;  %v4179_v28 = vunpack.i.l.bf16 %v4178_v62  ;;  %v2767_v59 = vsel %vm1355_vm3, %v6110_v57, %v4175_v8  ;;  %v2766_v20 = vsel %vm1355_vm3, %v6087_v10, %v4174_v34  ;;  %v4183_v10 = vpop.permute.xlu2 %4182  ;;  %v6399_v57 = vpop.f32.mrf.mxu0 }
 0x3bf   : > { %v3367_v0 = vadd.f32 %v6364_v54, %v3331_v2  ;;  %v4185_v50 = vunpack.i.h.bf16 %v4183_v10  ;;  %v4184_v62 = vunpack.i.l.bf16 %v4183_v10 }
 0x3c0   : > { %v2797_v12 = vsel %vm1388_vm4, %v2766_v20, %v4179_v28  ;;  %v2798_v48 = vsel %vm1388_vm4, %v2767_v59, %v4180_v36 }
 0x3c1   : > { %v3399_v7 = vadd.f32 %v4246_v27, %v3367_v0  ;;  %v2819_v24 = vpack.c.bf16 %v2798_v48, %v2797_v12  ;;  %v2977_v28 = vpop.f32.mrf.mxu3  ;;  %v3104_v12 = vadd.f32 %v6353_v56, %v2975_v25  ;;  %v2768_v46 = vsel %vm1355_vm3, %v6125_v16, %v4184_v62 }
 0x3c2   : > { %v1938_v32 = vpop.f32.mrf.mxu2 }
 0x3c3   : > { %3431 = vst.msk [vmem:[%s6377_s24 + $0x8] sm:$0xff] %vm1355_vm3, %v3399_v7  ;;  %v1973_v19 = vadd.f32 %v1938_v32, %v1787_v53  ;;  %3715 = vmatmul.msk.bf16.gmra.mxu3 %vm1525_vm5, %v2819_v24  ;;  %3756 = vmatmul.msk.bf16.gmra.mxu0 %vm1525_vm5, %v2819_v24  ;;  %v6896_v7 = vld [vmem:[#allocation35_spill] sm:$0xff]  ;;  %v6897_v53 = vld [vmem:[#allocation46_spill] sm:$0xff] }
 0x3c4   : > { %3806 = vmatmul.msk.bf16.gmra.mxu1 %vm1525_vm5, %v2819_v24 }
 0x3c5   : > { %v2009_v3 = vadd.f32 %v6082_v23, %v1973_v19 }
 0x3c7   : > { %v2041_v9 = vmax.f32 %v2009_v3, 0.0 }
 0x3c9   : > { %v2073_v45 = vmul.f32 %v2041_v9, %v6894_v4  ;;  %v2105_v26 = vmul.f32 %v2041_v9, %v6895_v43  ;;  %v2198_v14 = vrot.slane %v2041_v9, 7  ;;  %v4247_v9 = vld [vmem:[%s4356_s8 + $0x10] sm:$0xff] }
 0x3ca   : > { %v1940_v15 = vpop.f32.mrf.mxu2 }
 0x3cb   : > { %v2297_v44 = vrot.slane %v2073_v45, 7  ;;  %v2427_v2 = vrot.slane %v2105_v26, 7  ;;  %v1974_v8 = vadd.f32 %v1940_v15, %v1789_v33  ;;  %v2199_v34 = vsel %vm733_vm0, %v2196_v55, %v2198_v14 }
 0x3cc   : > { %v2496_v36 = vrot.slane %v2199_v34, 1  ;;  %v2769_v55 = vsel %vm1355_vm3, %v6143_v49, %v4185_v50 }
 0x3cd   : > { %v2010_v0 = vadd.f32 %v6082_v23, %v1974_v8  ;;  %v2428_v30 = vsel %vm733_vm0, %v2425_v11, %v2427_v2  ;;  %v6414_v59 = vsel %vm733_vm0, %v2295_v31, %v2297_v44  ;;  %v4188_v48 = vpop.permute.xlu0 %4187 }
 0x3ce   : > { %v2497_v63 = vsel %vm1032_vm1, %v2494_v35, %v2496_v36  ;;  %v2652_v20 = vrot.slane %v2428_v30, 2  ;;  %v4190_v31 = vunpack.i.h.bf16 %v4188_v48  ;;  %v4189_v27 = vunpack.i.l.bf16 %v4188_v48 }
 0x3cf   : > { %v2042_v23 = vmax.f32 %v2010_v0, 0.0  ;;  %v4221_v11 = vpack.i.bf16 %v2497_v63, %v6327_v5 }
 0x3d0   : > { %v6422_v38 = vpop.f32.mrf.mxu0  ;;  %v2653_v35 = vsel %vm1194_vm2, %v2650_v52, %v2652_v20  ;;  %v2800_v5 = vsel %vm1388_vm4, %v2769_v55, %v4190_v31  ;;  %v2799_v16 = vsel %vm1388_vm4, %v2768_v46, %v4189_v27  ;;  %v4198_v55 = vpop.permute.xlu2 %4197  ;;  %v4248_v46 = vld [vmem:[%s4356_s8 + $0x18] sm:$0xff] }
 0x3d1   : > { %v3255_v6 = vpop.f32.mrf.mxu1  ;;  %v2106_v49 = vmul.f32 %v2042_v23, %v6896_v7  ;;  %v2200_v56 = vrot.slane %v2042_v23, 7  ;;  %4222 = vrot.lane.b32.xlu1 %v4221_v11, %s4287_s19  ;;  %v4226_v13 = vpack.i.bf16 %v2653_v35, %v6339_v58  ;;  %v6436_v32 = vmul.f32 %v2042_v23, %v6897_v53 }
 0x3d2   : > { %v3332_v24 = vadd.f32 %v3255_v6, %v3104_v12  ;;  %v2820_v52 = vpack.c.bf16 %v2800_v5, %v2799_v16  ;;  %v4200_v48 = vunpack.i.h.bf16 %v4198_v55  ;;  %v4199_v11 = vunpack.i.l.bf16 %v4198_v55  ;;  %v4249_v16 = vld [vmem:[%s4356_s8 + $0x20] sm:$0xff] }
 0x3d3   : > { %v2205_v42 = vsel %vm733_vm0, %v2200_v56, 0.0  ;;  %v2429_v25 = vrot.slane %v2106_v49, 7  ;;  %4227 = vrot.lane.b32.xlu2 %v4226_v13, %s4288_s14  ;;  %v2201_v3 = vsel %vm733_vm0, %v2198_v14, %v2200_v56  ;;  %v2299_v58 = vrot.slane %v6436_v32, 7 }
 0x3d4   : > { %v3368_v19 = vadd.f32 %v6364_v54, %v3332_v24  ;;  %v2840_v10 = vrot.slane %v2205_v42, 1  ;;  %3716 = vmatmul.msk.bf16.gmra.mxu3 %vm1525_vm5, %v2820_v52  ;;  %3757 = vmatmul.msk.bf16.gmra.mxu0 %vm1525_vm5, %v2820_v52  ;;  %v2838_v4 = vrot.slane %v2201_v3, 1  ;;  %v3106_v14 = vadd.f32 %v6366_v40, %v2977_v28 }
 0x3d5   : > { %v2430_v45 = vsel %vm733_vm0, %v2427_v2, %v2429_v25  ;;  %v2434_v43 = vsel %vm733_vm0, %v2429_v25, 0.0  ;;  %3807 = vmatmul.msk.bf16.gmra.mxu1 %vm1525_vm5, %v2820_v52  ;;  %v6457_v34 = vsel %vm733_vm0, %v2297_v44, %v2299_v58 }
 0x3d6   : > { %v3400_v37 = vadd.f32 %v4247_v9, %v3368_v19  ;;  %v2980_v33 = vpop.f32.mrf.mxu3  ;;  %v2849_v26 = vrot.slane %v2430_v45, 2  ;;  %v2851_v50 = vrot.slane %v2434_v43, 2  ;;  %v2839_v15 = vsel %vm1032_vm1, %v2496_v36, %v2838_v4  ;;  %v4250_v43 = vld [vmem:[%s4356_s8 + $0x28] sm:$0xff] }
 0x3d7   : > { %v2841_v8 = vsel %vm1032_vm1, %v2838_v4, %v2840_v10  ;;  %v3178_v36 = vsel %vm1032_vm1, %v2840_v10, %v5096_v18  ;;  %v3109_v24 = vadd.f32 %v6382_v60, %v2980_v33 }
 0x3d8   : > { %3432 = vst.msk [vmem:[%s6377_s24 + $0x10] sm:$0xff] %vm1355_vm3, %v3400_v37  ;;  %v6459_v2 = vpop.f32.mrf.mxu0  ;;  %v4231_v0 = vpack.i.bf16 %v2841_v8, %v2839_v15  ;;  %v2850_v30 = vsel %vm1194_vm2, %v2652_v20, %v2849_v26  ;;  %v2852_v40 = vsel %vm1194_vm2, %v2849_v26, %v2851_v50  ;;  %v3182_v56 = vsel %vm1194_vm2, %v2851_v50, %v5138_v39 }
 0x3d9   : > { %v3257_v62 = vpop.f32.mrf.mxu1  ;;  %v4236_v63 = vpack.i.bf16 %v2852_v40, %v2850_v30 }
 0x3da   : > { %v3333_v28 = vadd.f32 %v3257_v62, %v3106_v14  ;;  %4232 = vrot.lane.b32.xlu0 %v4231_v0, %s4287_s19 }
 0x3db   : > { %4237 = vrot.lane.b32.xlu1 %v4236_v63, %s4288_s14  ;;  %v4193_v12 = vpop.permute.xlu1 %4192  ;;  %3179 = vrot.lane.b32.xlu2 %v3178_v36, %s4287_s19 }
 0x3dc   : > { %v3369_v44 = vadd.f32 %v6364_v54, %v3333_v28  ;;  %v4195_v23 = vunpack.i.h.bf16 %v4193_v12  ;;  %v4194_v20 = vunpack.i.l.bf16 %v4193_v12  ;;  %v4251_v28 = vld [vmem:[%s4356_s8 + $0x30] sm:$0xff] }
 0x3de   : > { %v3401_v31 = vadd.f32 %v4248_v46, %v3369_v44  ;;  %v2771_v27 = vsel %vm1355_vm3, %v6183_v41, %v4195_v23  ;;  %v2770_v6 = vsel %vm1355_vm3, %v6168_v22, %v4194_v20  ;;  %v2982_v18 = vpop.f32.mrf.mxu3 }
 0x3df   : > { %v2801_v35 = vsel %vm1388_vm4, %v2770_v6, %v4199_v11  ;;  %v2802_v7 = vsel %vm1388_vm4, %v2771_v27, %v4200_v48  ;;  %v3111_v60 = vadd.f32 %v6399_v57, %v2982_v18 }
 0x3e0   : > { %3433 = vst.msk [vmem:[%s6377_s24 + $0x18] sm:$0xff] %vm1355_vm3, %v3401_v31  ;;  %v2821_v49 = vpack.c.bf16 %v2802_v7, %v2801_v35  ;;  %v6481_v13 = vpop.f32.mrf.mxu0  ;;  %v4252_v35 = vld [vmem:[%s4356_s8 + $0x38] sm:$0xff] }
 0x3e1   : > { %v3260_v22 = vpop.f32.mrf.mxu1 }
 0x3e2   : > { %3183 = vrot.lane.b32.xlu0 %v3182_v56, %s4288_s14  ;;  %v3334_v41 = vadd.f32 %v3260_v22, %v3109_v24 }
 0x3e3   : > { %v4213_v40 = vpop.permute.xlu2 %4212 }
 0x3e4   : > { %3717 = vmatmul.msk.bf16.gmra.mxu3 %vm1525_vm5, %v2821_v49  ;;  %3758 = vmatmul.msk.bf16.gmra.mxu0 %vm1525_vm5, %v2821_v49  ;;  %v3370_v5 = vadd.f32 %v6364_v54, %v3334_v41  ;;  %v4214_v36 = vunpack.i.l.bf16 %v4213_v40 }
 0x3e5   : > { %3808 = vmatmul.msk.bf16.gmra.mxu1 %vm1525_vm5, %v2821_v49 }
 0x3e6   : > { %v3402_v53 = vadd.f32 %v4249_v16, %v3370_v5  ;;  %v2985_v39 = vpop.f32.mrf.mxu3  ;;  %v2774_v27 = vsel %vm1355_vm3, %v6246_v21, %v4214_v36  ;;  %v4253_v5 = vld [vmem:[%s4356_s8 + $0x40] sm:$0xff] }
 0x3e7   : > { %v3114_v8 = vadd.f32 %v6422_v38, %v2985_v39  ;;  %v4215_v38 = vunpack.i.h.bf16 %v4213_v40 }
 0x3e8   : > { %3434 = vst.msk [vmem:[%s6377_s24 + $0x20] sm:$0xff] %vm1355_vm3, %v3402_v53  ;;  %v3120_v42 = vpop.f32.mrf.mxu0 }
 0x3e9   : > { %v3262_v25 = vpop.f32.mrf.mxu1  ;;  %v2775_v31 = vsel %vm1355_vm3, %v6267_v61, %v4215_v38 }
 0x3ea   : > { %v3335_v19 = vadd.f32 %v3262_v25, %v3111_v60 }
 0x3eb   : > { %v4203_v52 = vpop.permute.xlu0 %4202 }
 0x3ec   : > { %v4205_v3 = vunpack.i.h.bf16 %v4203_v52  ;;  %v4204_v10 = vunpack.i.l.bf16 %v4203_v52  ;;  %v3371_v37 = vadd.f32 %v6364_v54, %v3335_v19  ;;  %v4254_v19 = vld [vmem:[%s4356_s8 + $0x48] sm:$0xff] }
 0x3ed   : > { %v4208_v9 = vpop.permute.xlu1 %4207 }
 0x3ee   : > { %v2773_v33 = vsel %vm1355_vm3, %v6227_v51, %v4205_v3  ;;  %v2772_v4 = vsel %vm1355_vm3, %v6206_v1, %v4204_v10  ;;  %v4210_v45 = vunpack.i.h.bf16 %v4208_v9  ;;  %v4209_v57 = vunpack.i.l.bf16 %v4208_v9  ;;  %v2987_v14 = vpop.f32.mrf.mxu3 }
 0x3ef   : > { %v3403_v26 = vadd.f32 %v4250_v43, %v3371_v37  ;;  %v3116_v44 = vadd.f32 %v6459_v2, %v2987_v14 }
 0x3f0   : > { %v2804_v50 = vsel %vm1388_vm4, %v2773_v33, %v4210_v45  ;;  %v2803_v15 = vsel %vm1388_vm4, %v2772_v4, %v4209_v57  ;;  %v3123_v51 = vpop.f32.mrf.mxu0  ;;  %v4255_v4 = vld [vmem:[%s4356_s8 + $0x50] sm:$0xff] }
 0x3f1   : > { %3435 = vst.msk [vmem:[%s6377_s24 + $0x28] sm:$0xff] %vm1355_vm3, %v3403_v26  ;;  %v2822_v62 = vpack.c.bf16 %v2804_v50, %v2803_v15  ;;  %v3265_v0 = vpop.f32.mrf.mxu1 }
 0x3f2   : > { %v3336_v30 = vadd.f32 %v3265_v0, %v3114_v8  ;;  %v4256_v8 = vld [vmem:[%s4356_s8 + $0x58] sm:$0xff] }
 0x3f4   : > { %3718 = vmatmul.msk.bf16.gmra.mxu3 %vm1525_vm5, %v2822_v62  ;;  %3759 = vmatmul.msk.bf16.gmra.mxu0 %vm1525_vm5, %v2822_v62  ;;  %v3372_v1 = vadd.f32 %v6364_v54, %v3336_v30 }
 0x3f5   : > { %3809 = vmatmul.msk.bf16.gmra.mxu1 %vm1525_vm5, %v2822_v62 }
 0x3f6   : > { %v3404_v63 = vadd.f32 %v4251_v28, %v3372_v1  ;;  %v2990_v55 = vpop.f32.mrf.mxu3 }
 0x3f7   : > { %v3119_v24 = vadd.f32 %v6481_v13, %v2990_v55 }
 0x3f8   : > { %3436 = vst.msk [vmem:[%s6377_s24 + $0x30] sm:$0xff] %vm1355_vm3, %v3404_v63  ;;  %v3125_v23 = vpop.f32.mrf.mxu0  ;;  %v4257_v63 = vld [vmem:[%s4356_s8 + $0x60] sm:$0xff] }
 0x3f9   : > { %v3267_v12 = vpop.f32.mrf.mxu1 }
 0x3fa   : > { %v3337_v20 = vadd.f32 %v3267_v12, %v3116_v44 }
 0x3fc   : > { %v3373_v6 = vadd.f32 %v6364_v54, %v3337_v20 }
 0x3fd   : > { %v4218_v48 = vpop.permute.xlu0 %4217 }
 0x3fe   : > { %v4220_v11 = vunpack.i.h.bf16 %v4218_v48  ;;  %v4219_v46 = vunpack.i.l.bf16 %v4218_v48  ;;  %v3405_v7 = vadd.f32 %v4252_v35, %v3373_v6  ;;  %v2992_v56 = vpop.f32.mrf.mxu3  ;;  %v4258_v48 = vld [vmem:[%s4356_s8 + $0x68] sm:$0xff]  ;;  %v4259_v35 = vld [vmem:[%s4356_s8 + $0x70] sm:$0xff] }
 0x3ff   : > { %v3121_v13 = vadd.f32 %v3120_v42, %v2992_v56 }
 0x400   : > { %v2806_v2 = vsel %vm1388_vm4, %v2775_v31, %v4220_v11  ;;  %v2805_v18 = vsel %vm1388_vm4, %v2774_v27, %v4219_v46  ;;  %3437 = vst.msk [vmem:[%s6377_s24 + $0x38] sm:$0xff] %vm1355_vm3, %v3405_v7  ;;  %v3128_v21 = vpop.f32.mrf.mxu0 }
 0x401   : > { %v2823_v49 = vpack.c.bf16 %v2806_v2, %v2805_v18  ;;  %v3270_v61 = vpop.f32.mrf.mxu1 }
 0x402   : > { %v3338_v22 = vadd.f32 %v3270_v61, %v3119_v24 }
 0x404   : > { %3719 = vmatmul.msk.bf16.gmra.mxu3 %vm1525_vm5, %v2823_v49  ;;  %3760 = vmatmul.msk.bf16.gmra.mxu0 %vm1525_vm5, %v2823_v49  ;;  %v3374_v41 = vadd.f32 %v6364_v54, %v3338_v22 }
 0x405   : > { %3810 = vmatmul.msk.bf16.gmra.mxu1 %vm1525_vm5, %v2823_v49 }
 0x406   : > { %v3406_v16 = vadd.f32 %v4253_v5, %v3374_v41  ;;  %v2995_v53 = vpop.f32.mrf.mxu3 }
 0x407   : > { %v3124_v9 = vadd.f32 %v3123_v51, %v2995_v53 }
 0x408   : > { %3438 = vst.msk [vmem:[%s6377_s24 + $0x40] sm:$0xff] %vm1355_vm3, %v3406_v16  ;;  %v3130_v52 = vpop.f32.mrf.mxu0 }
 0x409   : > { %v3272_v39 = vpop.f32.mrf.mxu1 }
 0x40a   : > { %v3339_v60 = vadd.f32 %v3272_v39, %v3121_v13 }
 0x40c   : > { %v3375_v25 = vadd.f32 %v6364_v54, %v3339_v60 }
 0x40e   : > { %v3407_v3 = vadd.f32 %v4254_v19, %v3375_v25  ;;  %v2997_v10 = vpop.f32.mrf.mxu3 }
 0x40f   : > { %v3126_v43 = vadd.f32 %v3125_v23, %v2997_v10 }
 0x410   : > { %3439 = vst.msk [vmem:[%s6377_s24 + $0x48] sm:$0xff] %vm1355_vm3, %v3407_v3  ;;  %v3133_v26 = vpop.f32.mrf.mxu0 }
 0x411   : > { %v3275_v37 = vpop.f32.mrf.mxu1 }
 0x412   : > { %v3340_v33 = vadd.f32 %v3275_v37, %v3124_v9 }
 0x414   : > { %v3376_v42 = vadd.f32 %v6364_v54, %v3340_v33 }
 0x416   : > { %v3408_v45 = vadd.f32 %v4255_v4, %v3376_v42  ;;  %v3000_v57 = vpop.f32.mrf.mxu3 }
 0x417   : > { %v3129_v0 = vadd.f32 %v3128_v21, %v3000_v57  ;;  %v4260_v21 = vld [vmem:[%s4356_s8 + $0x78] sm:$0xff] }
 0x418   : > { %3440 = vst.msk [vmem:[%s6377_s24 + $0x50] sm:$0xff] %vm1355_vm3, %v3408_v45  ;;  %v3135_v1 = vpop.f32.mrf.mxu0  ;;  %v4261_v45 = vld [vmem:[%s4356_s8 + $0x80] sm:$0xff] }
 0x419   : > { %v3277_v50 = vpop.f32.mrf.mxu1 }
 0x41a   : > { %v3341_v14 = vadd.f32 %v3277_v50, %v3126_v43 }
 0x41c   : > { %v3377_v15 = vadd.f32 %v6364_v54, %v3341_v14 }
 0x41e   : > { %v3409_v62 = vadd.f32 %v4256_v8, %v3377_v15  ;;  %v3002_v51 = vpop.f32.mrf.mxu3 }
 0x41f   : > { %v3131_v36 = vadd.f32 %v3130_v52, %v3002_v51 }
 0x420   : > { %3441 = vst.msk [vmem:[%s6377_s24 + $0x58] sm:$0xff] %vm1355_vm3, %v3409_v62  ;;  %v3138_v23 = vpop.f32.mrf.mxu0 }
 0x421   : > { %v3280_v30 = vpop.f32.mrf.mxu1 }
 0x422   : > { %v3342_v40 = vadd.f32 %v3280_v30, %v3129_v0 }
 0x424   : > { %v3378_v28 = vadd.f32 %v6364_v54, %v3342_v40 }
 0x426   : > { %v3410_v55 = vadd.f32 %v4257_v63, %v3378_v28  ;;  %v3005_v38 = vpop.f32.mrf.mxu3  ;;  %v4262_v63 = vld [vmem:[%s4356_s8 + $0x88] sm:$0xff] }
 0x427   : > { %v3134_v31 = vadd.f32 %v3133_v26, %v3005_v38 }
 0x428   : > { %3442 = vst.msk [vmem:[%s6377_s24 + $0x60] sm:$0xff] %vm1355_vm3, %v3410_v55  ;;  %v3140_v18 = vpop.f32.mrf.mxu0 }
 0x429   : > { %v3282_v44 = vpop.f32.mrf.mxu1 }
 0x42a   : > { %v3343_v12 = vadd.f32 %v3282_v44, %v3131_v36 }
 0x42c   : > { %v3379_v20 = vadd.f32 %v6364_v54, %v3343_v12 }
 0x42d   : > { %v4228_v16 = vpop.permute.xlu2 %4227 }
 0x42e   : > { %v3411_v11 = vadd.f32 %v4258_v48, %v3379_v20  ;;  %v3007_v46 = vpop.f32.mrf.mxu3  ;;  %v4230_v3 = vunpack.i.h.bf16 %v4228_v16  ;;  %v4229_v10 = vunpack.i.l.bf16 %v4228_v16 }
 0x42f   : > { %v3136_v56 = vadd.f32 %v3135_v1, %v3007_v46  ;;  %v4263_v46 = vld [vmem:[%s4356_s8 + $0x90] sm:$0xff] }
 0x430   : > { %3443 = vst.msk [vmem:[%s6377_s24 + $0x68] sm:$0xff] %vm1355_vm3, %v3411_v11  ;;  %v3143_v53 = vpop.f32.mrf.mxu0 }
 0x431   : > { %v3285_v27 = vpop.f32.mrf.mxu1 }
 0x432   : > { %v3344_v6 = vadd.f32 %v3285_v27, %v3134_v31 }
 0x434   : > { %v3380_v2 = vadd.f32 %v6364_v54, %v3344_v6 }
 0x436   : > { %v3412_v7 = vadd.f32 %v4259_v35, %v3380_v2  ;;  %v3010_v49 = vpop.f32.mrf.mxu3  ;;  %v4264_v35 = vld [vmem:[%s4356_s8 + $0x98] sm:$0xff] }
 0x437   : > { %v3139_v13 = vadd.f32 %v3138_v23, %v3010_v49 }
 0x438   : > { %3444 = vst.msk [vmem:[%s6377_s24 + $0x70] sm:$0xff] %vm1355_vm3, %v3412_v7  ;;  %v3145_v15 = vpop.f32.mrf.mxu0 }
 0x439   : > { %v3287_v24 = vpop.f32.mrf.mxu1 }
 0x43a   : > { %v3345_v61 = vadd.f32 %v3287_v24, %v3136_v56  ;;  %v3180_v24 = vpop.permute.xlu2 %3179 }
 0x43c   : > { %v3381_v22 = vadd.f32 %v6364_v54, %v3345_v61 }
 0x43e   : > { %v3413_v41 = vadd.f32 %v4260_v21, %v3381_v22  ;;  %v3012_v5 = vpop.f32.mrf.mxu3 }
 0x43f   : > { %v3141_v50 = vadd.f32 %v3140_v18, %v3012_v5 }
 0x440   : > { %3445 = vst.msk [vmem:[%s6377_s24 + $0x78] sm:$0xff] %vm1355_vm3, %v3413_v41  ;;  %v3148_v11 = vpop.f32.mrf.mxu0  ;;  %v2335_v41 = vsel %vm733_vm0, %v2299_v58, 0.0 }
 0x441   : > { %v3290_v39 = vpop.f32.mrf.mxu1  ;;  %v3186_v16 = vsel %vm1355_vm3, %v2335_v41, %v3180_v24 }
 0x442   : > { %v3346_v25 = vadd.f32 %v3290_v39, %v3139_v13  ;;  %v4265_v39 = vld [vmem:[%s4356_s8 + $0xa0] sm:$0xff] }
 0x443   : > { %v4223_v60 = vpop.permute.xlu1 %4222 }
 0x444   : > { %v4225_v52 = vunpack.i.h.bf16 %v4223_v60  ;;  %v4224_v19 = vunpack.i.l.bf16 %v4223_v60  ;;  %v3382_v9 = vadd.f32 %v6364_v54, %v3346_v25 }
 0x446   : > { %v2777_v37 = vsel %vm1355_vm3, %v6322_v17, %v4225_v52  ;;  %v2776_v33 = vsel %vm1355_vm3, %v6288_v47, %v4224_v19  ;;  %v3414_v57 = vadd.f32 %v4261_v45, %v3382_v9  ;;  %v3015_v43 = vpop.f32.mrf.mxu3  ;;  %v4266_v9 = vld [vmem:[%s4356_s8 + $0xa8] sm:$0xff] }
 0x447   : > { %v2807_v42 = vsel %vm1388_vm4, %v2776_v33, %v4229_v10  ;;  %v2808_v4 = vsel %vm1388_vm4, %v2777_v37, %v4230_v3  ;;  %v3144_v23 = vadd.f32 %v3143_v53, %v3015_v43  ;;  %v4267_v43 = vld [vmem:[%s4356_s8 + $0xb0] sm:$0xff] }
 0x448   : > { %v2824_v26 = vpack.c.bf16 %v2808_v4, %v2807_v42  ;;  %3446 = vst.msk [vmem:[%s6377_s24 + $0x80] sm:$0xff] %vm1355_vm3, %v3414_v57  ;;  %v3150_v56 = vpop.f32.mrf.mxu0 }
 0x449   : > { %v3292_v17 = vpop.f32.mrf.mxu1 }
 0x44a   : > { %3720 = vmatmul.msk.bf16.gmra.mxu3 %vm1525_vm5, %v2824_v26  ;;  %3761 = vmatmul.msk.bf16.gmra.mxu0 %vm1525_vm5, %v2824_v26  ;;  %v3347_v47 = vadd.f32 %v3292_v17, %v3141_v50 }
 0x44b   : > { %3811 = vmatmul.msk.bf16.gmra.mxu1 %vm1525_vm5, %v2824_v26 }
 0x44c   : > { %v4233_v14 = vpop.permute.xlu0 %4232  ;;  %v3383_v0 = vadd.f32 %v6364_v54, %v3347_v47 }
 0x44d   : > { %v4235_v8 = vunpack.i.h.bf16 %v4233_v14  ;;  %v4234_v62 = vunpack.i.l.bf16 %v4233_v14  ;;  %v4238_v51 = vpop.permute.xlu1 %4237 }
 0x44e   : > { %v4240_v30 = vunpack.i.h.bf16 %v4238_v51  ;;  %v4239_v1 = vunpack.i.l.bf16 %v4238_v51  ;;  %v3415_v55 = vadd.f32 %v4262_v63, %v3383_v0  ;;  %v3017_v44 = vpop.f32.mrf.mxu3  ;;  %v4269_v63 = vld [vmem:[%s4356_s8 + $0xc0] sm:$0xff] }
 0x44f   : > { %v2860_v40 = vsel %vm1355_vm3, %v6457_v34, %v4235_v8  ;;  %v2859_v28 = vsel %vm1355_vm3, %v6414_v59, %v4234_v62  ;;  %v3146_v27 = vadd.f32 %v3145_v15, %v3017_v44  ;;  %v4268_v62 = vld [vmem:[%s4356_s8 + $0xb8] sm:$0xff] }
 0x450   : > { %v2861_v38 = vsel %vm1388_vm4, %v2859_v28, %v4239_v1  ;;  %v2862_v36 = vsel %vm1388_vm4, %v2860_v40, %v4240_v30  ;;  %3447 = vst.msk [vmem:[%s6377_s24 + $0x88] sm:$0xff] %vm1355_vm3, %v3415_v55 }
 0x451   : > { %v2863_v12 = vpack.c.bf16 %v2862_v36, %v2861_v38  ;;  %v3153_v32 = vpop.f32.mrf.mxu0 }
 0x452   : > { %v3295_v20 = vpop.f32.mrf.mxu1 }
 0x453   : > { %v3348_v48 = vadd.f32 %v3295_v20, %v3144_v23  ;;  %v4270_v20 = vld [vmem:[%s4356_s8 + $0xc8] sm:$0xff] }
 0x454   : > { %v3184_v22 = vpop.permute.xlu0 %3183 }
 0x455   : > { %v3384_v34 = vadd.f32 %v6364_v54, %v3348_v48  ;;  %v3187_v53 = vsel %vm1388_vm4, %v3186_v16, %v3184_v22 }
 0x456   : > { %v3188_v25 = vpack.c.bf16 %v5400_v29, %v3187_v53 }
 0x457   : > { %v3416_v59 = vadd.f32 %v4263_v46, %v3384_v34  ;;  %v3020_v31 = vpop.f32.mrf.mxu3 }
 0x458   : > { %v3149_v61 = vadd.f32 %v3148_v11, %v3020_v31 }
 0x459   : > { %3448 = vst.msk [vmem:[%s6377_s24 + $0x90] sm:$0xff] %vm1355_vm3, %v3416_v59  ;;  %v3155_v45 = vpop.f32.mrf.mxu0 }
 0x45a   : > { %3721 = vmatmul.msk.bf16.gmra.mxu3 %vm1525_vm5, %v2863_v12  ;;  %v3297_v6 = vpop.f32.mrf.mxu1 }
 0x45b   : > { %3812 = vmatmul.msk.bf16.gmra.mxu1 %vm1525_vm5, %v2863_v12  ;;  %v3349_v2 = vadd.f32 %v3297_v6, %v3146_v27 }
 0x45d   : > { %v3385_v18 = vadd.f32 %v6364_v54, %v3349_v2 }
 0x45f   : > { %v3417_v7 = vadd.f32 %v4264_v35, %v3385_v18  ;;  %v3022_v49 = vpop.f32.mrf.mxu3  ;;  %v4271_v18 = vld [vmem:[%s4356_s8 + $0xd0] sm:$0xff] }
 0x460   : > { %v3151_v19 = vadd.f32 %v3150_v56, %v3022_v49 }
 0x461   : > { %3449 = vst.msk [vmem:[%s6377_s24 + $0x98] sm:$0xff] %vm1355_vm3, %v3417_v7  ;;  %v3158_v8 = vpop.f32.mrf.mxu0 }
 0x462   : > { %v3300_v21 = vpop.f32.mrf.mxu1 }
 0x463   : > { %v3350_v5 = vadd.f32 %v3300_v21, %v3149_v61  ;;  %v4272_v21 = vld [vmem:[%s4356_s8 + $0xd8] sm:$0xff] }
 0x465   : > { %v3386_v13 = vadd.f32 %v6364_v54, %v3350_v5 }
 0x467   : > { %v3418_v60 = vadd.f32 %v4265_v39, %v3386_v13  ;;  %v3025_v52 = vpop.f32.mrf.mxu3 }
 0x468   : > { %v3154_v33 = vadd.f32 %v3153_v32, %v3025_v52 }
 0x469   : > { %3450 = vst.msk [vmem:[%s6377_s24 + $0xa0] sm:$0xff] %vm1355_vm3, %v3418_v60  ;;  %v3160_v38 = vpop.f32.mrf.mxu0 }
 0x46a   : > { %v3302_v58 = vpop.f32.mrf.mxu1 }
 0x46b   : > { %3813 = vmatmul.msk.bf16.gmra.mxu1 %vm1525_vm5, %v3188_v25  ;;  %v3351_v3 = vadd.f32 %v3302_v58, %v3151_v19  ;;  %v4273_v25 = vld [vmem:[%s4356_s8 + $0xe0] sm:$0xff] }
 0x46d   : > { %v3387_v10 = vadd.f32 %v6364_v54, %v3351_v3 }
 0x46f   : > { %v3419_v37 = vadd.f32 %v4266_v9, %v3387_v10  ;;  %v3027_v29 = vpop.f32.mrf.mxu3 }
 0x470   : > { %v3156_v50 = vadd.f32 %v3155_v45, %v3027_v29 }
 0x471   : > { %3451 = vst.msk [vmem:[%s6377_s24 + $0xa8] sm:$0xff] %vm1355_vm3, %v3419_v37  ;;  %v3163_v11 = vpop.f32.mrf.mxu0  ;;  %v4274_v37 = vld [vmem:[%s4356_s8 + $0xe8] sm:$0xff] }
 0x472   : > { %v3305_v42 = vpop.f32.mrf.mxu1 }
 0x473   : > { %v3352_v4 = vadd.f32 %v3305_v42, %v3154_v33 }
 0x475   : > { %v3388_v57 = vadd.f32 %v6364_v54, %v3352_v4 }
 0x477   : > { %v3420_v26 = vadd.f32 %v4267_v43, %v3388_v57  ;;  %v3030_v14 = vpop.f32.mrf.mxu3  ;;  %v4275_v43 = vld [vmem:[%s4356_s8 + $0xf0] sm:$0xff] }
 0x478   : > { %v3159_v0 = vadd.f32 %v3158_v8, %v3030_v14  ;;  %v4276_v8 = vld [vmem:[%s4356_s8 + $0xf8] sm:$0xff] }
 0x479   : > { %3452 = vst.msk [vmem:[%s6377_s24 + $0xb0] sm:$0xff] %vm1355_vm3, %v3420_v26  ;;  %v3165_v31 = vpop.f32.mrf.mxu0 }
 0x47a   : > { %v3307_v17 = vpop.f32.mrf.mxu1 }
 0x47b   : > { %v3353_v47 = vadd.f32 %v3307_v17, %v3156_v50 }
 0x47d   : > { %v3389_v15 = vadd.f32 %v6364_v54, %v3353_v47 }
 0x47f   : > { %v3421_v51 = vadd.f32 %v4268_v62, %v3389_v15  ;;  %v3032_v28 = vpop.f32.mrf.mxu3 }
 0x480   : > { %v3161_v36 = vadd.f32 %v3160_v38, %v3032_v28 }
 0x481   : > { %3453 = vst.msk [vmem:[%s6377_s24 + $0xb8] sm:$0xff] %vm1355_vm3, %v3421_v51  ;;  %v3168_v61 = vpop.f32.mrf.mxu0 }
 0x482   : > { %v3310_v30 = vpop.f32.mrf.mxu1 }
 0x483   : > { %v3354_v1 = vadd.f32 %v3310_v30, %v3159_v0 }
 0x485   : > { %v3390_v40 = vadd.f32 %v6364_v54, %v3354_v1 }
 0x487   : > { %v3422_v55 = vadd.f32 %v4269_v63, %v3390_v40  ;;  %v3035_v34 = vpop.f32.mrf.mxu3 }
 0x488   : > { %v3164_v59 = vadd.f32 %v3163_v11, %v3035_v34 }
 0x489   : > { %3454 = vst.msk [vmem:[%s6377_s24 + $0xc0] sm:$0xff] %vm1355_vm3, %v3422_v55  ;;  %v3170_v60 = vpop.f32.mrf.mxu0 }
 0x48a   : > { %v3312_v44 = vpop.f32.mrf.mxu1 }
 0x48b   : > { %v3355_v12 = vadd.f32 %v3312_v44, %v3161_v36 }
 0x48d   : > { %v3391_v23 = vadd.f32 %v6364_v54, %v3355_v12 }
 0x48f   : > { %v3423_v48 = vadd.f32 %v4270_v20, %v3391_v23  ;;  %v3037_v46 = vpop.f32.mrf.mxu3 }
 0x490   : > { %v3166_v49 = vadd.f32 %v3165_v31, %v3037_v46 }
 0x491   : > { %3455 = vst.msk [vmem:[%s6377_s24 + $0xc8] sm:$0xff] %vm1355_vm3, %v3423_v48 }
 0x4c7   : > { %v3173_v9 = vpop.f32.mrf.mxu0 }
 0x4c8   : > { %v3315_v27 = vpop.f32.mrf.mxu1 }
 0x4c9   : > { %v3356_v6 = vadd.f32 %v3315_v27, %v3164_v59 }
 0x4cb   : > { %v3392_v2 = vadd.f32 %v6364_v54, %v3356_v6 }
 0x4cd   : > { %v3424_v35 = vadd.f32 %v4271_v18, %v3392_v2  ;;  %v3040_v7 = vpop.f32.mrf.mxu3 }
 0x4ce   : > { %v3169_v5 = vadd.f32 %v3168_v61, %v3040_v7 }
 0x4cf   : > { %3456 = vst.msk [vmem:[%s6377_s24 + $0xd0] sm:$0xff] %vm1355_vm3, %v3424_v35  ;;  %v3175_v50 = vpop.f32.mrf.mxu0 }
 0x4d0   : > { %v3317_v56 = vpop.f32.mrf.mxu1 }
 0x4d1   : > { %v3357_v24 = vadd.f32 %v3317_v56, %v3166_v49 }
 0x4d3   : > { %v3393_v22 = vadd.f32 %v6364_v54, %v3357_v24 }
 0x4d5   : > { %v3425_v41 = vadd.f32 %v4272_v21, %v3393_v22  ;;  %v3042_v16 = vpop.f32.mrf.mxu3 }
 0x4d6   : > { %v3171_v19 = vadd.f32 %v3170_v60, %v3042_v16 }
 0x4d7   : > { %3457 = vst.msk [vmem:[%s6377_s24 + $0xd8] sm:$0xff] %vm1355_vm3, %v3425_v41 }
 0x4d8   : > { %v3320_v53 = vpop.f32.mrf.mxu1 }
 0x4d9   : > { %v3358_v13 = vadd.f32 %v3320_v53, %v3169_v5 }
 0x4db   : > { %v3394_v39 = vadd.f32 %v6364_v54, %v3358_v13 }
 0x4dd   : > { %v3426_v52 = vadd.f32 %v4273_v25, %v3394_v39  ;;  %v3045_v3 = vpop.f32.mrf.mxu3 }
 0x4de   : > { %v3174_v29 = vadd.f32 %v3173_v9, %v3045_v3 }
 0x4df   : > { %3458 = vst.msk [vmem:[%s6377_s24 + $0xe0] sm:$0xff] %vm1355_vm3, %v3426_v52 }
 0x4e0   : > { %v3322_v32 = vpop.f32.mrf.mxu1 }
 0x4e1   : > { %v3359_v58 = vadd.f32 %v3322_v32, %v3171_v19 }
 0x4e3   : > { %v3395_v10 = vadd.f32 %v6364_v54, %v3359_v58 }
 0x4e5   : > { %v3427_v33 = vadd.f32 %v4274_v37, %v3395_v10  ;;  %v3047_v57 = vpop.f32.mrf.mxu3 }
 0x4e6   : > { %v3176_v17 = vadd.f32 %v3175_v50, %v3047_v57 }
 0x4e7   : > { %3459 = vst.msk [vmem:[%s6377_s24 + $0xe8] sm:$0xff] %vm1355_vm3, %v3427_v33 }
 0x4e8   : > { %v3325_v42 = vpop.f32.mrf.mxu1 }
 0x4e9   : > { %v3360_v4 = vadd.f32 %v3325_v42, %v3174_v29 }
 0x4eb   : > { %v3396_v45 = vadd.f32 %v6364_v54, %v3360_v4 }
 0x4ed   : > { %v3428_v26 = vadd.f32 %v4275_v43, %v3396_v45 }
 0x4ef   : > { %3460 = vst.msk [vmem:[%s6377_s24 + $0xf0] sm:$0xff] %vm1355_vm3, %v3428_v26 }
 0x4f0   : > { %v3327_v47 = vpop.f32.mrf.mxu1 }
 0x4f1   : > { %v3361_v14 = vadd.f32 %v3327_v47, %v3176_v17 }
 0x4f3   : > { %v3397_v15 = vadd.f32 %v6364_v54, %v3361_v14 }
 0x4f5   : > { %v3429_v62 = vadd.f32 %v4276_v8, %v3397_v15 }
 0x4f7   : > { %3461 = vst.msk [vmem:[%s6377_s24 + $0xf8] sm:$0xff] %vm1355_vm3, %v3429_v62 }
 0x4f8 PF: > { %s16_s21 = sadd.s32 1, %s4283_s21  }
 0x4f9   : > { %p13_p4 = scmp.ge.s32.totalorder %s16_s21, 4  }
 0x4fb   :  { %15 = sbr.rel (!%p13_p4) target bundleno = 1 (0x1), region = 78 }

</bundles_post_ra>
